<compile_context>
chip_gen: v6e
topology: v6e:2x2x1
jax: 0.10.0
libtpu: 0.0.40
codegen_flags: <defaults>
</compile_context>

<pallas_src>
import functools
import math

import jax
import jax.numpy as jnp
from jax import lax
from jax.experimental import pallas as pl
from jax.experimental.pallas import tpu as pltpu


def _spade_kernel(x_ref, seg_ref, mean_ref, rstd_ref, ws_ref, bs_ref,
                  wgb_ref, bg_ref, bb_ref, out_ref, actv_ref,
                  *, TH, W, groups, leaky_slope):
    f32 = jnp.float32
    t = pl.program_id(1)
    n_tiles = pl.num_programs(1)
    Cn = x_ref.shape[-1]                 # norm_nc
    Cpg = Cn // groups                   # gamma/beta output channels per group
    NH = 128                             # hidden channels per group (nhidden = 128 * groups)
    nh = NH * groups
    Clpg_p = seg_ref.shape[-1]           # zero-padded seg channels per group
    HWp = (TH + 2) * W                   # activation pixels incl. the 1-row halo on each side
    HW = TH * W

    # ---- mlp_shared: 9 shift-and-accumulate MXU matmuls per group, straight from the
    # (TH+4, W+2, Clpg_p) seg halo block (in-kernel im2col).  The 1-row activation halo the
    # gamma/beta conv needs is recomputed here (cheap: (TH+2)/TH redundancy on mlp_shared). ----
    for g in range(groups):
        acc = jnp.zeros((HWp, NH), f32)
        for ky in range(3):
            for kx in range(3):
                patch = seg_ref[0, g, ky:ky + TH + 2, kx:kx + W, :]
                acc = acc + jnp.dot(patch.reshape(HWp, Clpg_p),
                                    ws_ref[ky * 3 + kx, g],
                                    preferred_element_type=f32)
        a = acc + bs_ref[:, g * NH:(g + 1) * NH]
        a = jnp.where(a >= 0, a, leaky_slope * a)
        # bf16 scratch: identical numerics to casting at the gamma/beta dot; halves VMEM + loads.
        actv_ref[0:TH + 2, 1:1 + W, g * NH:(g + 1) * NH] = (
            a.reshape(TH + 2, W, NH).astype(actv_ref.dtype))

    # ---- halo zeroing: only the 1-wide frame the 3x3 taps actually read.  Columns every step
    # (megacore-safe); top/bottom rows only at the image boundary tiles. ----
    zcol = jnp.zeros((TH + 2, 1, nh), actv_ref.dtype)
    actv_ref[:, 0:1, :] = zcol
    actv_ref[:, W + 1:W + 2, :] = zcol

    @pl.when(t == 0)                      # activation row -1 is conv zero-padding
    def _zero_top():
        actv_ref[0:1, :, :] = jnp.zeros((1, W + 2, nh), actv_ref.dtype)

    @pl.when(t == n_tiles - 1)            # activation row H is conv zero-padding
    def _zero_bottom():
        actv_ref[TH + 1:TH + 2, :, :] = jnp.zeros((1, W + 2, nh), actv_ref.dtype)

    # ---- mlp_gamma ++ mlp_beta (fused weights) + per-group fused epilogue ----
    # TODO(synk): when G*2*Cpg <= 256, fuse groups block-diagonally per tap (one matmul per tap)
    # to better fill the 256-wide MXU on v6e/v7x.
    for g in range(groups):
        acc = jnp.zeros((HW, 2 * Cpg), f32)
        for ky in range(3):
            for kx in range(3):
                patch = actv_ref[ky:ky + TH, kx:kx + W, g * NH:(g + 1) * NH]
                acc = acc + jnp.dot(patch.reshape(HW, NH),
                                    wgb_ref[ky * 3 + kx, g],
                                    preferred_element_type=f32)
        c0, c1 = g * Cpg, (g + 1) * Cpg
        gamma = acc[:, :Cpg] + bg_ref[:, c0:c1]
        beta = acc[:, Cpg:] + bb_ref[:, c0:c1]
        xn = (x_ref[0, :, :, c0:c1].reshape(HW, Cpg).astype(f32)
              - mean_ref[0, :, c0:c1]) * rstd_ref[0, :, c0:c1]
        out = xn * (1.0 + gamma) + beta
        # TODO(synk): for norm_nc < 128 a lane-dense (C, pixels) output layout would avoid masked
        # partial stores; kept pixel-major (TH, W, C) here to match the matmul-natural layout.
        out_ref[0, :, :, c0:c1] = out.reshape(TH, W, Cpg).astype(out_ref.dtype)


def _nearest_resize_nchw(seg, H, W):
    # nearest-neighbor resize to (H, W); src_idx = floor(dst_idx * src/dst) (PyTorch 'nearest')
    N, C, Hs, Ws = seg.shape
    ridx = (jnp.arange(H) * Hs) // H
    cidx = (jnp.arange(W) * Ws) // W
    return seg[:, :, ridx[:, None], cidx[None, :]]


def _pick_row_tile(H):
    # row tile is a tunable; 16 keeps per-step live values small at production sizes
    for th in (16, 8, 4, 2, 1):
        if H % th == 0:
            return th
    return H


def spade_grouped_pallas(x, segmap, params, *, groups=1, ks=3, eps=1e-5,
                         leaky_slope=0.2, row_tile=None):
    assert ks == 3, "kernel implements ks=3 (module default)"
    N, Cn, H, W = x.shape
    label_nc = segmap.shape[1]
    G = groups
    assert label_nc % G == 0 and Cn % G == 0
    Clpg = label_nc // G
    Cpg = Cn // G
    nh = 128 * G
    TH = row_tile if row_tile is not None else _pick_row_tile(H)
    assert H % TH == 0
    T = H // TH
    Clpg_p = max(8, ((Clpg + 7) // 8) * 8)   # pad seg K-dim per group to a sublane multiple

    # ---- plain-JAX glue: hoisted instance-norm stats, nearest resize, halo-tiled padded seg ----
    x_nhwc = jnp.transpose(x, (0, 2, 3, 1)).astype(jnp.float32)            # (N, H, W, Cn)
    mean = jnp.mean(x_nhwc, axis=(1, 2))                                   # (N, Cn)
    var = jnp.mean((x_nhwc - mean[:, None, None, :]) ** 2, axis=(1, 2))    # biased variance
    rstd = lax.rsqrt(var + eps)
    mean = mean.reshape(N, 1, Cn).astype(jnp.float32)
    rstd = rstd.reshape(N, 1, Cn).astype(jnp.float32)

    seg_r = _nearest_resize_nchw(segmap, H, W)                             # (N, label_nc, H, W)
    seg_nhwc = jnp.transpose(seg_r, (0, 2, 3, 1)).astype(jnp.float32)
    seg_g = jnp.transpose(seg_nhwc.reshape(N, H, W, G, Clpg), (0, 3, 1, 2, 4))  # (N,G,H,W,Clpg)
    if Clpg_p != Clpg:
        seg_g = jnp.pad(seg_g, ((0, 0),) * 4 + ((0, Clpg_p - Clpg),))
    seg_gp = jnp.pad(seg_g, ((0, 0), (0, 0), (2, 2), (1, 1), (0, 0)))      # 2-row / 1-col zero pad
    seg_tiles = jnp.stack([seg_gp[:, :, t * TH:t * TH + TH + 4] for t in range(T)], axis=1)
    seg_tiles = seg_tiles.reshape(N * T, G, TH + 4, W + 2, Clpg_p).astype(jnp.bfloat16)

    # ---- weights in tap-major matmul layout (bf16 MXU operands) ----
    w_s = params['w_shared']                                               # (128*G, Clpg, 3, 3)
    ws_list = []
    for g in range(G):
        wg = jnp.transpose(w_s[g * 128:(g + 1) * 128], (2, 3, 1, 0)).reshape(9, Clpg, 128)
        if Clpg_p != Clpg:
            wg = jnp.pad(wg, ((0, 0), (0, Clpg_p - Clpg), (0, 0)))
        ws_list.append(wg)
    ws = jnp.stack(ws_list, axis=1).astype(jnp.bfloat16)                   # (9, G, Clpg_p, 128)

    w_g, w_b = params['w_gamma'], params['w_beta']                         # (Cn, 128, 3, 3)
    wgb_list = []
    for g in range(G):
        gg = jnp.transpose(w_g[g * Cpg:(g + 1) * Cpg], (2, 3, 1, 0))       # (3, 3, 128, Cpg)
        bb_ = jnp.transpose(w_b[g * Cpg:(g + 1) * Cpg], (2, 3, 1, 0))
        wgb_list.append(jnp.concatenate([gg, bb_], axis=-1).reshape(9, 128, 2 * Cpg))
    wgb = jnp.stack(wgb_list, axis=1).astype(jnp.bfloat16)                 # (9, G, 128, 2*Cpg)

    bs = params['b_shared'].reshape(1, nh).astype(jnp.float32)
    bg = params['b_gamma'].reshape(1, Cn).astype(jnp.float32)
    bb = params['b_beta'].reshape(1, Cn).astype(jnp.float32)

    # ---- VMEM budget: actual per-step working set, capped by the generation's physical VMEM ----
    def _nbytes(shape, dtype):
        return math.prod(shape) * jnp.dtype(dtype).itemsize

    est = (_nbytes((TH + 2, W + 2, nh), jnp.bfloat16)                      # actv scratch
           + 2 * (2 * _nbytes((TH, W, Cn), jnp.float32)                    # x + out blocks (dbl-buf)
                  + _nbytes((G, TH + 4, W + 2, Clpg_p), jnp.bfloat16)
                  + _nbytes(ws.shape, jnp.bfloat16) + _nbytes(wgb.shape, jnp.bfloat16)
                  + _nbytes(bs.shape, jnp.float32) + 2 * _nbytes(bg.shape, jnp.float32)
                  + 2 * _nbytes(mean.shape, jnp.float32))
           + _nbytes(((TH + 2) * W, 128), jnp.float32)                     # mlp_shared accumulator
           + 4 * _nbytes((TH * W, 2 * Cpg), jnp.float32))                  # gamma/beta acc + epilogue
    try:
        vmem_cap = int(getattr(pltpu.get_tpu_info(), 'vmem_capacity_bytes', 64 * 1024 * 1024))
    except Exception:
        vmem_cap = 64 * 1024 * 1024                                        # v7x per-TC floor
    vmem_limit = int(min(max(2 * est, 32 * 1024 * 1024), int(vmem_cap * 0.8)))

    kernel = functools.partial(_spade_kernel, TH=TH, W=W, groups=G, leaky_slope=leaky_slope)

    # TODO(synk): if the x/seg input DMA is still exposed in the profile at production sizes,
    # add pipeline_mode=pl.Buffered(3) on those in_specs (VMEM budget permitting).
    out_nhwc = pl.pallas_call(
        kernel,
        out_shape=jax.ShapeDtypeStruct((N, H, W, Cn), jnp.float32),
        grid_spec=pltpu.PrefetchScalarGridSpec(
            num_scalar_prefetch=0,
            grid=(N, T),
            in_specs=[
                pl.BlockSpec((1, TH, W, Cn), lambda n, t: (n, t, 0, 0)),
                pl.BlockSpec((1, G, TH + 4, W + 2, Clpg_p),
                             lambda n, t, _T=T: (n * _T + t, 0, 0, 0, 0)),
                pl.BlockSpec((1, 1, Cn), lambda n, t: (n, 0, 0)),
                pl.BlockSpec((1, 1, Cn), lambda n, t: (n, 0, 0)),
                pl.BlockSpec((9, G, Clpg_p, 128), lambda n, t: (0, 0, 0, 0)),
                pl.BlockSpec((1, nh), lambda n, t: (0, 0)),
                pl.BlockSpec((9, G, 128, 2 * Cpg), lambda n, t: (0, 0, 0, 0)),
                pl.BlockSpec((1, Cn), lambda n, t: (0, 0)),
                pl.BlockSpec((1, Cn), lambda n, t: (0, 0)),
            ],
            out_specs=pl.BlockSpec((1, TH, W, Cn), lambda n, t: (n, t, 0, 0)),
            scratch_shapes=[pltpu.VMEM((TH + 2, W + 2, nh), jnp.bfloat16)],
        ),
        compiler_params=pltpu.CompilerParams(
            dimension_semantics=("parallel", "parallel"),
            vmem_limit_bytes=vmem_limit),
    )(x_nhwc, seg_tiles, mean, rstd, ws, bs, wgb, bg, bb)

    return jnp.transpose(out_nhwc, (0, 3, 1, 2))


def spade_grouped_reference(x, segmap, params, *, groups=1, eps=1e-5, leaky_slope=0.2):
    # pure-JAX reference (NCHW / OIHW), mirrors the PyTorch module semantics
    seg = _nearest_resize_nchw(segmap, x.shape[2], x.shape[3])
    mean = jnp.mean(x, axis=(2, 3), keepdims=True)
    var = jnp.mean((x - mean) ** 2, axis=(2, 3), keepdims=True)
    normalized = (x - mean) * lax.rsqrt(var + eps)

    def conv(inp, w, b):
        out = lax.conv_general_dilated(
            inp, w, window_strides=(1, 1), padding=((1, 1), (1, 1)),
            dimension_numbers=('NCHW', 'OIHW', 'NCHW'),
            feature_group_count=groups)
        return out + b[None, :, None, None]

    actv = conv(seg, params['w_shared'], params['b_shared'])
    actv = jnp.where(actv >= 0, actv, leaky_slope * actv)
    gamma = conv(actv, params['w_gamma'], params['b_gamma'])
    beta = conv(actv, params['w_beta'], params['b_beta'])
    return normalized * (1.0 + gamma) + beta


def make_params(key, norm_nc, label_nc, ks=3, groups=1):
    nhidden = 128 * groups
    keys = jax.random.split(key, 6)

    def conv_init(kw, kb, out_c, in_c_total, ks, groups):
        in_pg = in_c_total // groups
        fan_in = in_pg * ks * ks
        bound = 1.0 / math.sqrt(fan_in)
        w = jax.random.uniform(kw, (out_c, in_pg, ks, ks), jnp.float32, -bound, bound)
        b = jax.random.uniform(kb, (out_c,), jnp.float32, -bound, bound)
        return w, b

    w_s, b_s = conv_init(keys[0], keys[1], nhidden, label_nc, ks, groups)
    w_g, b_g = conv_init(keys[2], keys[3], norm_nc, nhidden, ks, groups)
    w_b, b_b = conv_init(keys[4], keys[5], norm_nc, nhidden, ks, groups)
    return dict(w_shared=w_s, b_shared=b_s,
                w_gamma=w_g, b_gamma=b_g,
                w_beta=w_b, b_beta=b_b)


if __name__ == "__main__":
    key = jax.random.PRNGKey(0)

    configs = [
        # row_tile=8 exercises the multi-tile path (2 row tiles per image)
        dict(N=2, norm_nc=4, label_nc=3, H=16, W=16, Hs=8, Ws=8, groups=1, row_tile=8),
        # grouped path, single row tile
        dict(N=2, norm_nc=8, label_nc=4, H=16, W=16, Hs=8, Ws=8, groups=2, row_tile=None),
    ]
    for i, cfg in enumerate(configs):
        kx_, kseg, kp, key = jax.random.split(key, 4)
        x = jax.random.normal(kx_, (cfg['N'], cfg['norm_nc'], cfg['H'], cfg['W']), jnp.float32)
        segmap = jax.random.normal(kseg, (cfg['N'], cfg['label_nc'], cfg['Hs'], cfg['Ws']),
                                   jnp.float32)
        params = make_params(kp, cfg['norm_nc'], cfg['label_nc'], ks=3, groups=cfg['groups'])

        out = spade_grouped_pallas(x, segmap, params, groups=cfg['groups'],
                                   row_tile=cfg['row_tile'])
        out = jax.block_until_ready(out)

        ref = spade_grouped_reference(x, segmap, params, groups=cfg['groups'])
        assert out.shape == ref.shape == x.shape
        scale = float(jnp.max(jnp.abs(ref)))
        err = float(jnp.max(jnp.abs(out - ref)))
        # bf16 MXU operands / bf16 activation scratch vs. f32 reference -> small relative tolerance
        assert err <= 3e-2 * scale + 3e-2, f"config {i}: max abs err {err} (scale {scale})"

    print("KERNEL_OK")
</pallas_src>

<mosaic_0001>
module attributes {stable_mosaic.version = 11 : i64} {
  func.func @_spade_kernel(%arg0: i32, %arg1: i32, %arg2: memref<1x8x16x4xf32, #tpu.memory_space<vmem>>, %arg3: memref<1x1x12x18x8xbf16, #tpu.memory_space<vmem>>, %arg4: memref<1x1x4xf32, #tpu.memory_space<vmem>>, %arg5: memref<1x1x4xf32, #tpu.memory_space<vmem>>, %arg6: memref<9x1x8x128xbf16, #tpu.memory_space<vmem>>, %arg7: memref<1x128xf32, #tpu.memory_space<vmem>>, %arg8: memref<9x1x128x8xbf16, #tpu.memory_space<vmem>>, %arg9: memref<1x4xf32, #tpu.memory_space<vmem>>, %arg10: memref<1x4xf32, #tpu.memory_space<vmem>>, %arg11: memref<1x8x16x4xf32, #tpu.memory_space<vmem>>, %arg12: memref<10x18x128xbf16, #tpu.memory_space<vmem>>) attributes {dimension_semantics = [#tpu.dimension_semantics<parallel>, #tpu.dimension_semantics<parallel>], iteration_bounds = array<i64: 2, 2>, scalar_prefetch = 0 : i64, scratch_operands = 1 : i64, tpu.core_type = #tpu.core_type<tc>, window_params = [{transform_indices = @transform_0, window_bounds = array<i64: 1, 8, 16, 4>}, {transform_indices = @transform_1, window_bounds = array<i64: 1, 1, 12, 18, 8>}, {transform_indices = @transform_2, window_bounds = array<i64: 1, 1, 4>}, {transform_indices = @transform_3, window_bounds = array<i64: 1, 1, 4>}, {pipeline_mode = #tpu.pipeline_mode<synchronous>, transform_indices = @transform_4, window_bounds = array<i64: 9, 1, 8, 128>}, {pipeline_mode = #tpu.pipeline_mode<synchronous>, transform_indices = @transform_5, window_bounds = array<i64: 1, 128>}, {pipeline_mode = #tpu.pipeline_mode<synchronous>, transform_indices = @transform_6, window_bounds = array<i64: 9, 1, 128, 8>}, {pipeline_mode = #tpu.pipeline_mode<synchronous>, transform_indices = @transform_7, window_bounds = array<i64: 1, 4>}, {pipeline_mode = #tpu.pipeline_mode<synchronous>, transform_indices = @transform_8, window_bounds = array<i64: 1, 4>}, {transform_indices = @transform_9, window_bounds = array<i64: 1, 8, 16, 4>}]} {
    %cst = arith.constant 0.000000e+00 : f32
    %0 = vector.broadcast %cst : f32 to vector<160x128xf32>
    %c0 = arith.constant 0 : index
    %c0_0 = arith.constant 0 : index
    %c0_1 = arith.constant 0 : index
    %c0_2 = arith.constant 0 : index
    %c0_3 = arith.constant 0 : index
    %1 = vector.load %arg3[%c0, %c0_0, %c0_1, %c0_2, %c0_3] : memref<1x1x12x18x8xbf16, #tpu.memory_space<vmem>>, vector<1x1x10x16x8xbf16>
    %2 = vector.shape_cast %1 : vector<1x1x10x16x8xbf16> to vector<10x16x8xbf16>
    %3 = vector.shape_cast %2 : vector<10x16x8xbf16> to vector<160x8xbf16>
    %c0_4 = arith.constant 0 : index
    %c0_5 = arith.constant 0 : index
    %c0_6 = arith.constant 0 : index
    %c0_7 = arith.constant 0 : index
    %4 = vector.load %arg6[%c0_4, %c0_5, %c0_6, %c0_7] : memref<9x1x8x128xbf16, #tpu.memory_space<vmem>>, vector<1x1x8x128xbf16>
    %5 = vector.shape_cast %4 : vector<1x1x8x128xbf16> to vector<8x128xbf16>
    %cst_8 = arith.constant dense<0.000000e+00> : vector<160x128xf32>
    %6 = tpu.matmul %3, %5, %cst_8 {dimension_numbers = #tpu.dot_dimension_numbers<[1], [0], [0], [1], [0, 0, 1, 1], [], []>} : vector<160x8xbf16>, vector<8x128xbf16>, vector<160x128xf32> -> vector<160x128xf32>
    %7 = arith.addf %0, %6 : vector<160x128xf32>
    %c0_9 = arith.constant 0 : index
    %c0_10 = arith.constant 0 : index
    %c0_11 = arith.constant 0 : index
    %c1 = arith.constant 1 : index
    %c0_12 = arith.constant 0 : index
    %8 = vector.load %arg3[%c0_9, %c0_10, %c0_11, %c1, %c0_12] : memref<1x1x12x18x8xbf16, #tpu.memory_space<vmem>>, vector<1x1x10x16x8xbf16>
    %9 = vector.shape_cast %8 : vector<1x1x10x16x8xbf16> to vector<10x16x8xbf16>
    %10 = vector.shape_cast %9 : vector<10x16x8xbf16> to vector<160x8xbf16>
    %c1_13 = arith.constant 1 : index
    %c0_14 = arith.constant 0 : index
    %c0_15 = arith.constant 0 : index
    %c0_16 = arith.constant 0 : index
    %11 = vector.load %arg6[%c1_13, %c0_14, %c0_15, %c0_16] : memref<9x1x8x128xbf16, #tpu.memory_space<vmem>>, vector<1x1x8x128xbf16>
    %12 = vector.shape_cast %11 : vector<1x1x8x128xbf16> to vector<8x128xbf16>
    %cst_17 = arith.constant dense<0.000000e+00> : vector<160x128xf32>
    %13 = tpu.matmul %10, %12, %cst_17 {dimension_numbers = #tpu.dot_dimension_numbers<[1], [0], [0], [1], [0, 0, 1, 1], [], []>} : vector<160x8xbf16>, vector<8x128xbf16>, vector<160x128xf32> -> vector<160x128xf32>
    %14 = arith.addf %7, %13 : vector<160x128xf32>
    %c0_18 = arith.constant 0 : index
    %c0_19 = arith.constant 0 : index
    %c0_20 = arith.constant 0 : index
    %c2 = arith.constant 2 : index
    %c0_21 = arith.constant 0 : index
    %15 = vector.load %arg3[%c0_18, %c0_19, %c0_20, %c2, %c0_21] : memref<1x1x12x18x8xbf16, #tpu.memory_space<vmem>>, vector<1x1x10x16x8xbf16>
    %16 = vector.shape_cast %15 : vector<1x1x10x16x8xbf16> to vector<10x16x8xbf16>
    %17 = vector.shape_cast %16 : vector<10x16x8xbf16> to vector<160x8xbf16>
    %c2_22 = arith.constant 2 : index
    %c0_23 = arith.constant 0 : index
    %c0_24 = arith.constant 0 : index
    %c0_25 = arith.constant 0 : index
    %18 = vector.load %arg6[%c2_22, %c0_23, %c0_24, %c0_25] : memref<9x1x8x128xbf16, #tpu.memory_space<vmem>>, vector<1x1x8x128xbf16>
    %19 = vector.shape_cast %18 : vector<1x1x8x128xbf16> to vector<8x128xbf16>
    %cst_26 = arith.constant dense<0.000000e+00> : vector<160x128xf32>
    %20 = tpu.matmul %17, %19, %cst_26 {dimension_numbers = #tpu.dot_dimension_numbers<[1], [0], [0], [1], [0, 0, 1, 1], [], []>} : vector<160x8xbf16>, vector<8x128xbf16>, vector<160x128xf32> -> vector<160x128xf32>
    %21 = arith.addf %14, %20 : vector<160x128xf32>
    %c0_27 = arith.constant 0 : index
    %c0_28 = arith.constant 0 : index
    %c1_29 = arith.constant 1 : index
    %c0_30 = arith.constant 0 : index
    %c0_31 = arith.constant 0 : index
    %22 = vector.load %arg3[%c0_27, %c0_28, %c1_29, %c0_30, %c0_31] : memref<1x1x12x18x8xbf16, #tpu.memory_space<vmem>>, vector<1x1x10x16x8xbf16>
    %23 = vector.shape_cast %22 : vector<1x1x10x16x8xbf16> to vector<10x16x8xbf16>
    %24 = vector.shape_cast %23 : vector<10x16x8xbf16> to vector<160x8xbf16>
    %c3 = arith.constant 3 : index
    %c0_32 = arith.constant 0 : index
    %c0_33 = arith.constant 0 : index
    %c0_34 = arith.constant 0 : index
    %25 = vector.load %arg6[%c3, %c0_32, %c0_33, %c0_34] : memref<9x1x8x128xbf16, #tpu.memory_space<vmem>>, vector<1x1x8x128xbf16>
    %26 = vector.shape_cast %25 : vector<1x1x8x128xbf16> to vector<8x128xbf16>
    %cst_35 = arith.constant dense<0.000000e+00> : vector<160x128xf32>
    %27 = tpu.matmul %24, %26, %cst_35 {dimension_numbers = #tpu.dot_dimension_numbers<[1], [0], [0], [1], [0, 0, 1, 1], [], []>} : vector<160x8xbf16>, vector<8x128xbf16>, vector<160x128xf32> -> vector<160x128xf32>
    %28 = arith.addf %21, %27 : vector<160x128xf32>
    %c0_36 = arith.constant 0 : index
    %c0_37 = arith.constant 0 : index
    %c1_38 = arith.constant 1 : index
    %c1_39 = arith.constant 1 : index
    %c0_40 = arith.constant 0 : index
    %29 = vector.load %arg3[%c0_36, %c0_37, %c1_38, %c1_39, %c0_40] : memref<1x1x12x18x8xbf16, #tpu.memory_space<vmem>>, vector<1x1x10x16x8xbf16>
    %30 = vector.shape_cast %29 : vector<1x1x10x16x8xbf16> to vector<10x16x8xbf16>
    %31 = vector.shape_cast %30 : vector<10x16x8xbf16> to vector<160x8xbf16>
    %c4 = arith.constant 4 : index
    %c0_41 = arith.constant 0 : index
    %c0_42 = arith.constant 0 : index
    %c0_43 = arith.constant 0 : index
    %32 = vector.load %arg6[%c4, %c0_41, %c0_42, %c0_43] : memref<9x1x8x128xbf16, #tpu.memory_space<vmem>>, vector<1x1x8x128xbf16>
    %33 = vector.shape_cast %32 : vector<1x1x8x128xbf16> to vector<8x128xbf16>
    %cst_44 = arith.constant dense<0.000000e+00> : vector<160x128xf32>
    %34 = tpu.matmul %31, %33, %cst_44 {dimension_numbers = #tpu.dot_dimension_numbers<[1], [0], [0], [1], [0, 0, 1, 1], [], []>} : vector<160x8xbf16>, vector<8x128xbf16>, vector<160x128xf32> -> vector<160x128xf32>
    %35 = arith.addf %28, %34 : vector<160x128xf32>
    %c0_45 = arith.constant 0 : index
    %c0_46 = arith.constant 0 : index
    %c1_47 = arith.constant 1 : index
    %c2_48 = arith.constant 2 : index
    %c0_49 = arith.constant 0 : index
    %36 = vector.load %arg3[%c0_45, %c0_46, %c1_47, %c2_48, %c0_49] : memref<1x1x12x18x8xbf16, #tpu.memory_space<vmem>>, vector<1x1x10x16x8xbf16>
    %37 = vector.shape_cast %36 : vector<1x1x10x16x8xbf16> to vector<10x16x8xbf16>
    %38 = vector.shape_cast %37 : vector<10x16x8xbf16> to vector<160x8xbf16>
    %c5 = arith.constant 5 : index
    %c0_50 = arith.constant 0 : index
    %c0_51 = arith.constant 0 : index
    %c0_52 = arith.constant 0 : index
    %39 = vector.load %arg6[%c5, %c0_50, %c0_51, %c0_52] : memref<9x1x8x128xbf16, #tpu.memory_space<vmem>>, vector<1x1x8x128xbf16>
    %40 = vector.shape_cast %39 : vector<1x1x8x128xbf16> to vector<8x128xbf16>
    %cst_53 = arith.constant dense<0.000000e+00> : vector<160x128xf32>
    %41 = tpu.matmul %38, %40, %cst_53 {dimension_numbers = #tpu.dot_dimension_numbers<[1], [0], [0], [1], [0, 0, 1, 1], [], []>} : vector<160x8xbf16>, vector<8x128xbf16>, vector<160x128xf32> -> vector<160x128xf32>
    %42 = arith.addf %35, %41 : vector<160x128xf32>
    %c0_54 = arith.constant 0 : index
    %c0_55 = arith.constant 0 : index
    %c2_56 = arith.constant 2 : index
    %c0_57 = arith.constant 0 : index
    %c0_58 = arith.constant 0 : index
    %43 = vector.load %arg3[%c0_54, %c0_55, %c2_56, %c0_57, %c0_58] : memref<1x1x12x18x8xbf16, #tpu.memory_space<vmem>>, vector<1x1x10x16x8xbf16>
    %44 = vector.shape_cast %43 : vector<1x1x10x16x8xbf16> to vector<10x16x8xbf16>
    %45 = vector.shape_cast %44 : vector<10x16x8xbf16> to vector<160x8xbf16>
    %c6 = arith.constant 6 : index
    %c0_59 = arith.constant 0 : index
    %c0_60 = arith.constant 0 : index
    %c0_61 = arith.constant 0 : index
    %46 = vector.load %arg6[%c6, %c0_59, %c0_60, %c0_61] : memref<9x1x8x128xbf16, #tpu.memory_space<vmem>>, vector<1x1x8x128xbf16>
    %47 = vector.shape_cast %46 : vector<1x1x8x128xbf16> to vector<8x128xbf16>
    %cst_62 = arith.constant dense<0.000000e+00> : vector<160x128xf32>
    %48 = tpu.matmul %45, %47, %cst_62 {dimension_numbers = #tpu.dot_dimension_numbers<[1], [0], [0], [1], [0, 0, 1, 1], [], []>} : vector<160x8xbf16>, vector<8x128xbf16>, vector<160x128xf32> -> vector<160x128xf32>
    %49 = arith.addf %42, %48 : vector<160x128xf32>
    %c0_63 = arith.constant 0 : index
    %c0_64 = arith.constant 0 : index
    %c2_65 = arith.constant 2 : index
    %c1_66 = arith.constant 1 : index
    %c0_67 = arith.constant 0 : index
    %50 = vector.load %arg3[%c0_63, %c0_64, %c2_65, %c1_66, %c0_67] : memref<1x1x12x18x8xbf16, #tpu.memory_space<vmem>>, vector<1x1x10x16x8xbf16>
    %51 = vector.shape_cast %50 : vector<1x1x10x16x8xbf16> to vector<10x16x8xbf16>
    %52 = vector.shape_cast %51 : vector<10x16x8xbf16> to vector<160x8xbf16>
    %c7 = arith.constant 7 : index
    %c0_68 = arith.constant 0 : index
    %c0_69 = arith.constant 0 : index
    %c0_70 = arith.constant 0 : index
    %53 = vector.load %arg6[%c7, %c0_68, %c0_69, %c0_70] : memref<9x1x8x128xbf16, #tpu.memory_space<vmem>>, vector<1x1x8x128xbf16>
    %54 = vector.shape_cast %53 : vector<1x1x8x128xbf16> to vector<8x128xbf16>
    %cst_71 = arith.constant dense<0.000000e+00> : vector<160x128xf32>
    %55 = tpu.matmul %52, %54, %cst_71 {dimension_numbers = #tpu.dot_dimension_numbers<[1], [0], [0], [1], [0, 0, 1, 1], [], []>} : vector<160x8xbf16>, vector<8x128xbf16>, vector<160x128xf32> -> vector<160x128xf32>
    %56 = arith.addf %49, %55 : vector<160x128xf32>
    %c0_72 = arith.constant 0 : index
    %c0_73 = arith.constant 0 : index
    %c2_74 = arith.constant 2 : index
    %c2_75 = arith.constant 2 : index
    %c0_76 = arith.constant 0 : index
    %57 = vector.load %arg3[%c0_72, %c0_73, %c2_74, %c2_75, %c0_76] : memref<1x1x12x18x8xbf16, #tpu.memory_space<vmem>>, vector<1x1x10x16x8xbf16>
    %58 = vector.shape_cast %57 : vector<1x1x10x16x8xbf16> to vector<10x16x8xbf16>
    %59 = vector.shape_cast %58 : vector<10x16x8xbf16> to vector<160x8xbf16>
    %c8 = arith.constant 8 : index
    %c0_77 = arith.constant 0 : index
    %c0_78 = arith.constant 0 : index
    %c0_79 = arith.constant 0 : index
    %60 = vector.load %arg6[%c8, %c0_77, %c0_78, %c0_79] : memref<9x1x8x128xbf16, #tpu.memory_space<vmem>>, vector<1x1x8x128xbf16>
    %61 = vector.shape_cast %60 : vector<1x1x8x128xbf16> to vector<8x128xbf16>
    %cst_80 = arith.constant dense<0.000000e+00> : vector<160x128xf32>
    %62 = tpu.matmul %59, %61, %cst_80 {dimension_numbers = #tpu.dot_dimension_numbers<[1], [0], [0], [1], [0, 0, 1, 1], [], []>} : vector<160x8xbf16>, vector<8x128xbf16>, vector<160x128xf32> -> vector<160x128xf32>
    %63 = arith.addf %56, %62 : vector<160x128xf32>
    %c0_81 = arith.constant 0 : index
    %c0_82 = arith.constant 0 : index
    %64 = vector.load %arg7[%c0_81, %c0_82] : memref<1x128xf32, #tpu.memory_space<vmem>>, vector<1x128xf32>
    %65 = vector.broadcast %64 : vector<1x128xf32> to vector<160x128xf32>
    %66 = arith.addf %63, %65 : vector<160x128xf32>
    %cst_83 = arith.constant 0.000000e+00 : f32
    %67 = vector.broadcast %cst_83 : f32 to vector<160x128xf32>
    %68 = arith.cmpf oge, %66, %67 : vector<160x128xf32>
    %cst_84 = arith.constant 2.000000e-01 : f32
    %69 = vector.broadcast %cst_84 : f32 to vector<160x128xf32>
    %70 = arith.mulf %69, %66 : vector<160x128xf32>
    %71 = arith.select %68, %66, %70 : vector<160x128xi1>, vector<160x128xf32>
    %72 = vector.shape_cast %71 : vector<160x128xf32> to vector<10x16x128xf32>
    %73 = arith.truncf %72 : vector<10x16x128xf32> to vector<10x16x128xbf16>
    %c0_85 = arith.constant 0 : index
    %c1_86 = arith.constant 1 : index
    %c0_87 = arith.constant 0 : index
    %74 = vector.load %arg12[%c0_85, %c1_86, %c0_87] : memref<10x18x128xbf16, #tpu.memory_space<vmem>>, vector<10x16x128xbf16>
    tpu.vector_store %arg12[%c0_85, %c1_86, %c0_87], %73 {strides = array<i32>} : memref<10x18x128xbf16, #tpu.memory_space<vmem>>, vector<10x16x128xbf16>,
    %cst_88 = arith.constant 0.000000e+00 : bf16
    %75 = vector.broadcast %cst_88 : bf16 to vector<10x1x128xbf16>
    %c0_89 = arith.constant 0 : index
    %c0_90 = arith.constant 0 : index
    %c0_91 = arith.constant 0 : index
    %76 = vector.load %arg12[%c0_89, %c0_90, %c0_91] : memref<10x18x128xbf16, #tpu.memory_space<vmem>>, vector<10x1x128xbf16>
    tpu.vector_store %arg12[%c0_89, %c0_90, %c0_91], %75 {strides = array<i32>} : memref<10x18x128xbf16, #tpu.memory_space<vmem>>, vector<10x1x128xbf16>,
    %c0_92 = arith.constant 0 : index
    %c17 = arith.constant 17 : index
    %c0_93 = arith.constant 0 : index
    %77 = vector.load %arg12[%c0_92, %c17, %c0_93] : memref<10x18x128xbf16, #tpu.memory_space<vmem>>, vector<10x1x128xbf16>
    tpu.vector_store %arg12[%c0_92, %c17, %c0_93], %75 {strides = array<i32>} : memref<10x18x128xbf16, #tpu.memory_space<vmem>>, vector<10x1x128xbf16>,
    %c0_i32 = arith.constant 0 : i32
    %78 = arith.cmpi eq, %arg1, %c0_i32 : i32
    %79 = arith.extui %78 : i1 to i32
    %c0_i32_94 = arith.constant 0 : i32
    %80 = arith.cmpi ne, %79, %c0_i32_94 : i32
    scf.if %80 {
      %cst_188 = arith.constant 0.000000e+00 : bf16
      %166 = vector.broadcast %cst_188 : bf16 to vector<1x18x128xbf16>
      %c0_189 = arith.constant 0 : index
      %c0_190 = arith.constant 0 : index
      %c0_191 = arith.constant 0 : index
      %167 = vector.load %arg12[%c0_189, %c0_190, %c0_191] : memref<10x18x128xbf16, #tpu.memory_space<vmem>>, vector<1x18x128xbf16>
      tpu.vector_store %arg12[%c0_189, %c0_190, %c0_191], %166 {strides = array<i32>} : memref<10x18x128xbf16, #tpu.memory_space<vmem>>, vector<1x18x128xbf16>,
    } else {
    }
    %c1_i32 = arith.constant 1 : i32
    %81 = arith.cmpi eq, %arg1, %c1_i32 : i32
    %82 = arith.extui %81 : i1 to i32
    %c0_i32_95 = arith.constant 0 : i32
    %83 = arith.cmpi ne, %82, %c0_i32_95 : i32
    scf.if %83 {
      %cst_188 = arith.constant 0.000000e+00 : bf16
      %166 = vector.broadcast %cst_188 : bf16 to vector<1x18x128xbf16>
      %c9 = arith.constant 9 : index
      %c0_189 = arith.constant 0 : index
      %c0_190 = arith.constant 0 : index
      %167 = vector.load %arg12[%c9, %c0_189, %c0_190] : memref<10x18x128xbf16, #tpu.memory_space<vmem>>, vector<1x18x128xbf16>
      tpu.vector_store %arg12[%c9, %c0_189, %c0_190], %166 {strides = array<i32>} : memref<10x18x128xbf16, #tpu.memory_space<vmem>>, vector<1x18x128xbf16>,
    } else {
    }
    %cst_96 = arith.constant 0.000000e+00 : f32
    %84 = vector.broadcast %cst_96 : f32 to vector<128x8xf32>
    %c0_97 = arith.constant 0 : index
    %c0_98 = arith.constant 0 : index
    %c0_99 = arith.constant 0 : index
    %85 = vector.load %arg12[%c0_97, %c0_98, %c0_99] : memref<10x18x128xbf16, #tpu.memory_space<vmem>>, vector<8x16x128xbf16>
    %86 = vector.shape_cast %85 : vector<8x16x128xbf16> to vector<128x128xbf16>
    %c0_100 = arith.constant 0 : index
    %c0_101 = arith.constant 0 : index
    %c0_102 = arith.constant 0 : index
    %c0_103 = arith.constant 0 : index
    %87 = vector.load %arg8[%c0_100, %c0_101, %c0_102, %c0_103] : memref<9x1x128x8xbf16, #tpu.memory_space<vmem>>, vector<1x1x128x8xbf16>
    %88 = vector.shape_cast %87 : vector<1x1x128x8xbf16> to vector<128x8xbf16>
    %cst_104 = arith.constant dense<0.000000e+00> : vector<128x8xf32>
    %89 = tpu.matmul %86, %88, %cst_104 {dimension_numbers = #tpu.dot_dimension_numbers<[1], [0], [0], [1], [0, 0, 1, 1], [], []>} : vector<128x128xbf16>, vector<128x8xbf16>, vector<128x8xf32> -> vector<128x8xf32>
    %90 = arith.addf %84, %89 : vector<128x8xf32>
    %c0_105 = arith.constant 0 : index
    %c1_106 = arith.constant 1 : index
    %c0_107 = arith.constant 0 : index
    %91 = vector.load %arg12[%c0_105, %c1_106, %c0_107] : memref<10x18x128xbf16, #tpu.memory_space<vmem>>, vector<8x16x128xbf16>
    %92 = vector.shape_cast %91 : vector<8x16x128xbf16> to vector<128x128xbf16>
    %c1_108 = arith.constant 1 : index
    %c0_109 = arith.constant 0 : index
    %c0_110 = arith.constant 0 : index
    %c0_111 = arith.constant 0 : index
    %93 = vector.load %arg8[%c1_108, %c0_109, %c0_110, %c0_111] : memref<9x1x128x8xbf16, #tpu.memory_space<vmem>>, vector<1x1x128x8xbf16>
    %94 = vector.shape_cast %93 : vector<1x1x128x8xbf16> to vector<128x8xbf16>
    %cst_112 = arith.constant dense<0.000000e+00> : vector<128x8xf32>
    %95 = tpu.matmul %92, %94, %cst_112 {dimension_numbers = #tpu.dot_dimension_numbers<[1], [0], [0], [1], [0, 0, 1, 1], [], []>} : vector<128x128xbf16>, vector<128x8xbf16>, vector<128x8xf32> -> vector<128x8xf32>
    %96 = arith.addf %90, %95 : vector<128x8xf32>
    %c0_113 = arith.constant 0 : index
    %c2_114 = arith.constant 2 : index
    %c0_115 = arith.constant 0 : index
    %97 = vector.load %arg12[%c0_113, %c2_114, %c0_115] : memref<10x18x128xbf16, #tpu.memory_space<vmem>>, vector<8x16x128xbf16>
    %98 = vector.shape_cast %97 : vector<8x16x128xbf16> to vector<128x128xbf16>
    %c2_116 = arith.constant 2 : index
    %c0_117 = arith.constant 0 : index
    %c0_118 = arith.constant 0 : index
    %c0_119 = arith.constant 0 : index
    %99 = vector.load %arg8[%c2_116, %c0_117, %c0_118, %c0_119] : memref<9x1x128x8xbf16, #tpu.memory_space<vmem>>, vector<1x1x128x8xbf16>
    %100 = vector.shape_cast %99 : vector<1x1x128x8xbf16> to vector<128x8xbf16>
    %cst_120 = arith.constant dense<0.000000e+00> : vector<128x8xf32>
    %101 = tpu.matmul %98, %100, %cst_120 {dimension_numbers = #tpu.dot_dimension_numbers<[1], [0], [0], [1], [0, 0, 1, 1], [], []>} : vector<128x128xbf16>, vector<128x8xbf16>, vector<128x8xf32> -> vector<128x8xf32>
    %102 = arith.addf %96, %101 : vector<128x8xf32>
    %c1_121 = arith.constant 1 : index
    %c0_122 = arith.constant 0 : index
    %c0_123 = arith.constant 0 : index
    %103 = vector.load %arg12[%c1_121, %c0_122, %c0_123] : memref<10x18x128xbf16, #tpu.memory_space<vmem>>, vector<8x16x128xbf16>
    %104 = vector.shape_cast %103 : vector<8x16x128xbf16> to vector<128x128xbf16>
    %c3_124 = arith.constant 3 : index
    %c0_125 = arith.constant 0 : index
    %c0_126 = arith.constant 0 : index
    %c0_127 = arith.constant 0 : index
    %105 = vector.load %arg8[%c3_124, %c0_125, %c0_126, %c0_127] : memref<9x1x128x8xbf16, #tpu.memory_space<vmem>>, vector<1x1x128x8xbf16>
    %106 = vector.shape_cast %105 : vector<1x1x128x8xbf16> to vector<128x8xbf16>
    %cst_128 = arith.constant dense<0.000000e+00> : vector<128x8xf32>
    %107 = tpu.matmul %104, %106, %cst_128 {dimension_numbers = #tpu.dot_dimension_numbers<[1], [0], [0], [1], [0, 0, 1, 1], [], []>} : vector<128x128xbf16>, vector<128x8xbf16>, vector<128x8xf32> -> vector<128x8xf32>
    %108 = arith.addf %102, %107 : vector<128x8xf32>
    %c1_129 = arith.constant 1 : index
    %c1_130 = arith.constant 1 : index
    %c0_131 = arith.constant 0 : index
    %109 = vector.load %arg12[%c1_129, %c1_130, %c0_131] : memref<10x18x128xbf16, #tpu.memory_space<vmem>>, vector<8x16x128xbf16>
    %110 = vector.shape_cast %109 : vector<8x16x128xbf16> to vector<128x128xbf16>
    %c4_132 = arith.constant 4 : index
    %c0_133 = arith.constant 0 : index
    %c0_134 = arith.constant 0 : index
    %c0_135 = arith.constant 0 : index
    %111 = vector.load %arg8[%c4_132, %c0_133, %c0_134, %c0_135] : memref<9x1x128x8xbf16, #tpu.memory_space<vmem>>, vector<1x1x128x8xbf16>
    %112 = vector.shape_cast %111 : vector<1x1x128x8xbf16> to vector<128x8xbf16>
    %cst_136 = arith.constant dense<0.000000e+00> : vector<128x8xf32>
    %113 = tpu.matmul %110, %112, %cst_136 {dimension_numbers = #tpu.dot_dimension_numbers<[1], [0], [0], [1], [0, 0, 1, 1], [], []>} : vector<128x128xbf16>, vector<128x8xbf16>, vector<128x8xf32> -> vector<128x8xf32>
    %114 = arith.addf %108, %113 : vector<128x8xf32>
    %c1_137 = arith.constant 1 : index
    %c2_138 = arith.constant 2 : index
    %c0_139 = arith.constant 0 : index
    %115 = vector.load %arg12[%c1_137, %c2_138, %c0_139] : memref<10x18x128xbf16, #tpu.memory_space<vmem>>, vector<8x16x128xbf16>
    %116 = vector.shape_cast %115 : vector<8x16x128xbf16> to vector<128x128xbf16>
    %c5_140 = arith.constant 5 : index
    %c0_141 = arith.constant 0 : index
    %c0_142 = arith.constant 0 : index
    %c0_143 = arith.constant 0 : index
    %117 = vector.load %arg8[%c5_140, %c0_141, %c0_142, %c0_143] : memref<9x1x128x8xbf16, #tpu.memory_space<vmem>>, vector<1x1x128x8xbf16>
    %118 = vector.shape_cast %117 : vector<1x1x128x8xbf16> to vector<128x8xbf16>
    %cst_144 = arith.constant dense<0.000000e+00> : vector<128x8xf32>
    %119 = tpu.matmul %116, %118, %cst_144 {dimension_numbers = #tpu.dot_dimension_numbers<[1], [0], [0], [1], [0, 0, 1, 1], [], []>} : vector<128x128xbf16>, vector<128x8xbf16>, vector<128x8xf32> -> vector<128x8xf32>
    %120 = arith.addf %114, %119 : vector<128x8xf32>
    %c2_145 = arith.constant 2 : index
    %c0_146 = arith.constant 0 : index
    %c0_147 = arith.constant 0 : index
    %121 = vector.load %arg12[%c2_145, %c0_146, %c0_147] : memref<10x18x128xbf16, #tpu.memory_space<vmem>>, vector<8x16x128xbf16>
    %122 = vector.shape_cast %121 : vector<8x16x128xbf16> to vector<128x128xbf16>
    %c6_148 = arith.constant 6 : index
    %c0_149 = arith.constant 0 : index
    %c0_150 = arith.constant 0 : index
    %c0_151 = arith.constant 0 : index
    %123 = vector.load %arg8[%c6_148, %c0_149, %c0_150, %c0_151] : memref<9x1x128x8xbf16, #tpu.memory_space<vmem>>, vector<1x1x128x8xbf16>
    %124 = vector.shape_cast %123 : vector<1x1x128x8xbf16> to vector<128x8xbf16>
    %cst_152 = arith.constant dense<0.000000e+00> : vector<128x8xf32>
    %125 = tpu.matmul %122, %124, %cst_152 {dimension_numbers = #tpu.dot_dimension_numbers<[1], [0], [0], [1], [0, 0, 1, 1], [], []>} : vector<128x128xbf16>, vector<128x8xbf16>, vector<128x8xf32> -> vector<128x8xf32>
    %126 = arith.addf %120, %125 : vector<128x8xf32>
    %c2_153 = arith.constant 2 : index
    %c1_154 = arith.constant 1 : index
    %c0_155 = arith.constant 0 : index
    %127 = vector.load %arg12[%c2_153, %c1_154, %c0_155] : memref<10x18x128xbf16, #tpu.memory_space<vmem>>, vector<8x16x128xbf16>
    %128 = vector.shape_cast %127 : vector<8x16x128xbf16> to vector<128x128xbf16>
    %c7_156 = arith.constant 7 : index
    %c0_157 = arith.constant 0 : index
    %c0_158 = arith.constant 0 : index
    %c0_159 = arith.constant 0 : index
    %129 = vector.load %arg8[%c7_156, %c0_157, %c0_158, %c0_159] : memref<9x1x128x8xbf16, #tpu.memory_space<vmem>>, vector<1x1x128x8xbf16>
    %130 = vector.shape_cast %129 : vector<1x1x128x8xbf16> to vector<128x8xbf16>
    %cst_160 = arith.constant dense<0.000000e+00> : vector<128x8xf32>
    %131 = tpu.matmul %128, %130, %cst_160 {dimension_numbers = #tpu.dot_dimension_numbers<[1], [0], [0], [1], [0, 0, 1, 1], [], []>} : vector<128x128xbf16>, vector<128x8xbf16>, vector<128x8xf32> -> vector<128x8xf32>
    %132 = arith.addf %126, %131 : vector<128x8xf32>
    %c2_161 = arith.constant 2 : index
    %c2_162 = arith.constant 2 : index
    %c0_163 = arith.constant 0 : index
    %133 = vector.load %arg12[%c2_161, %c2_162, %c0_163] : memref<10x18x128xbf16, #tpu.memory_space<vmem>>, vector<8x16x128xbf16>
    %134 = vector.shape_cast %133 : vector<8x16x128xbf16> to vector<128x128xbf16>
    %c8_164 = arith.constant 8 : index
    %c0_165 = arith.constant 0 : index
    %c0_166 = arith.constant 0 : index
    %c0_167 = arith.constant 0 : index
    %135 = vector.load %arg8[%c8_164, %c0_165, %c0_166, %c0_167] : memref<9x1x128x8xbf16, #tpu.memory_space<vmem>>, vector<1x1x128x8xbf16>
    %136 = vector.shape_cast %135 : vector<1x1x128x8xbf16> to vector<128x8xbf16>
    %cst_168 = arith.constant dense<0.000000e+00> : vector<128x8xf32>
    %137 = tpu.matmul %134, %136, %cst_168 {dimension_numbers = #tpu.dot_dimension_numbers<[1], [0], [0], [1], [0, 0, 1, 1], [], []>} : vector<128x128xbf16>, vector<128x8xbf16>, vector<128x8xf32> -> vector<128x8xf32>
    %138 = arith.addf %132, %137 : vector<128x8xf32>
    %139 = vector.extract_strided_slice %138 {offsets = [0, 0], sizes = [128, 4], strides = [1, 1]} : vector<128x8xf32> to vector<128x4xf32>
    %c0_169 = arith.constant 0 : index
    %c0_170 = arith.constant 0 : index
    %140 = vector.load %arg9[%c0_169, %c0_170] : memref<1x4xf32, #tpu.memory_space<vmem>>, vector<1x4xf32>
    %141 = vector.broadcast %140 : vector<1x4xf32> to vector<128x4xf32>
    %142 = arith.addf %139, %141 : vector<128x4xf32>
    %143 = vector.extract_strided_slice %138 {offsets = [0, 4], sizes = [128, 4], strides = [1, 1]} : vector<128x8xf32> to vector<128x4xf32>
    %c0_171 = arith.constant 0 : index
    %c0_172 = arith.constant 0 : index
    %144 = vector.load %arg10[%c0_171, %c0_172] : memref<1x4xf32, #tpu.memory_space<vmem>>, vector<1x4xf32>
    %145 = vector.broadcast %144 : vector<1x4xf32> to vector<128x4xf32>
    %146 = arith.addf %143, %145 : vector<128x4xf32>
    %c0_173 = arith.constant 0 : index
    %c0_174 = arith.constant 0 : index
    %c0_175 = arith.constant 0 : index
    %c0_176 = arith.constant 0 : index
    %147 = vector.load %arg2[%c0_173, %c0_174, %c0_175, %c0_176] : memref<1x8x16x4xf32, #tpu.memory_space<vmem>>, vector<1x8x16x4xf32>
    %148 = vector.shape_cast %147 : vector<1x8x16x4xf32> to vector<8x16x4xf32>
    %149 = vector.shape_cast %148 : vector<8x16x4xf32> to vector<128x4xf32>
    %c0_177 = arith.constant 0 : index
    %c0_178 = arith.constant 0 : index
    %c0_179 = arith.constant 0 : index
    %150 = vector.load %arg4[%c0_177, %c0_178, %c0_179] : memref<1x1x4xf32, #tpu.memory_space<vmem>>, vector<1x1x4xf32>
    %151 = vector.shape_cast %150 : vector<1x1x4xf32> to vector<1x4xf32>
    %152 = vector.broadcast %151 : vector<1x4xf32> to vector<128x4xf32>
    %153 = arith.subf %149, %152 : vector<128x4xf32>
    %c0_180 = arith.constant 0 : index
    %c0_181 = arith.constant 0 : index
    %c0_182 = arith.constant 0 : index
    %154 = vector.load %arg5[%c0_180, %c0_181, %c0_182] : memref<1x1x4xf32, #tpu.memory_space<vmem>>, vector<1x1x4xf32>
    %155 = vector.shape_cast %154 : vector<1x1x4xf32> to vector<1x4xf32>
    %156 = vector.broadcast %155 : vector<1x4xf32> to vector<128x4xf32>
    %157 = arith.mulf %153, %156 : vector<128x4xf32>
    %cst_183 = arith.constant 1.000000e+00 : f32
    %158 = vector.broadcast %cst_183 : f32 to vector<128x4xf32>
    %159 = arith.addf %158, %142 : vector<128x4xf32>
    %160 = arith.mulf %157, %159 : vector<128x4xf32>
    %161 = arith.addf %160, %146 : vector<128x4xf32>
    %162 = vector.shape_cast %161 : vector<128x4xf32> to vector<8x16x4xf32>
    %c0_184 = arith.constant 0 : index
    %c0_185 = arith.constant 0 : index
    %c0_186 = arith.constant 0 : index
    %c0_187 = arith.constant 0 : index
    %163 = vector.load %arg11[%c0_184, %c0_185, %c0_186, %c0_187] : memref<1x8x16x4xf32, #tpu.memory_space<vmem>>, vector<1x8x16x4xf32>
    %164 = vector.shape_cast %163 : vector<1x8x16x4xf32> to vector<8x16x4xf32>
    %165 = vector.shape_cast %162 : vector<8x16x4xf32> to vector<1x8x16x4xf32>
    tpu.vector_store %arg11[%c0_184, %c0_185, %c0_186, %c0_187], %165 {strides = array<i32>} : memref<1x8x16x4xf32, #tpu.memory_space<vmem>>, vector<1x8x16x4xf32>,
    return
  }
  func.func @transform_0(%arg0: i32, %arg1: i32) -> (i32, i32, i32, i32) {
    %c0_i32 = arith.constant 0 : i32
    %c0_i32_0 = arith.constant 0 : i32
    %c0_i32_1 = arith.constant 0 : i32
    return %arg0, %arg1, %c0_i32, %c0_i32_0 : i32, i32, i32, i32
  }
  func.func @transform_1(%arg0: i32, %arg1: i32) -> (i32, i32, i32, i32, i32) {
    %c2_i32 = arith.constant 2 : i32
    %0 = arith.muli %arg0, %c2_i32 : i32
    %1 = arith.addi %0, %arg1 : i32
    %c0_i32 = arith.constant 0 : i32
    %c0_i32_0 = arith.constant 0 : i32
    %c0_i32_1 = arith.constant 0 : i32
    %c0_i32_2 = arith.constant 0 : i32
    %c0_i32_3 = arith.constant 0 : i32
    return %1, %c0_i32, %c0_i32_0, %c0_i32_1, %c0_i32_2 : i32, i32, i32, i32, i32
  }
  func.func @transform_2(%arg0: i32, %arg1: i32) -> (i32, i32, i32) {
    %c0_i32 = arith.constant 0 : i32
    %c0_i32_0 = arith.constant 0 : i32
    %c0_i32_1 = arith.constant 0 : i32
    return %arg0, %c0_i32, %c0_i32_0 : i32, i32, i32
  }
  func.func @transform_3(%arg0: i32, %arg1: i32) -> (i32, i32, i32) {
    %c0_i32 = arith.constant 0 : i32
    %c0_i32_0 = arith.constant 0 : i32
    %c0_i32_1 = arith.constant 0 : i32
    return %arg0, %c0_i32, %c0_i32_0 : i32, i32, i32
  }
  func.func @transform_4(%arg0: i32, %arg1: i32) -> (i32, i32, i32, i32) {
    %c0_i32 = arith.constant 0 : i32
    %c0_i32_0 = arith.constant 0 : i32
    %c0_i32_1 = arith.constant 0 : i32
    %c0_i32_2 = arith.constant 0 : i32
    %c0_i32_3 = arith.constant 0 : i32
    return %c0_i32, %c0_i32_0, %c0_i32_1, %c0_i32_2 : i32, i32, i32, i32
  }
  func.func @transform_5(%arg0: i32, %arg1: i32) -> (i32, i32) {
    %c0_i32 = arith.constant 0 : i32
    %c0_i32_0 = arith.constant 0 : i32
    %c0_i32_1 = arith.constant 0 : i32
    return %c0_i32, %c0_i32_0 : i32, i32
  }
  func.func @transform_6(%arg0: i32, %arg1: i32) -> (i32, i32, i32, i32) {
    %c0_i32 = arith.constant 0 : i32
    %c0_i32_0 = arith.constant 0 : i32
    %c0_i32_1 = arith.constant 0 : i32
    %c0_i32_2 = arith.constant 0 : i32
    %c0_i32_3 = arith.constant 0 : i32
    return %c0_i32, %c0_i32_0, %c0_i32_1, %c0_i32_2 : i32, i32, i32, i32
  }
  func.func @transform_7(%arg0: i32, %arg1: i32) -> (i32, i32) {
    %c0_i32 = arith.constant 0 : i32
    %c0_i32_0 = arith.constant 0 : i32
    %c0_i32_1 = arith.constant 0 : i32
    return %c0_i32, %c0_i32_0 : i32, i32
  }
  func.func @transform_8(%arg0: i32, %arg1: i32) -> (i32, i32) {
    %c0_i32 = arith.constant 0 : i32
    %c0_i32_0 = arith.constant 0 : i32
    %c0_i32_1 = arith.constant 0 : i32
    return %c0_i32, %c0_i32_0 : i32, i32
  }
  func.func @transform_9(%arg0: i32, %arg1: i32) -> (i32, i32, i32, i32) {
    %c0_i32 = arith.constant 0 : i32
    %c0_i32_0 = arith.constant 0 : i32
    %c0_i32_1 = arith.constant 0 : i32
    return %arg0, %arg1, %c0_i32, %c0_i32_0 : i32, i32, i32, i32
  }
}

</mosaic_0001>

<bundles_post_ra>
// kernel: tpu_custom_call.1
= control target key start
LH: loop header
LB: loop body
LE: loop exit
PB: predicated region body
PF: predicated region fallthrough
CT: control target
= control target key end

     0   :  { %s8836_s30 = smov 0   ;;  %s8838_s10 = smov 0   ;;  %s11377_s0 = inlined_call_operand.vmem [shape: f32[2,16,16,4], index: 0, kind: input, shape index: {}]   ;;  %s11378_s1 = inlined_call_operand.vmem [shape: bf16[4,1,12,18,8], index: 1, kind: input, shape index: {}]   ;;  %s11379_s2 = inlined_call_operand.vmem [shape: f32[2,1,4], index: 2, kind: input, shape index: {}]   ;;  %s11380_s3 = inlined_call_operand.vmem [shape: f32[2,1,4], index: 3, kind: input, shape index: {}]   ;;  %s11381_s4 = inlined_call_operand.vmem [shape: bf16[9,1,8,128], index: 4, kind: input, shape index: {}]   ;;  %s11382_s5 = inlined_call_operand.vmem [shape: f32[1,128], index: 5, kind: input, shape index: {}]   ;;  %s11383_s6 = inlined_call_operand.vmem [shape: bf16[9,1,128,8], index: 6, kind: input, shape index: {}]   ;;  %s11384_s7 = inlined_call_operand.vmem [shape: f32[1,4], index: 7, kind: input, shape index: {}]   ;;  %s11385_s8 = inlined_call_operand.vmem [shape: f32[1,4], index: 8, kind: input, shape index: {}]   ;;  %s11386_s9 = inlined_call_operand.vmem [shape: f32[2,16,16,4], index: 9, kind: output, shape index: {}]  }
   0x1   :  { %s8840_s11 = smov 0   ;;  %s8842_s12 = smov 0  }
   0x2   :  { %s8844_s13 = smov 0  }
   0x3 LB: > { %11392 = sst [smem:[#allocation3_spill]] %s8776_s12  ;;  %s28_s14 = sadd.s32 1, %s8772_s11  ;;  %s8780_s13 = sphi %s8844_s13, %s19_s13   ;;  %s8776_s12 = sphi %s8842_s12, %s11464_s12   ;;  %s8772_s11 = sphi %s8840_s11, %s11466_s11   ;;  %s8768_s10 = sphi %s8838_s10, %s11462_s10   ;;  %s8764_s30 = sphi %s8836_s30, %s11465_s30  }
   0x4   : > { %s31_s15 = sadd.s32 1, %s8776_s12  ;;  %p29_p0 = scmp.ge.s32.totalorder %s28_s14, 2 }
   0x5   : > { %p7139_p1 = scmp.ge.s32.totalorder %s8780_s13, 1  ;;  %p343_p2 = scmp.lt.s32.totalorder %s8780_s13, 5 }
   0x6   : > { %s11468_s14 = smov (%p29_p0, %s28_s14), 0  ;;  %s11470_s15 = smov (!%p29_p0, %s31_s15), %s8776_s12 }
   0x7   : > { %11393 = sst [smem:[#allocation4_spill]] %s11468_s14  ;;  %p344_p3 = pnand %p7139_p1, %p343_p2 }
   0x8   : > { %p33_p4 = scmp.ge.s32.totalorder %s11470_s15, 2 }
   0x9   : > { %347 = sbr.rel (%p344_p3) target bundleno = 1013 (0x3f5), region = 56 }
   0xa   : > { %s11472_s15 = smov (%p33_p4, %s11470_s15), 0 }
   0xb   : > { %11394 = sst [smem:[#allocation5_spill]] %s11472_s15 }
   0xe   : > { %s7140_s16 = sshll.u32 %s8764_s30, 3  ;;  %p403_p5 = scmp.lt.s32.totalorder %s8768_s10, 1  ;;  %v7150_v0 = vld [vmem:[%s11381_s4 + $0x4] sm:$0xf]  ;;  %vm777_vm0 = vcmask 1043456   ;;  %vm746_vm3 = vcmask 64512  }
   0xf   : > { %p405_p6 = scmp.lt.s32.totalorder %s7140_s16, 15  ;;  %8562 = vmatprep.subr.msk.bf16.mxu0 %vm777_vm0, %v7150_v0  ;;  %v779_v1 = vsel %vm777_vm0, %v7150_v0, 0  ;;  %v460_v2 = vld [vmem:[%s11381_s4] sm:$0xf]  ;;  %s7144_s21 = sshll.u32 %s8768_s10, 1  ;;  %v11395_v40 = vmov 0 }
  0x10   : > { %s11474_s10 = smov (!%p403_p5, %s8768_s10), 1  ;;  %8077 = vmatpush3.bf16.msra.mxu0 %v779_v1  ;;  %8563 = vmatprep.subr.msk.bf16.mxu1 %vm777_vm0, %v460_v2  ;;  %v975_v3 = vsel %vm777_vm0, %v460_v2, 0  ;;  %v7201_v4 = vld [vmem:[%s11381_s4 + $0x8] sm:$0xf]  ;;  %v7242_v5 = vld [vmem:[%s11381_s4 + $0xc] sm:$0xf]  ;;  %s414_s23 = sadd.s32 %s8764_s30, %s7144_s21 }
  0x11   : > { %s11476_s16 = smov (!%p405_p6, %s7140_s16), 15  ;;  %8099 = vmatpush3.bf16.msra.mxu1 %v975_v3  ;;  %s7142_s26 = sshll.u32 %s11474_s10, 5  ;;  %8564 = vmatprep.subr.msk.bf16.mxu0 %vm777_vm0, %v7201_v4  ;;  %v8917_v6 = vld [vmem:[%s11381_s4 + $0x10] sm:$0xf]  ;;  %v8922_v7 = vld [vmem:[%s11381_s4 + $0x14] sm:$0xf] }
  0x12   : > { %8565 = vmatprep.subr.msk.bf16.mxu1 %vm777_vm0, %v7242_v5  ;;  %s7141_s17 = sshll.u32 %s11476_s16, 1  ;;  %s427_s20 = scalar_lea.vmem %s11380_s3, %s11474_s10  ;;  %v8927_v8 = vld [vmem:[%s11381_s4 + $0x18] sm:$0xf]  ;;  %vm471_vm1 = vsmask.f32 3328  ;;  %v8930_v9 = vsel %vm777_vm0, %v7201_v4, 0 }
  0x13   : > { %s409_s22 = sadd.s32 %s7142_s26, %s7141_s17  ;;  %p415_p7 = scmp.lt.s32.totalorder %s414_s23, 3  ;;  %vm472_vm2 = vsmask.f32 7440  ;;  %v1495_v10 = vsel %vm777_vm0, %v7242_v5, 0  ;;  %v8940_v11 = vsel %vm777_vm0, %v8917_v6, 0  ;;  %v8944_v12 = vsel %vm777_vm0, %v8922_v7, 0 }
  0x14   : > { %s7143_s15 = sshll.u32 %s409_s22, 3  ;;  %v8948_v13 = vsel %vm777_vm0, %v8927_v8, 0  ;;  %vm8976_vm4 = vmor %vm471_vm1, %vm472_vm2  ;;  %vm1120_vm5 = vcmask 1042432   ;;  %vm1121_vm6 = vcmask 1046532   ;;  %vm3772_vm8 = vsmask.f32 7938 }
  0x15   : > { %s8907_s14 = scalar_lea.vmem %s11377_s0, %s7143_s15  ;;  %s8912_s29 = scalar_lea.vmem %s11386_s9, %s7143_s15  ;;  %v11396_v40 = vsel %vm8976_vm4, 4294967295, %v11395_v40  ;;  %vm9130_vm7 = vmor %vm1120_vm5, %vm1121_vm6  ;;  %vm3568_vm10 = vsmask.f32 256  ;;  %vm3778_vm11 = vcmask 1040384   ;;  %vm3569_vm12 = vsmask.f32 4368 }
  0x16   : > { %s11478_s23 = smov (!%p415_p7, %s414_s23), 3  ;;  %11397 = vst [vmem:[#allocation6_spill] sm:$0xff] %v11396_v40  ;;  %vm10126_vm15 = vmand %vm777_vm0, %vm3772_vm8  ;;  %p7509_p8 = scmp.ne.s32.totalorder %s8764_s30, 0 }
  0x17   : > { %s8571_s19 = smul.u32 144, %s11478_s23 }
  0x19   : > { %s8935_s22 = scalar_lea.vmem %s11378_s1, %s8571_s19 }
  0x1a   : > { %v440_v14 = vld [vmem:[%s8935_s22] sm:$0xf]  ;;  %v8952_v15 = vld [vmem:[%s8935_s22 + $0x4] sm:$0xf]  ;;  %v8955_v16 = vld [vmem:[%s8935_s22 + $0x8] sm:$0x1] }
  0x1b   : > { %v475_v17 = vshrl.u32 %v440_v14, 16  ;;  %v478_v18 = vshll.u32 %v440_v14, 16  ;;  %v484_v19 = vshll.u32 %v8952_v15, 16  ;;  %v488_v20 = vshrl.u32 %v8952_v15, 16  ;;  %v442_v21 = vld [vmem:[%s8935_s22 + $0xc] sm:$0xf] }
  0x1c   : > { %v494_v22 = vshll.u32 %v8955_v16, 16  ;;  %v1128_v23 = vrot.slane %v8955_v16, 5  ;;  %v7171_v24 = vcombine.low %v440_v14, %v8952_v15  ;;  %v8964_v25 = vld [vmem:[%s8935_s22 + $0x10] sm:$0xf]  ;;  %v8967_v26 = vld [vmem:[%s8935_s22 + $0x14] sm:$0x1] }
  0x1d   : > { %v477_v27 = vrot.slane %v475_v17, 4  ;;  %v480_v28 = vrot.slane %v478_v18, 5  ;;  %v486_v29 = vrot.slane %v484_v19, 5  ;;  %v490_v30 = vrot.slane %v488_v20, 4  ;;  %v444_v39 = vld [vmem:[%s8935_s22 + $0x18] sm:$0xf] }
  0x1e   : > { %v496_v31 = vrot.slane %v494_v22, 5  ;;  %8100 = vmatprep.mubr.msk.bf16.mxu1 %vm746_vm3, %v7171_v24  ;;  %v499_v32 = vshrl.u32 %v442_v21, 16  ;;  %v502_v33 = vshll.u32 %v442_v21, 16  ;;  %v508_v34 = vshll.u32 %v8964_v25, 16  ;;  %v8982_v49 = vld [vmem:[%s8935_s22 + $0x1c] sm:$0xf] }
  0x1f   : > { %v481_v35 = vor.u32 %v480_v28, %v477_v27  ;;  %v491_v36 = vor.u32 %v490_v30, %v486_v29  ;;  %v512_v37 = vshrl.u32 %v8964_v25, 16  ;;  %v518_v38 = vshll.u32 %v8967_v26, 16  ;;  %v8987_v53 = vld [vmem:[%s8935_s22 + $0x20] sm:$0x1]  ;;  %v446_v59 = vld [vmem:[%s8935_s22 + $0x24] sm:$0xf] }
  0x20   : > { %v501_v41 = vrot.slane %v499_v32, 4  ;;  %v504_v42 = vrot.slane %v502_v33, 5  ;;  %v510_v43 = vrot.slane %v508_v34, 5  ;;  %v1132_v44 = vrot.slane %v8964_v25, 5  ;;  %v8999_v4 = vld [vmem:[%s8935_s22 + $0x28] sm:$0xf] }
  0x21   : > { %v482_v45 = vrot.slane %v481_v35, 4  ;;  %v492_v46 = vrot.slane %v491_v36, 4  ;;  %v514_v47 = vrot.slane %v512_v37, 4  ;;  %v520_v48 = vrot.slane %v518_v38, 5  ;;  %v9006_v18 = vld [vmem:[%s8935_s22 + $0x2c] sm:$0x1] }
  0x22   : > { %v505_v50 = vor.u32 %v504_v42, %v501_v41  ;;  %v1135_v51 = vrot.slane %v8967_v26, 5  ;;  %v7172_v52 = vcombine.low %v442_v21, %v8964_v25  ;;  %v523_v54 = vshrl.u32 %v444_v39, 16  ;;  %v448_v24 = vld [vmem:[%s8935_s22 + $0x30] sm:$0xf]  ;;  %v9018_v34 = vld [vmem:[%s8935_s22 + $0x34] sm:$0xf] }
  0x23   : > { %v487_v55 = vsel %vm8976_vm4, %v482_v45, %v486_v29  ;;  %v497_v56 = vsel %vm8976_vm4, %v492_v46, %v496_v31  ;;  %v515_v57 = vor.u32 %v514_v47, %v510_v43  ;;  %v526_v58 = vshll.u32 %v444_v39, 16  ;;  %v9023_v38 = vld [vmem:[%s8935_s22 + $0x38] sm:$0x1] }
  0x24   : > { %v7151_v60 = vcombine.low %v487_v55, %v497_v56  ;;  %v506_v61 = vrot.slane %v505_v50, 4  ;;  %8101 = vmatmul.mubr.msk.bf16.vlgmr.msra.gmra.mxu1 %vm746_vm3, %v7172_v52  ;;  %v525_v62 = vrot.slane %v523_v54, 4  ;;  %v532_v63 = vshll.u32 %v8982_v49, 16  ;;  %v450_v56 = vld [vmem:[%s8935_s22 + $0x3c] sm:$0xf] }
  0x25   : > { %v516_v0 = vrot.slane %v515_v57, 4  ;;  %v528_v1 = vrot.slane %v526_v58, 5  ;;  %v536_v2 = vshrl.u32 %v8982_v49, 16  ;;  %v542_v3 = vshll.u32 %v8987_v53, 16  ;;  %8143 = vmatpush3.bf16.msra.mxu1 %v1495_v10 }
  0x26   : > { %8078 = vmatprep.mubr.msk.bf16.mxu0 %vm746_vm3, %v7151_v60  ;;  %v511_v5 = vsel %vm8976_vm4, %v506_v61, %v510_v43  ;;  %v534_v14 = vrot.slane %v532_v63, 5  ;;  %v7173_v17 = vcombine.low %v444_v39, %v8982_v49  ;;  %v547_v19 = vshrl.u32 %v446_v59, 16  ;;  %8567 = vmatprep.subr.msk.bf16.mxu1 %vm777_vm0, %v8922_v7  ;;  %v9038_v61 = vld [vmem:[%s8935_s22 + $0x40] sm:$0xf] }
  0x27   : > { %v521_v20 = vsel %vm8976_vm4, %v516_v0, %v520_v48  ;;  %v529_v21 = vor.u32 %v528_v1, %v525_v62  ;;  %v538_v10 = vrot.slane %v536_v2, 4  ;;  %v544_v22 = vrot.slane %v542_v3, 5  ;;  %v9042_v1 = vld [vmem:[%s8935_s22 + $0x44] sm:$0x1] }
  0x28   : > { %v7152_v27 = vcombine.low %v511_v5, %v521_v20  ;;  %8104 = vmatprep.mubr.msk.bf16.mxu1 %vm746_vm3, %v7173_v17  ;;  %v549_v28 = vrot.slane %v547_v19, 4  ;;  %v550_v29 = vshll.u32 %v446_v59, 16  ;;  %v556_v30 = vshll.u32 %v8999_v4, 16  ;;  %v452_v17 = vld [vmem:[%s8935_s22 + $0x48] sm:$0xf] }
  0x29   : > { %v530_v31 = vrot.slane %v529_v21, 4  ;;  %v539_v32 = vor.u32 %v538_v10, %v534_v14  ;;  %v560_v33 = vshrl.u32 %v8999_v4, 16  ;;  %v566_v7 = vshll.u32 %v9006_v18, 16 }
  0x2a   : > { %8079 = vmatmul.mubr.msk.bf16.vlgmr.msra.gmra.mxu0 %vm746_vm3, %v7152_v27  ;;  %v552_v35 = vrot.slane %v550_v29, 5  ;;  %v558_v36 = vrot.slane %v556_v30, 5  ;;  %v7174_v37 = vcombine.low %v446_v59, %v8999_v4  ;;  %v571_v39 = vshrl.u32 %v448_v24, 16 }
  0x2b   : > { %8121 = vmatpush3.bf16.msra.mxu0 %v8930_v9  ;;  %v535_v41 = vsel %vm8976_vm4, %v530_v31, %v534_v14  ;;  %v540_v42 = vrot.slane %v539_v32, 4  ;;  %v562_v43 = vrot.slane %v560_v33, 4  ;;  %v568_v45 = vrot.slane %v566_v7, 5  ;;  %v9058_v7 = vld [vmem:[%s8935_s22 + $0x50] sm:$0x1] }
  0x2c   : > { %v553_v46 = vor.u32 %v552_v35, %v549_v28  ;;  %8105 = vmatmul.mubr.msk.bf16.gmra.mxu1 %vm746_vm3, %v7174_v37  ;;  %v573_v47 = vrot.slane %v571_v39, 4  ;;  %v574_v48 = vshll.u32 %v448_v24, 16  ;;  %v580_v50 = vshll.u32 %v9018_v34, 16  ;;  %8566 = vmatprep.subr.msk.bf16.mxu0 %vm777_vm0, %v8917_v6 }
  0x2d   : > { %v545_v9 = vsel %vm8976_vm4, %v540_v42, %v544_v22  ;;  %v563_v52 = vor.u32 %v562_v43, %v558_v36  ;;  %v584_v54 = vshrl.u32 %v9018_v34, 16  ;;  %v590_v55 = vshll.u32 %v9023_v38, 16  ;;  %v9054_v22 = vld [vmem:[%s8935_s22 + $0x4c] sm:$0xf] }
  0x2e   : > { %v7153_v57 = vcombine.low %v535_v41, %v545_v9  ;;  %v554_v58 = vrot.slane %v553_v46, 4  ;;  %v576_v59 = vrot.slane %v574_v48, 5  ;;  %v582_v60 = vrot.slane %v580_v50, 5  ;;  %v454_v41 = vld [vmem:[%s8935_s22 + $0x54] sm:$0xf] }
  0x2f   : > { %v564_v62 = vrot.slane %v563_v52, 4  ;;  %v586_v63 = vrot.slane %v584_v54, 4  ;;  %v592_v6 = vrot.slane %v590_v55, 5  ;;  %v7175_v0 = vcombine.low %v448_v24, %v9018_v34 }
  0x30   : > { %8082 = vmatprep.mubr.msk.bf16.mxu0 %vm746_vm3, %v7153_v57  ;;  %v559_v2 = vsel %vm8976_vm4, %v554_v58, %v558_v36  ;;  %v577_v3 = vor.u32 %v576_v59, %v573_v47  ;;  %v595_v5 = vshrl.u32 %v450_v56, 16  ;;  %v598_v14 = vshll.u32 %v450_v56, 16  ;;  %v9068_v47 = vld [vmem:[%s8935_s22 + $0x58] sm:$0xf]  ;;  %v9075_v58 = vld [vmem:[%s8935_s22 + $0x5c] sm:$0x1] }
  0x31   : > { %v569_v19 = vsel %vm8976_vm4, %v564_v62, %v568_v45  ;;  %v587_v20 = vor.u32 %v586_v63, %v582_v60  ;;  %8108 = vmatprep.mubr.msk.bf16.mxu1 %vm746_vm3, %v7175_v0  ;;  %v604_v21 = vshll.u32 %v9038_v61, 16  ;;  %v608_v10 = vshrl.u32 %v9038_v61, 16 }
  0x32   : > { %v7154_v24 = vcombine.low %v559_v2, %v569_v19  ;;  %v578_v27 = vrot.slane %v577_v3, 4  ;;  %v597_v28 = vrot.slane %v595_v5, 4  ;;  %v600_v29 = vrot.slane %v598_v14, 5 }
  0x33   : > { %v588_v30 = vrot.slane %v587_v20, 4  ;;  %v606_v31 = vrot.slane %v604_v21, 5  ;;  %v610_v32 = vrot.slane %v608_v10, 4  ;;  %v614_v33 = vshll.u32 %v9042_v1, 16 }
  0x34   : > { %8083 = vmatmul.mubr.msk.bf16.gmra.mxu0 %vm746_vm3, %v7154_v24  ;;  %v583_v35 = vsel %vm8976_vm4, %v578_v27, %v582_v60  ;;  %v601_v36 = vor.u32 %v600_v29, %v597_v28  ;;  %v7176_v37 = vcombine.low %v450_v56, %v9038_v61  ;;  %v619_v39 = vshrl.u32 %v452_v17, 16  ;;  %v9089_v28 = vld [vmem:[%s8935_s22 + $0x64] sm:$0xf] }
  0x35   : > { %v593_v42 = vsel %vm8976_vm4, %v588_v30, %v592_v6  ;;  %v611_v43 = vor.u32 %v610_v32, %v606_v31  ;;  %v616_v45 = vrot.slane %v614_v33, 5  ;;  %v622_v46 = vshll.u32 %v452_v17, 16  ;;  %v456_v6 = vld [vmem:[%s8935_s22 + $0x60] sm:$0xf]  ;;  %v9094_v32 = vld [vmem:[%s8935_s22 + $0x68] sm:$0x1] }
  0x36   : > { %v7155_v48 = vcombine.low %v583_v35, %v593_v42  ;;  %v602_v50 = vrot.slane %v601_v36, 4  ;;  %8109 = vmatmul.mubr.msk.bf16.gmra.mxu1 %vm746_vm3, %v7176_v37  ;;  %v621_v9 = vrot.slane %v619_v39, 4  ;;  %v628_v52 = vshll.u32 %v9054_v22, 16  ;;  %v458_v42 = vld [vmem:[%s8935_s22 + $0x6c] sm:$0xf] }
  0x37   : > { %v612_v54 = vrot.slane %v611_v43, 4  ;;  %v624_v55 = vrot.slane %v622_v46, 5  ;;  %v632_v56 = vshrl.u32 %v9054_v22, 16  ;;  %v638_v57 = vshll.u32 %v9058_v7, 16 }
  0x38   : > { %8086 = vmatprep.mubr.msk.bf16.mxu0 %vm746_vm3, %v7155_v48  ;;  %v607_v59 = vsel %vm8976_vm4, %v602_v50, %v606_v31  ;;  %v630_v60 = vrot.slane %v628_v52, 5  ;;  %v7177_v62 = vcombine.low %v452_v17, %v9054_v22  ;;  %v643_v63 = vshrl.u32 %v454_v41, 16 }
  0x39   : > { %v617_v0 = vsel %vm8976_vm4, %v612_v54, %v616_v45  ;;  %v625_v2 = vor.u32 %v624_v55, %v621_v9  ;;  %v634_v3 = vrot.slane %v632_v56, 4  ;;  %v640_v5 = vrot.slane %v638_v57, 5 }
  0x3a   : > { %v7156_v14 = vcombine.low %v607_v59, %v617_v0  ;;  %8112 = vmatprep.mubr.msk.bf16.mxu1 %vm746_vm3, %v7177_v62  ;;  %v645_v19 = vrot.slane %v643_v63, 4  ;;  %v646_v20 = vshll.u32 %v454_v41, 16  ;;  %v652_v21 = vshll.u32 %v9068_v47, 16 }
  0x3b   : > { %v626_v10 = vrot.slane %v625_v2, 4  ;;  %v635_v24 = vor.u32 %v634_v3, %v630_v60  ;;  %v656_v17 = vshrl.u32 %v9068_v47, 16  ;;  %v662_v27 = vshll.u32 %v9075_v58, 16  ;;  %v1090_v3 = vld [vmem:[%s8935_s22] sm:$0xe] }
  0x3c   : > { %8087 = vmatmul.mubr.msk.bf16.gmra.mxu0 %vm746_vm3, %v7156_v14  ;;  %v648_v29 = vrot.slane %v646_v20, 5  ;;  %v654_v30 = vrot.slane %v652_v21, 5  ;;  %v7178_v31 = vcombine.low %v454_v41, %v9068_v47  ;;  %v667_v33 = vshrl.u32 %v456_v6, 16  ;;  %v9102_v41 = vld [vmem:[%s8935_s22 + $0x70] sm:$0xf] }
  0x3d   : > { %v631_v35 = vsel %vm8976_vm4, %v626_v10, %v630_v60  ;;  %v636_v36 = vrot.slane %v635_v24, 4  ;;  %v658_v37 = vrot.slane %v656_v17, 4  ;;  %v664_v39 = vrot.slane %v662_v27, 5  ;;  %v9109_v60 = vld [vmem:[%s8935_s22 + $0x74] sm:$0x1] }
  0x3e   : > { %v649_v43 = vor.u32 %v648_v29, %v645_v19  ;;  %8113 = vmatmul.mubr.msk.bf16.gmra.mxu1 %vm746_vm3, %v7178_v31  ;;  %v669_v45 = vrot.slane %v667_v33, 4  ;;  %v670_v46 = vshll.u32 %v456_v6, 16  ;;  %v676_v48 = vshll.u32 %v9089_v28, 16 }
  0x3f   : > { %v641_v50 = vsel %vm8976_vm4, %v636_v36, %v640_v5  ;;  %v659_v9 = vor.u32 %v658_v37, %v654_v30  ;;  %v680_v52 = vshrl.u32 %v9089_v28, 16  ;;  %v686_v54 = vshll.u32 %v9094_v32, 16 }
  0x40   : > { %v7157_v55 = vcombine.low %v631_v35, %v641_v50  ;;  %v650_v56 = vrot.slane %v649_v43, 4  ;;  %v672_v57 = vrot.slane %v670_v46, 5  ;;  %v678_v59 = vrot.slane %v676_v48, 5  ;;  %v1091_v43 = vld [vmem:[%s8935_s22 + $0xc] sm:$0xe] }
  0x41   : > { %v660_v62 = vrot.slane %v659_v9, 4  ;;  %v682_v63 = vrot.slane %v680_v52, 4  ;;  %v688_v0 = vrot.slane %v686_v54, 5  ;;  %v7179_v2 = vcombine.low %v456_v6, %v9089_v28  ;;  %v1092_v9 = vld [vmem:[%s8935_s22 + $0x18] sm:$0xe] }
  0x42   : > { %8090 = vmatprep.mubr.msk.bf16.mxu0 %vm746_vm3, %v7157_v55  ;;  %v655_v5 = vsel %vm8976_vm4, %v650_v56, %v654_v30  ;;  %v673_v14 = vor.u32 %v672_v57, %v669_v45  ;;  %v691_v19 = vshrl.u32 %v458_v42, 16  ;;  %v694_v20 = vshll.u32 %v458_v42, 16  ;;  %v8626_v30 = vld [vmem:[%s8935_s22 + $0xc] sm:$0xff]  }
  0x43   : > { %v665_v21 = vsel %vm8976_vm4, %v660_v62, %v664_v39  ;;  %v683_v10 = vor.u32 %v682_v63, %v678_v59  ;;  %8116 = vmatprep.mubr.msk.bf16.mxu1 %vm746_vm3, %v7179_v2  ;;  %v700_v24 = vshll.u32 %v9102_v41, 16  ;;  %v704_v6 = vshrl.u32 %v9102_v41, 16 }
  0x44   : > { %v7158_v17 = vcombine.low %v655_v5, %v665_v21  ;;  %v674_v27 = vrot.slane %v673_v14, 4  ;;  %v693_v29 = vrot.slane %v691_v19, 4  ;;  %v696_v31 = vrot.slane %v694_v20, 5  ;;  %v1093_v20 = vld [vmem:[%s8935_s22 + $0x24] sm:$0xe] }
  0x45   : > { %v684_v33 = vrot.slane %v683_v10, 4  ;;  %v702_v35 = vrot.slane %v700_v24, 5  ;;  %v706_v36 = vrot.slane %v704_v6, 4  ;;  %v710_v37 = vshll.u32 %v9109_v60, 16  ;;  %v1094_v21 = vld [vmem:[%s8935_s22 + $0x30] sm:$0xe] }
  0x46   : > { %8091 = vmatmul.mubr.msk.bf16.gmra.mxu0 %vm746_vm3, %v7158_v17  ;;  %v679_v39 = vsel %vm8976_vm4, %v674_v27, %v678_v59  ;;  %v697_v45 = vor.u32 %v696_v31, %v693_v29  ;;  %v7180_v46 = vcombine.low %v458_v42, %v9102_v41  ;;  %v11398_v48 = vmov 0  ;;  %v8628_v29 = vld [vmem:[%s8935_s22 + $0x24] sm:$0xff]  }
  0x47   : > { %v11399_v48 = vsel %vm9130_vm7, 4294967295, %v11398_v48  ;;  %v7191_v50 = vrot.slane %v1090_v3, 9  ;;  %v689_v52 = vsel %vm8976_vm4, %v684_v33, %v688_v0  ;;  %v707_v54 = vor.u32 %v706_v36, %v702_v35  ;;  %v1096_v33 = vld [vmem:[%s8935_s22 + $0x48] sm:$0xe] }
  0x48   : > { %11400 = vst [vmem:[#allocation7_spill] sm:$0xff] %v11399_v48  ;;  %v712_v55 = vrot.slane %v710_v37, 5  ;;  %v1125_v56 = vrot.slane %v8952_v15, 5  ;;  %v7159_v57 = vcombine.low %v679_v39, %v689_v52  ;;  %v698_v59 = vrot.slane %v697_v45, 4  ;;  %8117 = vmatmul.mubr.msk.bf16.gmra.mxu1 %vm746_vm3, %v7180_v46  ;;  %v1097_v45 = vld [vmem:[%s8935_s22 + $0x54] sm:$0xe] }
  0x49   : > { %v7192_v42 = vrot.slane %v1091_v43, 9  ;;  %v1134_v62 = vrot.slane %v1132_v44, 4  ;;  %v708_v63 = vrot.slane %v707_v54, 4  ;;  %8144 = vmatprep.mubr.msk.bf16.mxu1 %vm746_vm3, %v8626_v30  ;;  %v7193_v15 = vrot.slane %v1092_v9, 9 }
  0x4a   : > { %v1126_v2 = vsel %vm9130_vm7, %v7191_v50, %v1125_v56  ;;  %v1127_v0 = vrot.slane %v1125_v56, 4  ;;  %8094 = vmatprep.mubr.msk.bf16.mxu0 %vm746_vm3, %v7159_v57  ;;  %v703_v3 = vsel %vm8976_vm4, %v698_v59, %v702_v35  ;;  %v1139_v19 = vrot.slane %v8982_v49, 5  ;;  %v8627_v49 = vld [vmem:[%s8935_s22 + $0x18] sm:$0xff]  }
  0x4b   : > { %v9151_v5 = vsel %vm9130_vm7, %v7192_v42, %v1132_v44  ;;  %v9157_v14 = vsel %vm9130_vm7, %v1134_v62, %v1135_v51  ;;  %v713_v10 = vsel %vm8976_vm4, %v708_v63, %v712_v55  ;;  %v1142_v44 = vrot.slane %v8987_v53, 5  ;;  %v1095_v51 = vld [vmem:[%s8935_s22 + $0x3c] sm:$0xe]  ;;  %v1098_v55 = vld [vmem:[%s8935_s22 + $0x60] sm:$0xe] }
  0x4c   : > { %v1129_v25 = vsel %vm9130_vm7, %v1127_v0, %v1128_v23  ;;  %v7203_v26 = vcombine.low %v9151_v5, %v9157_v14  ;;  %v7160_v24 = vcombine.low %v703_v3, %v713_v10  ;;  %v1140_v17 = vsel %vm9130_vm7, %v7193_v15, %v1139_v19  ;;  %v1099_v42 = vld [vmem:[%s8935_s22 + $0x6c] sm:$0xe]  ;;  %v8630_v14 = vld [vmem:[%s8935_s22 + $0x3c] sm:$0xff]  }
  0x4d   : > { %v7202_v6 = vcombine.low %v1126_v2, %v1129_v25  ;;  %v1141_v27 = vrot.slane %v1139_v19, 4  ;;  %v7194_v31 = vrot.slane %v1093_v20, 9  ;;  %v1146_v16 = vrot.slane %v8999_v4, 5  ;;  %v8629_v2 = vld [vmem:[%s8935_s22 + $0x30] sm:$0xff]   ;;  %v7263_v5 = vld [vmem:[%s8935_s22 + $0xc] sm:$0xf] }
  0x4e   : > { %v1149_v23 = vrot.slane %v9006_v18, 5  ;;  %v7195_v30 = vrot.slane %v1094_v21, 9  ;;  %8095 = vmatmul.mubr.msk.bf16.gmra.mxu0 %vm746_vm3, %v7160_v24  ;;  %v1153_v35 = vrot.slane %v9018_v34, 5  ;;  %v1156_v36 = vrot.slane %v9023_v38, 5 }
  0x4f   : > { %v1143_v53 = vsel %vm9130_vm7, %v1141_v27, %v1142_v44  ;;  %v7196_v37 = vrot.slane %v1095_v51, 9  ;;  %8122 = vmatprep.mubr.msk.bf16.mxu0 %vm746_vm3, %v7202_v6  ;;  %v9187_v4 = vsel %vm9130_vm7, %v7194_v31, %v1146_v16  ;;  %v1148_v18 = vrot.slane %v1146_v16, 4  ;;  %v9249_v51 = vld [vmem:[%s8935_s22 + $0x10] sm:$0xf] }
  0x50   : > { %v7204_v43 = vcombine.low %v1140_v17, %v1143_v53  ;;  %v1160_v39 = vrot.slane %v9038_v61, 5  ;;  %8145 = vmatmul.mubr.msk.bf16.vlgmr.msra.gmra.mxu1 %vm746_vm3, %v8627_v49  ;;  %v9194_v34 = vsel %vm9130_vm7, %v7195_v30, %v1153_v35  ;;  %v1155_v38 = vrot.slane %v1153_v35, 4  ;;  %v9268_v49 = vld [vmem:[%s8935_s22 + $0x14] sm:$0x1]  ;;  %v9290_v35 = vld [vmem:[%s8935_s22 + $0x20] sm:$0x1] }
  0x51   : > { %v1163_v46 = vrot.slane %v9042_v1, 5  ;;  %v7197_v50 = vrot.slane %v1096_v33, 9  ;;  %v9199_v9 = vsel %vm9130_vm7, %v1148_v18, %v1149_v23  ;;  %8148 = vmatprep.mubr.msk.bf16.mxu1 %vm746_vm3, %v8628_v29  ;;  %v1167_v54 = vrot.slane %v9054_v22, 5  ;;  %8187 = vmatpush3.bf16.msra.mxu1 %v8944_v12  ;;  %v7267_v23 = vld [vmem:[%s8935_s22 + $0x1c] sm:$0xf] }
  0x52   : > { %v9204_v61 = vsel %vm9130_vm7, %v7196_v37, %v1160_v39  ;;  %v1162_v52 = vrot.slane %v1160_v39, 4  ;;  %v7205_v1 = vcombine.low %v9187_v4, %v9199_v9  ;;  %v9213_v56 = vsel %vm9130_vm7, %v1155_v38, %v1156_v36  ;;  %v8631_v36 = vld [vmem:[%s8935_s22 + $0x48] sm:$0xff]   ;;  %v9313_v4 = vld [vmem:[%s11381_s4 + $0x1c] sm:$0xf] }
  0x53   : > { %v1170_v57 = vrot.slane %v9058_v7, 5  ;;  %v7198_v59 = vrot.slane %v1097_v45, 9  ;;  %v7206_v62 = vcombine.low %v9194_v34, %v9213_v56  ;;  %v9225_v12 = vsel %vm9130_vm7, %v7197_v50, %v1167_v54  ;;  %v8632_v45 = vld [vmem:[%s8935_s22 + $0x54] sm:$0xff]   ;;  %8569 = vmatprep.subr.msk.bf16.mxu1 %vm777_vm0, %v9313_v4 }
  0x54   : > { %v9221_v22 = vsel %vm9130_vm7, %v1162_v52, %v1163_v46  ;;  %v1169_v63 = vrot.slane %v1167_v54, 4  ;;  %v1174_v7 = vrot.slane %v9068_v47, 5  ;;  %v1177_v15 = vrot.slane %v9075_v58, 5  ;;  %v7314_v54 = vld [vmem:[%s8935_s22 + $0xc] sm:$0xe] }
  0x55   : > { %v7207_v0 = vcombine.low %v9204_v61, %v9221_v22  ;;  %v7199_v3 = vrot.slane %v1098_v55, 9  ;;  %v1181_v20 = vrot.slane %v9089_v28, 5  ;;  %v1184_v21 = vrot.slane %v9094_v32, 5 }
  0x56   : > { %v9236_v19 = vsel %vm9130_vm7, %v1169_v63, %v1170_v57  ;;  %v7200_v10 = vrot.slane %v1099_v42, 9  ;;  %8123 = vmatmul.mubr.msk.bf16.vlgmr.msra.gmra.mxu0 %vm746_vm3, %v7203_v26  ;;  %v9245_v58 = vsel %vm9130_vm7, %v7198_v59, %v1174_v7  ;;  %v1176_v25 = vrot.slane %v1174_v7, 4  ;;  %v7315_v63 = vld [vmem:[%s8935_s22 + $0x18] sm:$0xe] }
  0x57   : > { %v7208_v47 = vcombine.low %v9225_v12, %v9236_v19  ;;  %v1188_v44 = vrot.slane %v9102_v41, 5  ;;  %8165 = vmatpush3.bf16.msra.mxu0 %v8940_v11  ;;  %8126 = vmatprep.mubr.msk.bf16.mxu0 %vm746_vm3, %v7204_v43  ;;  %v9255_v28 = vsel %vm9130_vm7, %v7199_v3, %v1181_v20  ;;  %v1183_v32 = vrot.slane %v1181_v20, 4 }
  0x58   : > { %v1191_v26 = vrot.slane %v9109_v60, 5  ;;  %v1661_v24 = vshrl.u32 %v7263_v5, 16  ;;  %8149 = vmatmul.mubr.msk.bf16.gmra.mxu1 %vm746_vm3, %v8629_v2  ;;  %v9261_v41 = vsel %vm9130_vm7, %v1176_v25, %v1177_v15  ;;  %v1664_v17 = vshll.u32 %v7263_v5, 16  ;;  %8568 = vmatprep.subr.msk.bf16.mxu0 %vm777_vm0, %v8927_v8  ;;  %v7266_v60 = vld [vmem:[%s8935_s22 + $0x18] sm:$0xf] }
  0x59   : > { %v9265_v11 = vsel %vm9130_vm7, %v7200_v10, %v1188_v44  ;;  %v1190_v6 = vrot.slane %v1188_v44, 4  ;;  %8152 = vmatprep.mubr.msk.bf16.mxu1 %vm746_vm3, %v8630_v14  ;;  %v7209_v27 = vcombine.low %v9245_v58, %v9261_v41  ;;  %v9278_v29 = vsel %vm9130_vm7, %v1183_v32, %v1184_v21  ;;  %v7269_v5 = vld [vmem:[%s8935_s22 + $0x24] sm:$0xf]  ;;  %v9327_v32 = vld [vmem:[%s8935_s22 + $0x28] sm:$0xf] }
  0x5a   : > { %v1663_v31 = vrot.slane %v1661_v24, 4  ;;  %v1670_v16 = vshll.u32 %v9249_v51, 16  ;;  %v7210_v30 = vcombine.low %v9255_v28, %v9278_v29  ;;  %v1666_v33 = vrot.slane %v1664_v17, 5 }
  0x5b   : > { %v9286_v8 = vsel %vm9130_vm7, %v1190_v6, %v1191_v26  ;;  %v1674_v53 = vshrl.u32 %v9249_v51, 16  ;;  %v1680_v18 = vshll.u32 %v9268_v49, 16  ;;  %v1685_v39 = vshrl.u32 %v7266_v60, 16 }
  0x5c   : > { %v7211_v37 = vcombine.low %v9265_v11, %v9286_v8  ;;  %v1672_v43 = vrot.slane %v1670_v16, 5  ;;  %v1667_v38 = vor.u32 %v1666_v33, %v1663_v31  ;;  %v1688_v50 = vshll.u32 %v7266_v60, 16  ;;  %v9339_v16 = vld [vmem:[%s8935_s22 + $0x2c] sm:$0x1] }
  0x5d   : > { %v1676_v46 = vrot.slane %v1674_v53, 4  ;;  %v1694_v52 = vshll.u32 %v7267_v23, 16  ;;  %v1682_v55 = vrot.slane %v1680_v18, 5  ;;  %v1687_v57 = vrot.slane %v1685_v39, 4  ;;  %v8633_v53 = vld [vmem:[%s8935_s22 + $0x60] sm:$0xff]  }
  0x5e   : > { %v1698_v59 = vshrl.u32 %v7267_v23, 16  ;;  %v1704_v42 = vshll.u32 %v9290_v35, 16  ;;  %8127 = vmatmul.mubr.msk.bf16.gmra.mxu0 %vm746_vm3, %v7205_v1  ;;  %v1668_v2 = vrot.slane %v1667_v38, 4  ;;  %v1690_v15 = vrot.slane %v1688_v50, 5  ;;  %v7272_v18 = vld [vmem:[%s8935_s22 + $0x30] sm:$0xf] }
  0x5f   : > { %v1677_v7 = vor.u32 %v1676_v46, %v1672_v43  ;;  %v1696_v3 = vrot.slane %v1694_v52, 5  ;;  %8130 = vmatprep.mubr.msk.bf16.mxu0 %vm746_vm3, %v7206_v62  ;;  %v7324_v21 = vrot.slane %v7314_v54, 9  ;;  %v2140_v10 = vrot.slane %v9249_v51, 5  ;;  %v9352_v39 = vld [vmem:[%s8935_s22 + $0x34] sm:$0xf] }
  0x60   : > { %v1700_v14 = vrot.slane %v1698_v59, 4  ;;  %v1706_v20 = vrot.slane %v1704_v42, 5  ;;  %8153 = vmatmul.mubr.msk.bf16.gmra.mxu1 %vm746_vm3, %v8631_v36  ;;  %v1673_v9 = vsel %vm8976_vm4, %v1668_v2, %v1672_v43  ;;  %v1691_v34 = vor.u32 %v1690_v15, %v1687_v57  ;;  %v9359_v54 = vld [vmem:[%s8935_s22 + $0x38] sm:$0x1] }
  0x61   : > { %v1678_v1 = vrot.slane %v1677_v7, 4  ;;  %v2143_v56 = vrot.slane %v9268_v49, 5  ;;  %8156 = vmatprep.mubr.msk.bf16.mxu1 %vm746_vm3, %v8632_v45  ;;  %v9324_v25 = vsel %vm9130_vm7, %v7324_v21, %v2140_v10  ;;  %v2142_v44 = vrot.slane %v2140_v10, 4  ;;  %v8634_v45 = vld [vmem:[%s8935_s22 + $0x6c] sm:$0xff]  }
  0x62   : > { %v1701_v62 = vor.u32 %v1700_v14, %v1696_v3  ;;  %v7325_v51 = vrot.slane %v7315_v63, 9  ;;  %v1692_v24 = vrot.slane %v1691_v34, 4  ;;  %v2147_v6 = vrot.slane %v7267_v23, 5  ;;  %v7316_v63 = vld [vmem:[%s8935_s22 + $0x24] sm:$0xe] }
  0x63   : > { %v1683_v26 = vsel %vm8976_vm4, %v1678_v1, %v1682_v55  ;;  %v2150_v49 = vrot.slane %v9290_v35, 5  ;;  %v9336_v31 = vsel %vm9130_vm7, %v2142_v44, %v2143_v56  ;;  %v1709_v33 = vshrl.u32 %v7269_v5, 16  ;;  %v7317_v7 = vld [vmem:[%s8935_s22 + $0x30] sm:$0xe] }
  0x64   : > { %v9332_v17 = vcombine.low %v1673_v9, %v1683_v26  ;;  %v1702_v60 = vrot.slane %v1701_v62, 4  ;;  %v1697_v36 = vsel %vm8976_vm4, %v1692_v24, %v1696_v3  ;;  %v7335_v23 = vcombine.low %v9324_v25, %v9336_v31  ;;  %v9441_v31 = vld [vmem:[%s8935_s22 + $0x50] sm:$0x1] }
  0x65   : > { %v9348_v35 = vsel %vm9130_vm7, %v7325_v51, %v2147_v6  ;;  %v2149_v43 = vrot.slane %v2147_v6, 4  ;;  %v1711_v46 = vrot.slane %v1709_v33, 4  ;;  %v1712_v50 = vshll.u32 %v7269_v5, 16  ;;  %v8635_v51 = vld [vmem:[%s8935_s22 + $0x78] sm:$0xff]  }
  0x66   : > { %v1707_v38 = vsel %vm8976_vm4, %v1702_v60, %v1706_v20  ;;  %v1718_v52 = vshll.u32 %v9327_v32, 16  ;;  %8131 = vmatmul.mubr.msk.bf16.gmra.mxu0 %vm746_vm3, %v7207_v0  ;;  %v1722_v59 = vshrl.u32 %v9327_v32, 16  ;;  %v1728_v42 = vshll.u32 %v9339_v16, 16  ;;  %v7275_v60 = vld [vmem:[%s8935_s22 + $0x3c] sm:$0xf] }
  0x67   : > { %v9365_v55 = vcombine.low %v1697_v36, %v1707_v38  ;;  %v9369_v57 = vsel %vm9130_vm7, %v2149_v43, %v2150_v49  ;;  %8134 = vmatprep.mubr.msk.bf16.mxu0 %vm746_vm3, %v7208_v47  ;;  %v1714_v22 = vrot.slane %v1712_v50, 5  ;;  %v1733_v2 = vshrl.u32 %v7272_v18, 16  ;;  %v7278_v50 = vld [vmem:[%s8935_s22 + $0x48] sm:$0xf] }
  0x68   : > { %v7336_v61 = vcombine.low %v9348_v35, %v9369_v57  ;;  %v1720_v0 = vrot.slane %v1718_v52, 5  ;;  %8157 = vmatmul.mubr.msk.bf16.gmra.mxu1 %vm746_vm3, %v8633_v53  ;;  %v1724_v15 = vrot.slane %v1722_v59, 4  ;;  %v1730_v3 = vrot.slane %v1728_v42, 5  ;;  %v9467_v57 = vld [vmem:[%s8935_s22 + $0x58] sm:$0xf] }
  0x69   : > { %v1736_v5 = vshll.u32 %v7272_v18, 16  ;;  %v1742_v14 = vshll.u32 %v9352_v39, 16  ;;  %8160 = vmatprep.mubr.msk.bf16.mxu1 %vm746_vm3, %v8634_v45  ;;  %v1715_v12 = vor.u32 %v1714_v22, %v1711_v46  ;;  %v1735_v19 = vrot.slane %v1733_v2, 4  ;;  %v9395_v18 = vld [vmem:[%s8935_s22 + $0x40] sm:$0xf] }
  0x6a   : > { %v1746_v47 = vshrl.u32 %v9352_v39, 16  ;;  %v1752_v20 = vshll.u32 %v9359_v54, 16  ;;  %v1725_v21 = vor.u32 %v1724_v15, %v1720_v0  ;;  %v7326_v1 = vrot.slane %v7316_v63, 9  ;;  %v9398_v45 = vld [vmem:[%s8935_s22 + $0x44] sm:$0x1] }
  0x6b   : > { %v1738_v10 = vrot.slane %v1736_v5, 5  ;;  %v1744_v9 = vrot.slane %v1742_v14, 5  ;;  %v1716_v34 = vrot.slane %v1715_v12, 4  ;;  %v2154_v44 = vrot.slane %v9327_v32, 5  ;;  %v7279_v22 = vld [vmem:[%s8935_s22 + $0x4c] sm:$0xf] }
  0x6c   : > { %v1748_v56 = vrot.slane %v1746_v47, 4  ;;  %v1754_v62 = vrot.slane %v1752_v20, 5  ;;  %v1726_v26 = vrot.slane %v1725_v21, 4  ;;  %v2157_v6 = vrot.slane %v9339_v16, 5  ;;  %v7318_v14 = vld [vmem:[%s8935_s22 + $0x3c] sm:$0xe] }
  0x6d   : > { %v1739_v24 = vor.u32 %v1738_v10, %v1735_v19  ;;  %v7327_v49 = vrot.slane %v7317_v7, 9  ;;  %v1721_v33 = vsel %vm8976_vm4, %v1716_v34, %v1720_v0  ;;  %v2155_v36 = vsel %vm9130_vm7, %v7326_v1, %v2154_v44  ;;  %v7319_v34 = vld [vmem:[%s8935_s22 + $0x48] sm:$0xe] }
  0x6e   : > { %v1749_v53 = vor.u32 %v1748_v56, %v1744_v9  ;;  %v2156_v43 = vrot.slane %v2154_v44, 4  ;;  %8135 = vmatmul.mubr.msk.bf16.gmra.mxu0 %vm746_vm3, %v7209_v27  ;;  %v1731_v32 = vsel %vm8976_vm4, %v1726_v26, %v1730_v3  ;;  %v2161_v38 = vrot.slane %v9352_v39, 5  ;;  %v7281_v26 = vld [vmem:[%s8935_s22 + $0x54] sm:$0xf] }
  0x6f   : > { %v1740_v16 = vrot.slane %v1739_v24, 4  ;;  %v2164_v46 = vrot.slane %v9359_v54, 5  ;;  %8138 = vmatprep.mubr.msk.bf16.mxu0 %vm746_vm3, %v7210_v30  ;;  %v9413_v52 = vcombine.low %v1721_v33, %v1731_v32  ;;  %v1757_v27 = vshrl.u32 %v7275_v60, 16  ;;  %v9473_v32 = vld [vmem:[%s8935_s22 + $0x5c] sm:$0x1] }
  0x70   : > { %v1750_v58 = vrot.slane %v1749_v53, 4  ;;  %v2158_v41 = vsel %vm9130_vm7, %v2156_v43, %v2157_v6  ;;  %8161 = vmatmul.mubr.msk.bf16.gmra.mxu1 %vm746_vm3, %v8635_v51  ;;  %v9422_v28 = vsel %vm9130_vm7, %v7327_v49, %v2161_v38  ;;  %v2163_v29 = vrot.slane %v2161_v38, 4 }
  0x71   : > { %v1745_v39 = vsel %vm8976_vm4, %v1740_v16, %v1744_v9  ;;  %v7337_v54 = vcombine.low %v2155_v36, %v2158_v41  ;;  %8188 = vmatprep.mubr.msk.bf16.mxu1 %vm746_vm3, %v7335_v23  ;;  %v1759_v59 = vrot.slane %v1757_v27, 4  ;;  %v1760_v42 = vshll.u32 %v7275_v60, 16  ;;  %v9481_v41 = vld [vmem:[%s8935_s22 + $0x64] sm:$0xf] }
  0x72   : > { %v1755_v30 = vsel %vm8976_vm4, %v1750_v58, %v1754_v62  ;;  %v1766_v63 = vshll.u32 %v9395_v18, 16  ;;  %v9436_v2 = vsel %vm9130_vm7, %v2163_v29, %v2164_v46  ;;  %v1770_v7 = vshrl.u32 %v9395_v18, 16  ;;  %v7284_v58 = vld [vmem:[%s8935_s22 + $0x60] sm:$0xf] }
  0x73   : > { %v9432_v0 = vcombine.low %v1745_v39, %v1755_v30  ;;  %v1776_v25 = vshll.u32 %v9398_v45, 16  ;;  %v7338_v23 = vcombine.low %v9422_v28, %v9436_v2  ;;  %v1762_v15 = vrot.slane %v1760_v42, 5  ;;  %v9488_v30 = vld [vmem:[%s8935_s22 + $0x68] sm:$0x1]  ;;  %v7321_v28 = vld [vmem:[%s8935_s22 + $0x60] sm:$0xe] }
  0x74   : > { %v1768_v3 = vrot.slane %v1766_v63, 5  ;;  %v1781_v5 = vshrl.u32 %v7278_v50, 16  ;;  %v1772_v12 = vrot.slane %v1770_v7, 4  ;;  %v1784_v47 = vshll.u32 %v7278_v50, 16 }
  0x75   : > { %v1778_v19 = vrot.slane %v1776_v25, 5  ;;  %v1790_v20 = vshll.u32 %v7279_v22, 16  ;;  %v1763_v21 = vor.u32 %v1762_v15, %v1759_v59  ;;  %v1794_v9 = vshrl.u32 %v7279_v22, 16  ;;  %v9493_v59 = vld [vmem:[%s11381_s4 + $0x20] sm:$0xf] }
  0x76   : > { %v1783_v10 = vrot.slane %v1781_v5, 4  ;;  %v1800_v1 = vshll.u32 %v9441_v31, 16  ;;  %8139 = vmatmul.mubr.msk.bf16.gmra.mxu0 %vm746_vm3, %v7211_v37  ;;  %v1773_v56 = vor.u32 %v1772_v12, %v1768_v3  ;;  %v1786_v62 = vrot.slane %v1784_v47, 5  ;;  %v7320_v25 = vld [vmem:[%s8935_s22 + $0x54] sm:$0xe] }
  0x77   : > { %v1792_v44 = vrot.slane %v1790_v20, 5  ;;  %v7328_v51 = vrot.slane %v7318_v14, 9  ;;  %8166 = vmatprep.mubr.msk.bf16.mxu0 %vm746_vm3, %v9332_v17  ;;  %v1764_v24 = vrot.slane %v1763_v21, 4  ;;  %v1796_v6 = vrot.slane %v1794_v9, 4 }
  0x78   : > { %v1802_v49 = vrot.slane %v1800_v1, 5  ;;  %v2168_v60 = vrot.slane %v9395_v18, 5  ;;  %8189 = vmatmul.mubr.msk.bf16.vlgmr.msra.gmra.mxu1 %vm746_vm3, %v7336_v61  ;;  %v1774_v11 = vrot.slane %v1773_v56, 4  ;;  %v1787_v8 = vor.u32 %v1786_v62, %v1783_v10 }
  0x79   : > { %v2171_v37 = vrot.slane %v9398_v45, 5  ;;  %v7329_v33 = vrot.slane %v7319_v34, 9  ;;  %8192 = vmatprep.mubr.msk.bf16.mxu1 %vm746_vm3, %v7337_v54  ;;  %v1769_v17 = vsel %vm8976_vm4, %v1764_v24, %v1768_v3  ;;  %v1797_v53 = vor.u32 %v1796_v6, %v1792_v44 }
  0x7a   : > { %v2169_v36 = vsel %vm9130_vm7, %v7328_v51, %v2168_v60  ;;  %v2170_v35 = vrot.slane %v2168_v60, 4  ;;  %v1779_v61 = vsel %vm8976_vm4, %v1774_v11, %v1778_v19  ;;  %v1788_v43 = vrot.slane %v1787_v8, 4  ;;  %v7287_v11 = vld [vmem:[%s8935_s22 + $0x6c] sm:$0xf] }
  0x7b   : > { %v2175_v18 = vrot.slane %v7279_v22, 5  ;;  %v2178_v45 = vrot.slane %v9441_v31, 5  ;;  %v9475_v16 = vcombine.low %v1769_v17, %v1779_v61  ;;  %v1798_v38 = vrot.slane %v1797_v53, 4  ;;  %v7288_v61 = vld [vmem:[%s8935_s22 + $0x70] sm:$0xf] }
  0x7c   : > { %v2172_v46 = vsel %vm9130_vm7, %v2170_v35, %v2171_v37  ;;  %v1805_v50 = vshrl.u32 %v7281_v26, 16  ;;  %v1793_v27 = vsel %vm8976_vm4, %v1788_v43, %v1792_v44  ;;  %v1808_v22 = vshll.u32 %v7281_v26, 16 }
  0x7d   : > { %v7339_v39 = vcombine.low %v2169_v36, %v2172_v46  ;;  %v2176_v54 = vsel %vm9130_vm7, %v7329_v33, %v2175_v18  ;;  %v2177_v29 = vrot.slane %v2175_v18, 4  ;;  %v1803_v42 = vsel %vm8976_vm4, %v1798_v38, %v1802_v49 }
  0x7e   : > { %v1807_v63 = vrot.slane %v1805_v50, 4  ;;  %v1814_v7 = vshll.u32 %v9467_v57, 16  ;;  %8167 = vmatmul.mubr.msk.bf16.vlgmr.msra.gmra.mxu0 %vm746_vm3, %v9365_v55  ;;  %v9501_v31 = vcombine.low %v1793_v27, %v1803_v42  ;;  %v1818_v3 = vshrl.u32 %v9467_v57, 16 }
  0x7f   : > { %v2179_v15 = vsel %vm9130_vm7, %v2177_v29, %v2178_v45  ;;  %v1824_v5 = vshll.u32 %v9473_v32, 16  ;;  %8209 = vmatpush3.bf16.msra.mxu0 %v8948_v13  ;;  %8170 = vmatprep.mubr.msk.bf16.mxu0 %vm746_vm3, %v9413_v52  ;;  %v1810_v12 = vrot.slane %v1808_v22, 5  ;;  %v1829_v47 = vshrl.u32 %v7284_v58, 16  ;;  %v7291_v29 = vld [vmem:[%s8935_s22 + $0x7c] sm:$0xf] }
  0x80   : > { %v7340_v14 = vcombine.low %v2176_v54, %v2179_v15  ;;  %v1816_v19 = vrot.slane %v1814_v7, 5  ;;  %8193 = vmatmul.mubr.msk.bf16.gmra.mxu1 %vm746_vm3, %v7338_v23  ;;  %v1820_v55 = vrot.slane %v1818_v3, 4  ;;  %v1832_v21 = vshll.u32 %v7284_v58, 16  ;;  %8570 = vmatprep.subr.msk.bf16.mxu0 %vm777_vm0, %v9493_v59  ;;  %v7292_v7 = vld [vmem:[%s8935_s22 + $0x80] sm:$0x1] }
  0x81   : > { %v1826_v20 = vrot.slane %v1824_v5, 5  ;;  %v1838_v10 = vshll.u32 %v9481_v41, 16  ;;  %8196 = vmatprep.mubr.msk.bf16.mxu1 %vm746_vm3, %v7339_v39  ;;  %v1811_v13 = vor.u32 %v1810_v12, %v1807_v63  ;;  %v1831_v52 = vrot.slane %v1829_v47, 4 }
  0x82   : > { %v1842_v9 = vshrl.u32 %v9481_v41, 16  ;;  %v1848_v1 = vshll.u32 %v9488_v30, 16  ;;  %v1821_v2 = vor.u32 %v1820_v55, %v1816_v19  ;;  %v1834_v23 = vrot.slane %v1832_v21, 5 }
  0x83   : > { %v1840_v34 = vrot.slane %v1838_v10, 5  ;;  %v7330_v56 = vrot.slane %v7320_v25, 9  ;;  %v1812_v62 = vrot.slane %v1811_v13, 4  ;;  %v2182_v26 = vrot.slane %v9467_v57, 5 }
  0x84   : > { %v1844_v44 = vrot.slane %v1842_v9, 4  ;;  %v1850_v51 = vrot.slane %v1848_v1, 5  ;;  %v1822_v24 = vrot.slane %v1821_v2, 4  ;;  %v1835_v6 = vor.u32 %v1834_v23, %v1831_v52  ;;  %v7323_v52 = vld [vmem:[%s8935_s22 + $0x78] sm:$0xe] }
  0x85   : > { %v2185_v49 = vrot.slane %v9473_v32, 5  ;;  %v7331_v60 = vrot.slane %v7321_v28, 9  ;;  %v1817_v8 = vsel %vm8976_vm4, %v1812_v62, %v1816_v19  ;;  %v2183_v33 = vsel %vm9130_vm7, %v7330_v56, %v2182_v26 }
  0x86   : > { %v1845_v37 = vor.u32 %v1844_v44, %v1840_v34  ;;  %v2184_v17 = vrot.slane %v2182_v26, 4  ;;  %8171 = vmatmul.mubr.msk.bf16.gmra.mxu0 %vm746_vm3, %v9432_v0  ;;  %v1827_v53 = vsel %vm8976_vm4, %v1822_v24, %v1826_v20  ;;  %v1836_v36 = vrot.slane %v1835_v6, 4  ;;  %v7289_v0 = vld [vmem:[%s8935_s22 + $0x74] sm:$0x1] }
  0x87   : > { %v2189_v35 = vrot.slane %v9481_v41, 5  ;;  %v2192_v57 = vrot.slane %v9488_v30, 5  ;;  %8174 = vmatprep.mubr.msk.bf16.mxu0 %vm746_vm3, %v9475_v16  ;;  %v7300_v43 = vcombine.low %v1817_v8, %v1827_v53  ;;  %v1853_v32 = vshrl.u32 %v7287_v11, 16  ;;  %v7290_v16 = vld [vmem:[%s8935_s22 + $0x78] sm:$0xf] }
  0x88   : > { %v1846_v18 = vrot.slane %v1845_v37, 4  ;;  %v2186_v45 = vsel %vm9130_vm7, %v2184_v17, %v2185_v49  ;;  %8197 = vmatmul.mubr.msk.bf16.gmra.mxu1 %vm746_vm3, %v7340_v14  ;;  %v1841_v38 = vsel %vm8976_vm4, %v1836_v36, %v1840_v34  ;;  %v1856_v39 = vshll.u32 %v7287_v11, 16  ;;  %v7322_v14 = vld [vmem:[%s8935_s22 + $0x6c] sm:$0xe]  ;;  %v7396_v17 = vld [vmem:[%s8935_s22 + $0x18] sm:$0xf] }
  0x89   : > { %v7341_v46 = vcombine.low %v2183_v33, %v2186_v45  ;;  %v2190_v50 = vsel %vm9130_vm7, %v7331_v60, %v2189_v35  ;;  %v2191_v58 = vrot.slane %v2189_v35, 4  ;;  %v1855_v27 = vrot.slane %v1853_v32, 4  ;;  %v9578_v32 = vld [vmem:[%s8935_s22 + $0x20] sm:$0x1] }
  0x8a   : > { %v1851_v41 = vsel %vm8976_vm4, %v1846_v18, %v1850_v51  ;;  %v1862_v54 = vshll.u32 %v7288_v61, 16  ;;  %v1866_v63 = vshrl.u32 %v7288_v61, 16  ;;  %v1872_v22 = vshll.u32 %v7289_v0, 16 }
  0x8b   : > { %v7301_v30 = vcombine.low %v1841_v38, %v1851_v41  ;;  %8200 = vmatprep.mubr.msk.bf16.mxu1 %vm746_vm3, %v7341_v46  ;;  %v2193_v42 = vsel %vm9130_vm7, %v2191_v58, %v2192_v57  ;;  %v1858_v15 = vrot.slane %v1856_v39, 5  ;;  %v1877_v5 = vshrl.u32 %v7290_v16, 16  ;;  %v7399_v58 = vld [vmem:[%s8935_s22 + $0x24] sm:$0xf] }
  0x8c   : > { %v7342_v25 = vcombine.low %v2190_v50, %v2193_v42  ;;  %v1864_v3 = vrot.slane %v1862_v54, 5  ;;  %v1868_v12 = vrot.slane %v1866_v63, 4  ;;  %v1874_v19 = vrot.slane %v1872_v22, 5  ;;  %v9594_v54 = vld [vmem:[%s8935_s22 + $0x28] sm:$0xf] }
  0x8d   : > { %v1880_v47 = vshll.u32 %v7290_v16, 16  ;;  %v1886_v55 = vshll.u32 %v7291_v29, 16  ;;  %v1859_v20 = vor.u32 %v1858_v15, %v1855_v27  ;;  %v1879_v21 = vrot.slane %v1877_v5, 4  ;;  %v9599_v63 = vld [vmem:[%s8935_s22 + $0x2c] sm:$0x1] }
  0x8e   : > { %v1890_v10 = vshrl.u32 %v7291_v29, 16  ;;  %v1896_v13 = vshll.u32 %v7292_v7, 16  ;;  %8175 = vmatmul.mubr.msk.bf16.gmra.mxu0 %vm746_vm3, %v9501_v31  ;;  %v1869_v9 = vor.u32 %v1868_v12, %v1864_v3  ;;  %v7332_v2 = vrot.slane %v7322_v14, 9 }
  0x8f   : > { %v1882_v1 = vrot.slane %v1880_v47, 5  ;;  %v1888_v28 = vrot.slane %v1886_v55, 5  ;;  %8178 = vmatprep.mubr.msk.bf16.mxu0 %vm746_vm3, %v7300_v43  ;;  %v1860_v23 = vrot.slane %v1859_v20, 4  ;;  %v2196_v62 = vrot.slane %v7288_v61, 5  ;;  %v9571_v61 = vld [vmem:[%s8935_s22 + $0x1c] sm:$0xf] }
  0x90   : > { %v1892_v34 = vrot.slane %v1890_v10, 4  ;;  %v1898_v56 = vrot.slane %v1896_v13, 5  ;;  %8201 = vmatmul.mubr.msk.bf16.gmra.mxu1 %vm746_vm3, %v7342_v25  ;;  %v1870_v44 = vrot.slane %v1869_v9, 4  ;;  %v2199_v26 = vrot.slane %v7289_v0, 5  ;;  %v9607_v10 = vld [vmem:[%s8935_s22 + $0x34] sm:$0xf] }
  0x91   : > { %v1883_v51 = vor.u32 %v1882_v1, %v1879_v21  ;;  %v7333_v24 = vrot.slane %v7323_v52, 9  ;;  %v1865_v31 = vsel %vm8976_vm4, %v1860_v23, %v1864_v3  ;;  %v2197_v49 = vsel %vm9130_vm7, %v7332_v2, %v2196_v62  ;;  %v7402_v3 = vld [vmem:[%s8935_s22 + $0x30] sm:$0xf]  ;;  %v8636_v13 = vld [vmem:[%s8935_s22 + $0x18] sm:$0xff]  }
  0x92   : > { %v1893_v6 = vor.u32 %v1892_v34, %v1888_v28  ;;  %v2198_v60 = vrot.slane %v2196_v62, 4  ;;  %v1875_v11 = vsel %vm8976_vm4, %v1870_v44, %v1874_v19  ;;  %v2203_v37 = vrot.slane %v7291_v29, 5 }
  0x93   : > { %v1884_v8 = vrot.slane %v1883_v51, 4  ;;  %v2206_v33 = vrot.slane %v7292_v7, 5  ;;  %v7302_v53 = vcombine.low %v1865_v31, %v1875_v11  ;;  %v2978_v57 = vsel %vm777_vm0, %v9313_v4, 0  ;;  %v7405_v31 = vld [vmem:[%s8935_s22 + $0x3c] sm:$0xf] }
  0x94   : > { %v1894_v36 = vrot.slane %v1893_v6, 4  ;;  %v2200_v35 = vsel %vm9130_vm7, %v2198_v60, %v2199_v26  ;;  %v2204_v45 = vsel %vm9130_vm7, %v7333_v24, %v2203_v37  ;;  %v2205_v0 = vrot.slane %v2203_v37, 4  ;;  %8231 = vmatpush3.bf16.msra.mxu1 %v2978_v57 }
  0x95   : > { %v1889_v43 = vsel %vm8976_vm4, %v1884_v8, %v1888_v28  ;;  %v7343_v18 = vcombine.low %v2197_v49, %v2200_v35  ;;  %v9584_v4 = vsel %vm777_vm0, %v9493_v59, 0  ;;  %v2676_v46 = vshrl.u32 %v7396_v17, 16  ;;  %v9622_v8 = vld [vmem:[%s8935_s22 + $0x40] sm:$0xf]  ;;  %vm10133_vm0 = vmand %vm3778_vm11, %vm3568_vm10 }
  0x96   : > { %v1899_v38 = vsel %vm8976_vm4, %v1894_v36, %v1898_v56  ;;  %v2679_v50 = vshll.u32 %v7396_v17, 16  ;;  %8179 = vmatmul.mubr.msk.bf16.gmra.mxu0 %vm746_vm3, %v7301_v30  ;;  %v2207_v41 = vsel %vm9130_vm7, %v2205_v0, %v2206_v33  ;;  %v2685_v27 = vshll.u32 %v9571_v61, 16  ;;  %v9611_v56 = vld [vmem:[%s8935_s22 + $0x38] sm:$0x1] }
  0x97   : > { %v7303_v16 = vcombine.low %v1889_v43, %v1899_v38  ;;  %8204 = vmatprep.mubr.msk.bf16.mxu1 %vm746_vm3, %v7343_v18  ;;  %v2689_v39 = vshrl.u32 %v9571_v61, 16  ;;  %8182 = vmatprep.mubr.msk.bf16.mxu0 %vm746_vm3, %v7302_v53  ;;  %v7344_v59 = vcombine.low %v2204_v45, %v2207_v41  ;;  %v2678_v29 = vrot.slane %v2676_v46, 4  ;;  %v9629_v43 = vld [vmem:[%s8935_s22 + $0x44] sm:$0x1] }
  0x98   : > { %v2681_v42 = vrot.slane %v2679_v50, 5  ;;  %v2695_v30 = vshll.u32 %v9578_v32, 16  ;;  %v2687_v22 = vrot.slane %v2685_v27, 5  ;;  %v2700_v25 = vshrl.u32 %v7399_v58, 16  ;;  %v7408_v50 = vld [vmem:[%s8935_s22 + $0x48] sm:$0xf] }
  0x99   : > { %v2691_v7 = vrot.slane %v2689_v39, 4  ;;  %v2703_v15 = vshll.u32 %v7399_v58, 16  ;;  %8205 = vmatmul.mubr.msk.bf16.gmra.mxu1 %vm746_vm3, %v7344_v59  ;;  %v2709_v12 = vshll.u32 %v9594_v54, 16  ;;  %v2713_v19 = vshrl.u32 %v9594_v54, 16  ;;  %v8637_v58 = vld [vmem:[%s8935_s22 + $0x24] sm:$0xff]  }
  0x9a   : > { %v2682_v5 = vor.u32 %v2681_v42, %v2678_v29  ;;  %v2697_v14 = vrot.slane %v2695_v30, 5  ;;  %v2702_v55 = vrot.slane %v2700_v25, 4  ;;  %v2719_v21 = vshll.u32 %v9599_v63, 16  ;;  %v9638_v59 = vld [vmem:[%s8935_s22 + $0x4c] sm:$0xf]  ;;  %v8638_v29 = vld [vmem:[%s8935_s22 + $0x30] sm:$0xff]  }
  0x9b   : > { %v2692_v47 = vor.u32 %v2691_v7, %v2687_v22  ;;  %v2705_v20 = vrot.slane %v2703_v15, 5  ;;  %v2711_v9 = vrot.slane %v2709_v12, 5  ;;  %v2715_v1 = vrot.slane %v2713_v19, 4 }
  0x9c   : > { %v2683_v52 = vrot.slane %v2682_v5, 4  ;;  %v2724_v28 = vshrl.u32 %v7402_v3, 16  ;;  %v2721_v34 = vrot.slane %v2719_v21, 5  ;;  %v2727_v62 = vshll.u32 %v7402_v3, 16  ;;  %v9647_v3 = vld [vmem:[%s8935_s22 + $0x50] sm:$0x1] }
  0x9d   : > { %v2693_v2 = vrot.slane %v2692_v47, 4  ;;  %v2706_v23 = vor.u32 %v2705_v20, %v2702_v55  ;;  %v2716_v51 = vor.u32 %v2715_v1, %v2711_v9  ;;  %v2733_v24 = vshll.u32 %v9607_v10, 16  ;;  %v7411_v20 = vld [vmem:[%s8935_s22 + $0x54] sm:$0xf]  ;;  %v9656_v1 = vld [vmem:[%s8935_s22 + $0x58] sm:$0xf] }
  0x9e   : > { %v2688_v44 = vsel %vm8976_vm4, %v2683_v52, %v2687_v22  ;;  %v2726_v26 = vrot.slane %v2724_v28, 4  ;;  %8183 = vmatmul.mubr.msk.bf16.gmra.mxu0 %vm746_vm3, %v7303_v16  ;;  %v2729_v60 = vrot.slane %v2727_v62, 5  ;;  %v2737_v11 = vshrl.u32 %v9607_v10, 16 }
  0x9f   : > { %v2698_v6 = vsel %vm8976_vm4, %v2693_v2, %v2697_v14  ;;  %v2707_v49 = vrot.slane %v2706_v23, 4  ;;  %8210 = vmatprep.mubr.msk.bf16.mxu0 %vm746_vm3, %v8636_v13  ;;  %v2717_v33 = vrot.slane %v2716_v51, 4  ;;  %v2735_v17 = vrot.slane %v2733_v24, 5 }
  0xa0   : > { %v7427_v37 = vcombine.low %v2688_v44, %v2698_v6  ;;  %v2743_v53 = vshll.u32 %v9611_v56, 16  ;;  %v2730_v35 = vor.u32 %v2729_v60, %v2726_v26  ;;  %v2739_v57 = vrot.slane %v2737_v11, 4  ;;  %v8639_v60 = vld [vmem:[%s8935_s22 + $0x3c] sm:$0xff]  }
  0xa1   : > { %v2712_v36 = vsel %vm8976_vm4, %v2707_v49, %v2711_v9  ;;  %v2748_v18 = vshrl.u32 %v7405_v31, 16  ;;  %v2722_v45 = vsel %vm8976_vm4, %v2717_v33, %v2721_v34  ;;  %v2751_v38 = vshll.u32 %v7405_v31, 16  ;;  %v9665_v31 = vld [vmem:[%s8935_s22 + $0x5c] sm:$0x1] }
  0xa2   : > { %8232 = vmatprep.mubr.msk.bf16.mxu1 %vm746_vm3, %v7427_v37  ;;  %v2745_v0 = vrot.slane %v2743_v53, 5  ;;  %v2757_v46 = vshll.u32 %v9622_v8, 16  ;;  %v7428_v16 = vcombine.low %v2712_v36, %v2722_v45  ;;  %v2731_v41 = vrot.slane %v2730_v35, 4  ;;  %v7414_v53 = vld [vmem:[%s8935_s22 + $0x60] sm:$0xf]  ;;  %v8640_v35 = vld [vmem:[%s8935_s22 + $0x48] sm:$0xff]  }
  0xa3   : > { %v2740_v27 = vor.u32 %v2739_v57, %v2735_v17  ;;  %v2750_v39 = vrot.slane %v2748_v18, 4  ;;  %v2753_v42 = vrot.slane %v2751_v38, 5  ;;  %v2761_v22 = vshrl.u32 %v9622_v8, 16 }
  0xa4   : > { %v2759_v30 = vrot.slane %v2757_v46, 5  ;;  %v2767_v7 = vshll.u32 %v9629_v43, 16  ;;  %8233 = vmatmul.mubr.msk.bf16.vlgmr.msra.gmra.mxu1 %vm746_vm3, %v7428_v16  ;;  %v2736_v25 = vsel %vm8976_vm4, %v2731_v41, %v2735_v17  ;;  %v2772_v5 = vshrl.u32 %v7408_v50, 16 }
  0xa5   : > { %v2741_v15 = vrot.slane %v2740_v27, 4  ;;  %v2775_v14 = vshll.u32 %v7408_v50, 16  ;;  %v2754_v12 = vor.u32 %v2753_v42, %v2750_v39  ;;  %v2763_v19 = vrot.slane %v2761_v22, 4  ;;  %v9681_v27 = vld [vmem:[%s8935_s22 + $0x68] sm:$0x1] }
  0xa6   : > { %v2769_v47 = vrot.slane %v2767_v7, 5  ;;  %v2781_v55 = vshll.u32 %v9638_v59, 16  ;;  %8211 = vmatmul.mubr.msk.bf16.vlgmr.msra.gmra.mxu0 %vm746_vm3, %v8637_v58  ;;  %v2774_v13 = vrot.slane %v2772_v5, 4  ;;  %v2785_v9 = vshrl.u32 %v9638_v59, 16 }
  0xa7   : > { %v2746_v21 = vsel %vm8976_vm4, %v2741_v15, %v2745_v0  ;;  %v2777_v52 = vrot.slane %v2775_v14, 5  ;;  %8253 = vmatpush3.bf16.msra.mxu0 %v9584_v4  ;;  %8214 = vmatprep.mubr.msk.bf16.mxu0 %vm746_vm3, %v8638_v29  ;;  %v2755_v2 = vrot.slane %v2754_v12, 4  ;;  %v2764_v23 = vor.u32 %v2763_v19, %v2759_v30  ;;  %v9675_v0 = vld [vmem:[%s8935_s22 + $0x64] sm:$0xf]  ;;  %v9692_v19 = vld [vmem:[%s8935_s22 + $0x70] sm:$0xf] }
  0xa8   : > { %v7429_v28 = vcombine.low %v2736_v25, %v2746_v21  ;;  %v2783_v34 = vrot.slane %v2781_v55, 5  ;;  %v2787_v44 = vrot.slane %v2785_v9, 4  ;;  %v2791_v51 = vshll.u32 %v9647_v3, 16  ;;  %v7417_v25 = vld [vmem:[%s8935_s22 + $0x6c] sm:$0xf] }
  0xa9   : > { %v2778_v62 = vor.u32 %v2777_v52, %v2774_v13  ;;  %v2796_v26 = vshrl.u32 %v7411_v20, 16  ;;  %v2760_v24 = vsel %vm8976_vm4, %v2755_v2, %v2759_v30  ;;  %v2765_v4 = vrot.slane %v2764_v23, 4  ;;  %v8641_v13 = vld [vmem:[%s8935_s22 + $0x54] sm:$0xff]  }
  0xaa   : > { %8236 = vmatprep.mubr.msk.bf16.mxu1 %vm746_vm3, %v7429_v28  ;;  %v2799_v6 = vshll.u32 %v7411_v20, 16  ;;  %v2805_v49 = vshll.u32 %v9656_v1, 16  ;;  %v2788_v37 = vor.u32 %v2787_v44, %v2783_v34  ;;  %v2793_v33 = vrot.slane %v2791_v51, 5  ;;  %v9700_v44 = vld [vmem:[%s8935_s22 + $0x74] sm:$0x1] }
  0xab   : > { %v2779_v11 = vrot.slane %v2778_v62, 4  ;;  %v2798_v17 = vrot.slane %v2796_v26, 4  ;;  %v2770_v36 = vsel %vm8976_vm4, %v2765_v4, %v2769_v47  ;;  %v2809_v45 = vshrl.u32 %v9656_v1, 16  ;;  %v7420_v26 = vld [vmem:[%s8935_s22 + $0x78] sm:$0xf]  ;;  %v8642_v4 = vld [vmem:[%s8935_s22 + $0x60] sm:$0xff]  }
  0xac   : > { %v2801_v57 = vrot.slane %v2799_v6, 5  ;;  %v2807_v18 = vrot.slane %v2805_v49, 5  ;;  %v7430_v38 = vcombine.low %v2760_v24, %v2770_v36  ;;  %v2789_v50 = vrot.slane %v2788_v37, 4 }
  0xad   : > { %v2784_v46 = vsel %vm8976_vm4, %v2779_v11, %v2783_v34  ;;  %v2815_v58 = vshll.u32 %v9665_v31, 16  ;;  %v2811_v41 = vrot.slane %v2809_v45, 4  ;;  %v2820_v39 = vshrl.u32 %v7414_v53, 16  ;;  %v9709_v11 = vld [vmem:[%s8935_s22 + $0x7c] sm:$0xf] }
  0xae   : > { %v2802_v16 = vor.u32 %v2801_v57, %v2798_v17  ;;  %v2823_v29 = vshll.u32 %v7414_v53, 16  ;;  %8215 = vmatmul.mubr.msk.bf16.gmra.mxu0 %vm746_vm3, %v8639_v60  ;;  %8237 = vmatmul.mubr.msk.bf16.gmra.mxu1 %vm746_vm3, %v7430_v38  ;;  %v2794_v42 = vsel %vm8976_vm4, %v2789_v50, %v2793_v33  ;;  %v2829_v22 = vshll.u32 %v9675_v0, 16 }
  0xaf   : > { %v2817_v30 = vrot.slane %v2815_v58, 5  ;;  %v2833_v7 = vshrl.u32 %v9675_v0, 16  ;;  %8218 = vmatprep.mubr.msk.bf16.mxu0 %vm746_vm3, %v8640_v35  ;;  %v7431_v15 = vcombine.low %v2784_v46, %v2794_v42  ;;  %v2812_v14 = vor.u32 %v2811_v41, %v2807_v18  ;;  %v9719_v46 = vld [vmem:[%s8935_s22 + $0x80] sm:$0x1] }
  0xb0   : > { %v2803_v5 = vrot.slane %v2802_v16, 4  ;;  %v2822_v12 = vrot.slane %v2820_v39, 4  ;;  %v2825_v47 = vrot.slane %v2823_v29, 5  ;;  %v2831_v55 = vrot.slane %v2829_v22, 5  ;;  %v7423_v16 = vld [vmem:[%s8935_s22 + $0x84] sm:$0xf] }
  0xb1   : > { %v2835_v20 = vrot.slane %v2833_v7, 4  ;;  %v2839_v21 = vshll.u32 %v9681_v27, 16  ;;  %8240 = vmatprep.mubr.msk.bf16.mxu1 %vm746_vm3, %v7431_v15  ;;  %v2813_v9 = vrot.slane %v2812_v14, 4  ;;  %v2844_v28 = vshrl.u32 %v7417_v25, 16 }
  0xb2   : > { %v2808_v52 = vsel %vm8976_vm4, %v2803_v5, %v2807_v18  ;;  %v2847_v2 = vshll.u32 %v7417_v25, 16  ;;  %v2826_v23 = vor.u32 %v2825_v47, %v2822_v12  ;;  %v2853_v51 = vshll.u32 %v9692_v19, 16  ;;  %v9733_v47 = vld [vmem:[%s8935_s22 + $0x8c] sm:$0x1] }
  0xb3   : > { %v2836_v34 = vor.u32 %v2835_v20, %v2831_v55  ;;  %v2841_v62 = vrot.slane %v2839_v21, 5  ;;  %v2818_v24 = vsel %vm8976_vm4, %v2813_v9, %v2817_v30  ;;  %v2846_v6 = vrot.slane %v2844_v28, 4  ;;  %v9725_v30 = vld [vmem:[%s8935_s22 + $0x88] sm:$0xf]  ;;  %v8643_v20 = vld [vmem:[%s8935_s22 + $0x6c] sm:$0xff]  }
  0xb4   : > { %v2849_v49 = vrot.slane %v2847_v2, 5  ;;  %v2857_v60 = vshrl.u32 %v9692_v19, 16  ;;  %v7432_v37 = vcombine.low %v2808_v52, %v2818_v24  ;;  %v2827_v33 = vrot.slane %v2826_v23, 4  ;;  %v7447_v28 = vld [vmem:[%s8935_s22 + $0x18] sm:$0xe] }
  0xb5   : > { %v2837_v17 = vrot.slane %v2836_v34, 4  ;;  %v2855_v53 = vrot.slane %v2853_v51, 5  ;;  %v2863_v57 = vshll.u32 %v9700_v44, 16  ;;  %v2868_v18 = vshrl.u32 %v7420_v26, 16  ;;  %v8644_v23 = vld [vmem:[%s8935_s22 + $0x78] sm:$0xff]  }
  0xb6   : > { %v2850_v36 = vor.u32 %v2849_v49, %v2846_v6  ;;  %v2859_v35 = vrot.slane %v2857_v60, 4  ;;  %8219 = vmatmul.mubr.msk.bf16.gmra.mxu0 %vm746_vm3, %v8641_v13  ;;  %8241 = vmatmul.mubr.msk.bf16.gmra.mxu1 %vm746_vm3, %v7432_v37  ;;  %v2832_v45 = vsel %vm8976_vm4, %v2827_v33, %v2831_v55  ;;  %v2871_v50 = vshll.u32 %v7420_v26, 16 }
  0xb7   : > { %v2842_v38 = vsel %vm8976_vm4, %v2837_v17, %v2841_v62  ;;  %v2877_v58 = vshll.u32 %v9709_v11, 16  ;;  %8222 = vmatprep.mubr.msk.bf16.mxu0 %vm746_vm3, %v8642_v4  ;;  %v2865_v42 = vrot.slane %v2863_v57, 5  ;;  %v2870_v22 = vrot.slane %v2868_v18, 4 }
  0xb8   : > { %v7433_v41 = vcombine.low %v2832_v45, %v2842_v38  ;;  %v2851_v39 = vrot.slane %v2850_v36, 4  ;;  %v2860_v29 = vor.u32 %v2859_v35, %v2855_v53  ;;  %v2873_v7 = vrot.slane %v2871_v50, 5  ;;  %v7448_v38 = vld [vmem:[%s8935_s22 + $0x24] sm:$0xe] }
  0xb9   : > { %v2879_v25 = vrot.slane %v2877_v58, 5  ;;  %v2881_v15 = vshrl.u32 %v9709_v11, 16  ;;  %v2887_v12 = vshll.u32 %v9719_v46, 16  ;;  %v2892_v55 = vshrl.u32 %v7423_v16, 16 }
  0xba   : > { %8244 = vmatprep.mubr.msk.bf16.mxu1 %vm746_vm3, %v7433_v41  ;;  %v2856_v5 = vsel %vm8976_vm4, %v2851_v39, %v2855_v53  ;;  %v2861_v14 = vrot.slane %v2860_v29, 4  ;;  %v2874_v21 = vor.u32 %v2873_v7, %v2870_v22  ;;  %v2895_v52 = vshll.u32 %v7423_v16, 16  ;;  %v8645_v22 = vld [vmem:[%s8935_s22 + $0x84] sm:$0xff]  }
  0xbb   : > { %v2883_v13 = vrot.slane %v2881_v15, 4  ;;  %v2901_v9 = vshll.u32 %v9725_v30, 16  ;;  %v2889_v34 = vrot.slane %v2887_v12, 5  ;;  %v2894_v62 = vrot.slane %v2892_v55, 4 }
  0xbc   : > { %v2866_v2 = vsel %vm8976_vm4, %v2861_v14, %v2865_v42  ;;  %v2905_v51 = vshrl.u32 %v9725_v30, 16  ;;  %v2875_v24 = vrot.slane %v2874_v21, 4  ;;  %v2897_v6 = vrot.slane %v2895_v52, 5 }
  0xbd   : > { %v7434_v26 = vcombine.low %v2856_v5, %v2866_v2  ;;  %v2884_v4 = vor.u32 %v2883_v13, %v2879_v25  ;;  %v2903_v49 = vrot.slane %v2901_v9, 5  ;;  %v2911_v37 = vshll.u32 %v9733_v47, 16 }
  0xbe   : > { %v2907_v60 = vrot.slane %v2905_v51, 4  ;;  %v7457_v33 = vrot.slane %v7447_v28, 9  ;;  %8223 = vmatmul.mubr.msk.bf16.gmra.mxu0 %vm746_vm3, %v8643_v20  ;;  %v2880_v17 = vsel %vm8976_vm4, %v2875_v24, %v2879_v25  ;;  %v2898_v36 = vor.u32 %v2897_v6, %v2894_v62  ;;  %v7450_v28 = vld [vmem:[%s8935_s22 + $0x3c] sm:$0xe] }
  0xbf   : > { %8245 = vmatmul.mubr.msk.bf16.gmra.mxu1 %vm746_vm3, %v7434_v26  ;;  %v2885_v53 = vrot.slane %v2884_v4, 4  ;;  %v3155_v35 = vrot.slane %v9571_v61, 5  ;;  %8226 = vmatprep.mubr.msk.bf16.mxu0 %vm746_vm3, %v8644_v23  ;;  %v2913_v18 = vrot.slane %v2911_v37, 5  ;;  %v3158_v45 = vrot.slane %v9578_v32, 5  ;;  %v7449_v61 = vld [vmem:[%s8935_s22 + $0x30] sm:$0xe] }
  0xc0   : > { %v2908_v57 = vor.u32 %v2907_v60, %v2903_v49  ;;  %v2899_v58 = vrot.slane %v2898_v36, 4  ;;  %v3162_v42 = vrot.slane %v9594_v54, 5  ;;  %v7458_v25 = vrot.slane %v7448_v38, 9  ;;  %v7451_v23 = vld [vmem:[%s8935_s22 + $0x48] sm:$0xe] }
  0xc1   : > { %v2890_v50 = vsel %vm8976_vm4, %v2885_v53, %v2889_v34  ;;  %v3156_v16 = vsel %vm9130_vm7, %v7457_v33, %v3155_v35  ;;  %v3157_v41 = vrot.slane %v3155_v35, 4  ;;  %v3169_v15 = vrot.slane %v9607_v10, 5  ;;  %v7452_v33 = vld [vmem:[%s8935_s22 + $0x54] sm:$0xe] }
  0xc2   : > { %v7435_v39 = vcombine.low %v2880_v17, %v2890_v50  ;;  %v2909_v29 = vrot.slane %v2908_v57, 4  ;;  %v2904_v7 = vsel %vm8976_vm4, %v2899_v58, %v2903_v49  ;;  %v3164_v12 = vrot.slane %v3162_v42, 4  ;;  %v7453_v17 = vld [vmem:[%s8935_s22 + $0x60] sm:$0xe] }
  0xc3   : > { %v3159_v32 = vsel %vm9130_vm7, %v3157_v41, %v3158_v45  ;;  %v3165_v54 = vrot.slane %v9599_v63, 5  ;;  %v7459_v20 = vrot.slane %v7449_v61, 9  ;;  %v3171_v21 = vrot.slane %v3169_v15, 4  ;;  %v7454_v41 = vld [vmem:[%s8935_s22 + $0x6c] sm:$0xe] }
  0xc4   : > { %8248 = vmatprep.mubr.msk.bf16.mxu1 %vm746_vm3, %v7435_v39  ;;  %v2914_v5 = vsel %vm8976_vm4, %v2909_v29, %v2913_v18  ;;  %v7468_v14 = vcombine.low %v3156_v16, %v3159_v32  ;;  %v3172_v13 = vrot.slane %v9611_v56, 5  ;;  %v3163_v10 = vsel %vm9130_vm7, %v7458_v25, %v3162_v42  ;;  %v7455_v39 = vld [vmem:[%s8935_s22 + $0x78] sm:$0xe] }
  0xc5   : > { %v7436_v55 = vcombine.low %v2904_v7, %v2914_v5  ;;  %v3166_v52 = vsel %vm9130_vm7, %v3164_v12, %v3165_v54  ;;  %v3176_v9 = vrot.slane %v9622_v8, 5  ;;  %v3170_v63 = vsel %vm9130_vm7, %v7459_v20, %v3169_v15  ;;  %v7456_v12 = vld [vmem:[%s8935_s22 + $0x84] sm:$0xe] }
  0xc6   : > { %8227 = vmatmul.mubr.msk.bf16.gmra.mxu0 %vm746_vm3, %v8645_v22  ;;  %v3173_v56 = vsel %vm9130_vm7, %v3171_v21, %v3172_v13  ;;  %v3183_v2 = vrot.slane %v9638_v59, 5  ;;  %v7469_v34 = vcombine.low %v3163_v10, %v3166_v52  ;;  %v7460_v51 = vrot.slane %v7450_v28, 9 }
  0xc7   : > { %8249 = vmatmul.mubr.msk.bf16.gmra.mxu1 %vm746_vm3, %v7436_v55  ;;  %8254 = vmatprep.mubr.msk.bf16.mxu0 %vm746_vm3, %v7468_v14  ;;  %v7470_v62 = vcombine.low %v3170_v63, %v3173_v56  ;;  %v3178_v26 = vrot.slane %v3176_v9, 4  ;;  %v3179_v24 = vrot.slane %v9629_v43, 5  ;;  %v7461_v4 = vrot.slane %v7451_v23, 9 }
  0xc8   : > { %v3185_v8 = vrot.slane %v3183_v2, 4  ;;  %v3186_v6 = vrot.slane %v9647_v3, 5  ;;  %v3177_v59 = vsel %vm9130_vm7, %v7460_v51, %v3176_v9  ;;  %v3190_v60 = vrot.slane %v9656_v1, 5 }
  0xc9   : > { %v3180_v49 = vsel %vm9130_vm7, %v3178_v26, %v3179_v24  ;;  %v3184_v37 = vsel %vm9130_vm7, %v7461_v4, %v3183_v2  ;;  %v3197_v3 = vrot.slane %v9675_v0, 5  ;;  %v7462_v35 = vrot.slane %v7452_v33, 9 }
  0xca   : > { %v3187_v43 = vsel %vm9130_vm7, %v3185_v8, %v3186_v6  ;;  %v7471_v53 = vcombine.low %v3177_v59, %v3180_v49  ;;  %v3192_v57 = vrot.slane %v3190_v60, 4  ;;  %v3193_v18 = vrot.slane %v9665_v31, 5 }
  0xcb   : > { %v7472_v36 = vcombine.low %v3184_v37, %v3187_v43  ;;  %v7463_v45 = vrot.slane %v7453_v17, 9  ;;  %v3199_v1 = vrot.slane %v3197_v3, 4  ;;  %v3200_v38 = vrot.slane %v9681_v27, 5 }
  0xcc   : > { %v3191_v0 = vsel %vm9130_vm7, %v7462_v35, %v3190_v60  ;;  %v3194_v50 = vsel %vm9130_vm7, %v3192_v57, %v3193_v18  ;;  %v3204_v58 = vrot.slane %v9692_v19, 5  ;;  %v3211_v27 = vrot.slane %v9709_v11, 5 }
  0xcd   : > { %v3198_v16 = vsel %vm9130_vm7, %v7463_v45, %v3197_v3  ;;  %v3201_v31 = vsel %vm9130_vm7, %v3199_v1, %v3200_v38  ;;  %v7473_v29 = vcombine.low %v3191_v0, %v3194_v50  ;;  %v7464_v61 = vrot.slane %v7454_v41, 9 }
  0xce   : > { %8255 = vmatmul.mubr.msk.bf16.vlgmr.msra.gmra.mxu0 %vm746_vm3, %v7469_v34  ;;  %v7474_v42 = vcombine.low %v3198_v16, %v3201_v31  ;;  %v3206_v22 = vrot.slane %v3204_v58, 4  ;;  %v3207_v7 = vrot.slane %v9700_v44, 5  ;;  %v7465_v32 = vrot.slane %v7455_v39, 9 }
  0xcf   : > { %8258 = vmatprep.mubr.msk.bf16.mxu0 %vm746_vm3, %v7470_v62  ;;  %v3213_v25 = vrot.slane %v3211_v27, 4  ;;  %v3214_v19 = vrot.slane %v9719_v46, 5  ;;  %v3205_v15 = vsel %vm9130_vm7, %v7464_v61, %v3204_v58  ;;  %v3218_v5 = vrot.slane %v9725_v30, 5 }
  0xd0   : > { %v3208_v11 = vsel %vm9130_vm7, %v3206_v22, %v3207_v7  ;;  %v3212_v14 = vsel %vm9130_vm7, %v7465_v32, %v3211_v27  ;;  %v7466_v55 = vrot.slane %v7456_v12, 9  ;;  %v3221_v21 = vrot.slane %v9733_v47, 5 }
  0xd1   : > { %v3215_v44 = vsel %vm9130_vm7, %v3213_v25, %v3214_v19  ;;  %v7475_v46 = vcombine.low %v3205_v15, %v3208_v11  ;;  %v3220_v20 = vrot.slane %v3218_v5, 4 }
  0xd2   : > { %v7476_v54 = vcombine.low %v3212_v14, %v3215_v44  ;;  %v3219_v30 = vsel %vm9130_vm7, %v7466_v55, %v3218_v5 }
  0xd3   : > { %v3222_v52 = vsel %vm9130_vm7, %v3220_v20, %v3221_v21 }
  0xd4   : > { %v7477_v56 = vcombine.low %v3219_v30, %v3222_v52 }
  0xd6   : > { %8259 = vmatmul.mubr.msk.bf16.gmra.mxu0 %vm746_vm3, %v7471_v53 }
  0xd7   : > { %8262 = vmatprep.mubr.msk.bf16.mxu0 %vm746_vm3, %v7472_v36 }
  0xde   : > { %8263 = vmatmul.mubr.msk.bf16.gmra.mxu0 %vm746_vm3, %v7473_v29 }
  0xdf   : > { %8266 = vmatprep.mubr.msk.bf16.mxu0 %vm746_vm3, %v7474_v42 }
  0xe4   : > { %v8102_v13 = vpop.f32.mrf.mxu1 }
  0xe6   : > { %8267 = vmatmul.mubr.msk.bf16.gmra.mxu0 %vm746_vm3, %v7475_v46  ;;  %v1011_v10 = vpop.f32.mrf.mxu1 }
  0xe7   : > { %8270 = vmatprep.mubr.msk.bf16.mxu0 %vm746_vm3, %v7476_v54 }
  0xe8   : > { %v8103_v9 = vpop.f32.mrf.mxu1 }
  0xea   : > { %v8080_v63 = vpop.f32.mrf.mxu0  ;;  %v1014_v28 = vpop.f32.mrf.mxu1 }
  0xeb   : > { %v1020_v2 = vadd.f32 %v8102_v13, %v8080_v63 }
  0xec   : > { %v815_v23 = vpop.f32.mrf.mxu0  ;;  %v8106_v34 = vpop.f32.mrf.mxu1 }
  0xed   : > { %v1012_v47 = vadd.f32 %v1011_v10, %v815_v23 }
  0xee   : > { %8271 = vmatmul.mubr.msk.bf16.gmra.mxu0 %vm746_vm3, %v7477_v56  ;;  %v8081_v62 = vpop.f32.mrf.mxu0  ;;  %v1027_v51 = vpop.f32.mrf.mxu1  ;;  %vm10141_vm3 = vmor %vm3568_vm10, %vm3569_vm12 }
  0xef   : > { %v1023_v26 = vadd.f32 %v8103_v9, %v8081_v62 }
  0xf0   : > { %v818_v24 = vpop.f32.mrf.mxu0  ;;  %v8107_v4 = vpop.f32.mrf.mxu1 }
  0xf1   : > { %v1015_v8 = vadd.f32 %v1014_v28, %v818_v24 }
  0xf2   : > { %v1030_v6 = vpop.f32.mrf.mxu1 }
  0xf4   : > { %v8084_v59 = vpop.f32.mrf.mxu0 }
  0xf5   : > { %v9837_v49 = vadd.f32 %v8106_v34, %v8084_v59 }
  0xf6   : > { %v831_v60 = vpop.f32.mrf.mxu0  ;;  %v8110_v37 = vpop.f32.mrf.mxu1 }
  0xf7   : > { %v9839_v43 = vadd.f32 %v1027_v51, %v831_v60 }
  0xf8   : > { %v8085_v33 = vpop.f32.mrf.mxu0  ;;  %v1043_v3 = vpop.f32.mrf.mxu1 }
  0xf9   : > { %v9841_v17 = vadd.f32 %v8107_v4, %v8085_v33 }
  0xfa   : > { %v834_v53 = vpop.f32.mrf.mxu0  ;;  %v8111_v36 = vpop.f32.mrf.mxu1 }
  0xfb   : > { %v9843_v35 = vadd.f32 %v1030_v6, %v834_v53 }
  0xfc   : > { %v8088_v57 = vpop.f32.mrf.mxu0  ;;  %v1046_v18 = vpop.f32.mrf.mxu1 }
  0xfd   : > { %v9845_v45 = vadd.f32 %v8110_v37, %v8088_v57 }
  0xfe   : > { %v847_v1 = vpop.f32.mrf.mxu0  ;;  %v8114_v38 = vpop.f32.mrf.mxu1 }
  0xff   : > { %v9847_v0 = vadd.f32 %v1043_v3, %v847_v1 }
 0x100   : > { %v8089_v50 = vpop.f32.mrf.mxu0  ;;  %v1059_v58 = vpop.f32.mrf.mxu1 }
 0x101   : > { %v9849_v16 = vadd.f32 %v8111_v36, %v8089_v50 }
 0x102   : > { %v850_v31 = vpop.f32.mrf.mxu0  ;;  %v8115_v41 = vpop.f32.mrf.mxu1 }
 0x103   : > { %v9851_v27 = vadd.f32 %v1046_v18, %v850_v31 }
 0x104   : > { %v1062_v39 = vpop.f32.mrf.mxu1 }
 0x106   : > { %v8092_v29 = vpop.f32.mrf.mxu0 }
 0x107   : > { %v9853_v42 = vadd.f32 %v8114_v38, %v8092_v29 }
 0x108   : > { %v863_v61 = vpop.f32.mrf.mxu0  ;;  %v8118_v22 = vpop.f32.mrf.mxu1 }
 0x109   : > { %v9855_v7 = vadd.f32 %v1059_v58, %v863_v61 }
 0x10a   : > { %v8093_v32 = vpop.f32.mrf.mxu0  ;;  %v1075_v25 = vpop.f32.mrf.mxu1 }
 0x10b   : > { %v9857_v19 = vadd.f32 %v8115_v41, %v8093_v32 }
 0x10c   : > { %v866_v15 = vpop.f32.mrf.mxu0  ;;  %v8119_v11 = vpop.f32.mrf.mxu1 }
 0x10d   : > { %v9859_v5 = vadd.f32 %v1062_v39, %v866_v15 }
 0x10e   : > { %v8096_v14 = vpop.f32.mrf.mxu0  ;;  %v1078_v44 = vpop.f32.mrf.mxu1 }
 0x10f   : > { %v9861_v12 = vadd.f32 %v8118_v22, %v8096_v14 }
 0x110   : > { %v879_v46 = vpop.f32.mrf.mxu0  ;;  %v8146_v54 = vpop.f32.mrf.mxu1 }
 0x111   : > { %v9863_v55 = vadd.f32 %v1075_v25, %v879_v46 }
 0x112   : > { %v8097_v20 = vpop.f32.mrf.mxu0  ;;  %v1531_v21 = vpop.f32.mrf.mxu1 }
 0x113   : > { %v9865_v13 = vadd.f32 %v8119_v11, %v8097_v20 }
 0x114   : > { %v882_v10 = vpop.f32.mrf.mxu0  ;;  %v8147_v30 = vpop.f32.mrf.mxu1 }
 0x115   : > { %v9867_v52 = vadd.f32 %v1078_v44, %v882_v10 }
 0x116   : > { %v8124_v9 = vpop.f32.mrf.mxu0  ;;  %v1534_v63 = vpop.f32.mrf.mxu1 }
 0x117   : > { %v1373_v56 = vadd.f32 %v8124_v9, %v1020_v2 }
 0x118   : > { %v1292_v28 = vpop.f32.mrf.mxu0  ;;  %v8150_v23 = vpop.f32.mrf.mxu1 }
 0x119   : > { %v1371_v34 = vadd.f32 %v1292_v28, %v1012_v47  ;;  %v9869_v62 = vadd.f32 %v8146_v54, %v1373_v56 }
 0x11a   : > { %v8125_v51 = vpop.f32.mrf.mxu0  ;;  %v1547_v24 = vpop.f32.mrf.mxu1 }
 0x11b   : > { %v1374_v4 = vadd.f32 %v8125_v51, %v1023_v26  ;;  %v9871_v6 = vadd.f32 %v1531_v21, %v1371_v34 }
 0x11c   : > { %v1295_v59 = vpop.f32.mrf.mxu0  ;;  %v8151_v60 = vpop.f32.mrf.mxu1 }
 0x11d   : > { %v1372_v37 = vadd.f32 %v1295_v59, %v1015_v8  ;;  %v9873_v33 = vadd.f32 %v8147_v30, %v1374_v4 }
 0x11e   : > { %v8128_v3 = vpop.f32.mrf.mxu0  ;;  %v1550_v53 = vpop.f32.mrf.mxu1 }
 0x11f   : > { %v1377_v36 = vadd.f32 %v8128_v3, %v9837_v49  ;;  %v9876_v2 = vadd.f32 %v1534_v63, %v1372_v37 }
 0x120   : > { %v1308_v57 = vpop.f32.mrf.mxu0  ;;  %v8154_v47 = vpop.f32.mrf.mxu1 }
 0x121   : > { %v1375_v18 = vadd.f32 %v1308_v57, %v9839_v43  ;;  %v9879_v1 = vadd.f32 %v8150_v23, %v1377_v36 }
 0x122   : > { %v8129_v26 = vpop.f32.mrf.mxu0  ;;  %v1563_v38 = vpop.f32.mrf.mxu1 }
 0x123   : > { %v1378_v50 = vadd.f32 %v8129_v26, %v9841_v17  ;;  %v9882_v58 = vadd.f32 %v1547_v24, %v1375_v18 }
 0x124   : > { %v1311_v8 = vpop.f32.mrf.mxu0  ;;  %v8155_v31 = vpop.f32.mrf.mxu1 }
 0x125   : > { %v1376_v41 = vadd.f32 %v1311_v8, %v9843_v35  ;;  %v9885_v39 = vadd.f32 %v8151_v60, %v1378_v50 }
 0x126   : > { %v8132_v49 = vpop.f32.mrf.mxu0  ;;  %v1566_v29 = vpop.f32.mrf.mxu1 }
 0x127   : > { %v1381_v61 = vadd.f32 %v8132_v49, %v9845_v45  ;;  %v9888_v22 = vadd.f32 %v1550_v53, %v1376_v41 }
 0x128   : > { %v1324_v43 = vpop.f32.mrf.mxu0  ;;  %v8158_v32 = vpop.f32.mrf.mxu1 }
 0x129   : > { %v1379_v25 = vadd.f32 %v1324_v43, %v9847_v0  ;;  %v9891_v15 = vadd.f32 %v8154_v47, %v1381_v61 }
 0x12a   : > { %v8133_v17 = vpop.f32.mrf.mxu0  ;;  %v1579_v11 = vpop.f32.mrf.mxu1 }
 0x12b   : > { %v1382_v14 = vadd.f32 %v8133_v17, %v9849_v16  ;;  %v9894_v44 = vadd.f32 %v1563_v38, %v1379_v25 }
 0x12c   : > { %v1327_v35 = vpop.f32.mrf.mxu0  ;;  %v8159_v46 = vpop.f32.mrf.mxu1 }
 0x12d   : > { %v1380_v54 = vadd.f32 %v1327_v35, %v9851_v27  ;;  %v9897_v20 = vadd.f32 %v8155_v31, %v1382_v14 }
 0x12e   : > { %v8136_v45 = vpop.f32.mrf.mxu0  ;;  %v1582_v21 = vpop.f32.mrf.mxu1 }
 0x12f   : > { %v1385_v10 = vadd.f32 %v8136_v45, %v9853_v42  ;;  %v9900_v30 = vadd.f32 %v1566_v29, %v1380_v54 }
 0x130   : > { %v1340_v0 = vpop.f32.mrf.mxu0  ;;  %v8162_v9 = vpop.f32.mrf.mxu1 }
 0x131   : > { %v1383_v63 = vadd.f32 %v1340_v0, %v9855_v7  ;;  %v9903_v56 = vadd.f32 %v8158_v32, %v1385_v10 }
 0x132   : > { %v8137_v16 = vpop.f32.mrf.mxu0  ;;  %v1595_v28 = vpop.f32.mrf.mxu1 }
 0x133   : > { %v1386_v23 = vadd.f32 %v8137_v16, %v9857_v19  ;;  %v1622_v34 = vadd.f32 %v1579_v11, %v1383_v63 }
 0x134   : > { %v1343_v27 = vpop.f32.mrf.mxu0  ;;  %v8163_v51 = vpop.f32.mrf.mxu1 }
 0x135   : > { %v1384_v24 = vadd.f32 %v1343_v27, %v9859_v5  ;;  %v1625_v4 = vadd.f32 %v8159_v46, %v1386_v23 }
 0x136   : > { %v8140_v59 = vpop.f32.mrf.mxu0  ;;  %v1598_v42 = vpop.f32.mrf.mxu1 }
 0x137   : > { %v1389_v60 = vadd.f32 %v8140_v59, %v9861_v12  ;;  %v1623_v37 = vadd.f32 %v1582_v21, %v1384_v24 }
 0x138   : > { %v1356_v3 = vpop.f32.mrf.mxu0  ;;  %v9908_v53 = vpop.f32.mrf.mxu1 }
 0x139   : > { %v1387_v7 = vadd.f32 %v1356_v3, %v9863_v55  ;;  %v1628_v36 = vadd.f32 %v8162_v9, %v1389_v60 }
 0x13a   : > { %v8141_v57 = vpop.f32.mrf.mxu0  ;;  %v9911_v47 = vpop.f32.mrf.mxu1 }
 0x13b   : > { %v1390_v19 = vadd.f32 %v8141_v57, %v9865_v13  ;;  %v1626_v18 = vadd.f32 %v1595_v28, %v1387_v7 }
 0x13c   : > { %v1359_v26 = vpop.f32.mrf.mxu0  ;;  %v9914_v5 = vpop.f32.mrf.mxu1 }
 0x13d   : > { %v1388_v38 = vadd.f32 %v1359_v26, %v9867_v52  ;;  %v1629_v50 = vadd.f32 %v8163_v51, %v1390_v19 }
 0x13e   : > { %v8168_v12 = vpop.f32.mrf.mxu0  ;;  %v9917_v8 = vpop.f32.mrf.mxu1 }
 0x13f   : > { %v1627_v31 = vadd.f32 %v1598_v42, %v1388_v38  ;;  %v9920_v41 = vadd.f32 %v8168_v12, %v9869_v62 }
 0x140   : > { %v1999_v55 = vpop.f32.mrf.mxu0  ;;  %v9922_v49 = vpop.f32.mrf.mxu1 }
 0x141   : > { %v9925_v29 = vadd.f32 %v1999_v55, %v9871_v6 }
 0x142   : > { %v8169_v13 = vpop.f32.mrf.mxu0  ;;  %v9927_v61 = vpop.f32.mrf.mxu1 }
 0x143   : > { %v9930_v43 = vadd.f32 %v8169_v13, %v9873_v33 }
 0x144   : > { %v2002_v52 = vpop.f32.mrf.mxu0  ;;  %v9932_v32 = vpop.f32.mrf.mxu1 }
 0x145   : > { %v9935_v25 = vadd.f32 %v2002_v52, %v9876_v2 }
 0x146   : > { %v8172_v62 = vpop.f32.mrf.mxu0  ;;  %v9937_v17 = vpop.f32.mrf.mxu1 }
 0x147   : > { %v9940_v11 = vadd.f32 %v8172_v62, %v9879_v1 }
 0x148   : > { %v2015_v6 = vpop.f32.mrf.mxu0  ;;  %v9942_v14 = vpop.f32.mrf.mxu1 }
 0x149   : > { %v9945_v35 = vadd.f32 %v2015_v6, %v9882_v58 }
 0x14a   : > { %v8173_v33 = vpop.f32.mrf.mxu0  ;;  %v9947_v46 = vpop.f32.mrf.mxu1 }
 0x14b   : > { %v9950_v54 = vadd.f32 %v8173_v33, %v9885_v39 }
 0x14c   : > { %v2018_v2 = vpop.f32.mrf.mxu0  ;;  %v9952_v45 = vpop.f32.mrf.mxu1 }
 0x14d   : > { %v9955_v21 = vadd.f32 %v2018_v2, %v9888_v22 }
 0x14e   : > { %v8176_v1 = vpop.f32.mrf.mxu0  ;;  %v9957_v10 = vpop.f32.mrf.mxu1 }
 0x14f   : > { %v9960_v0 = vadd.f32 %v8176_v1, %v9891_v15 }
 0x150   : > { %v2031_v58 = vpop.f32.mrf.mxu0  ;;  %v9962_v9 = vpop.f32.mrf.mxu1 }
 0x151   : > { %v9965_v63 = vadd.f32 %v2031_v58, %v9894_v44 }
 0x152   : > { %v8177_v39 = vpop.f32.mrf.mxu0  ;;  %v9967_v16 = vpop.f32.mrf.mxu1 }
 0x153   : > { %v9970_v28 = vadd.f32 %v8177_v39, %v9897_v20 }
 0x154   : > { %v2034_v22 = vpop.f32.mrf.mxu0  ;;  %v9972_v23 = vpop.f32.mrf.mxu1 }
 0x155   : > { %v9975_v27 = vadd.f32 %v2034_v22, %v9900_v30 }
 0x156   : > { %v8180_v15 = vpop.f32.mrf.mxu0  ;;  %v9977_v51 = vpop.f32.mrf.mxu1 }
 0x157   : > { %v9980_v24 = vadd.f32 %v8180_v15, %v9903_v56 }
 0x158   : > { %v2047_v44 = vpop.f32.mrf.mxu0 }
 0x159   : > { %v9982_v59 = vadd.f32 %v2047_v44, %v1622_v34  ;;  %v9984_v42 = vpop.f32.mrf.mxu1 }
 0x15a   : > { %v8181_v60 = vpop.f32.mrf.mxu0 }
 0x15b   : > { %v9986_v20 = vadd.f32 %v8181_v60, %v1625_v4  ;;  %v9988_v3 = vpop.f32.mrf.mxu1 }
 0x15c   : > { %v2050_v7 = vpop.f32.mrf.mxu0 }
 0x15d   : > { %v2091_v57 = vadd.f32 %v2050_v7, %v1623_v37  ;;  %v9990_v30 = vpop.f32.mrf.mxu1 }
 0x15e   : > { %v8184_v19 = vpop.f32.mrf.mxu0 }
 0x15f   : > { %v9992_v26 = vadd.f32 %v8184_v19, %v1628_v36  ;;  %v9994_v56 = vpop.f32.mrf.mxu1 }
 0x160   : > { %v2063_v38 = vpop.f32.mrf.mxu0 }
 0x161   : > { %v2094_v12 = vadd.f32 %v2063_v38, %v1626_v18 }
 0x162   : > { %v8185_v34 = vpop.f32.mrf.mxu0 }
 0x163   : > { %v9996_v55 = vadd.f32 %v8185_v34, %v1629_v50 }
 0x164   : > { %v2066_v13 = vpop.f32.mrf.mxu0  ;;  %v9998_v52 = vpop.f32.mrf.mxu1 }
 0x165   : > { %v10000_v4 = vadd.f32 %v2066_v13, %v1627_v31 }
 0x166   : > { %v8212_v62 = vpop.f32.mrf.mxu0  ;;  %v10002_v6 = vpop.f32.mrf.mxu1 }
 0x167   : > { %11401 = vst [vmem:[#allocation8_spill] sm:$0xff] %v10002_v6 }
 0x168   : > { %v2546_v37 = vpop.f32.mrf.mxu0  ;;  %v10004_v33 = vpop.f32.mrf.mxu1 }
 0x169   : > { %11402 = vst [vmem:[#allocation9_spill] sm:$0xff] %v10004_v33 }
 0x16a   : > { %v8213_v36 = vpop.f32.mrf.mxu0  ;;  %v10006_v2 = vpop.f32.mrf.mxu1 }
 0x16b   : > { %11403 = vst [vmem:[#allocation10_spill] sm:$0xff] %v10006_v2 }
 0x16c   : > { %v2549_v1 = vpop.f32.mrf.mxu0 }
 0x16e   : > { %v8216_v58 = vpop.f32.mrf.mxu0  ;;  %v10008_v18 = vpop.f32.mrf.mxu1 }
 0x16f   : > { %11404 = vst [vmem:[#allocation11_spill] sm:$0xff] %v10008_v18 }
 0x170   : > { %v2562_v50 = vpop.f32.mrf.mxu0  ;;  %v10010_v39 = vpop.f32.mrf.mxu1 }
 0x171   : > { %11405 = vst [vmem:[#allocation12_spill] sm:$0xff] %v10010_v39 }
 0x172   : > { %v8217_v22 = vpop.f32.mrf.mxu0  ;;  %v10012_v15 = vpop.f32.mrf.mxu1 }
 0x173   : > { %11406 = vst [vmem:[#allocation13_spill] sm:$0xff] %v10012_v15 }
 0x174   : > { %v2565_v31 = vpop.f32.mrf.mxu0  ;;  %v10014_v44 = vpop.f32.mrf.mxu1 }
 0x175   : > { %11407 = vst [vmem:[#allocation14_spill] sm:$0xff] %v10014_v44 }
 0x176   : > { %v8220_v60 = vpop.f32.mrf.mxu0  ;;  %v10016_v7 = vpop.f32.mrf.mxu1 }
 0x177   : > { %11408 = vst [vmem:[#allocation15_spill] sm:$0xff] %v10016_v7  ;;  %v2388_v7 = vadd.f32 %v9908_v53, %v9920_v41  ;;  %v2393_v53 = vadd.f32 %v9932_v32, %v9950_v54 }
 0x178   : > { %v2578_v19 = vpop.f32.mrf.mxu0  ;;  %v10018_v38 = vpop.f32.mrf.mxu1 }
 0x179   : > { %11409 = vst [vmem:[#allocation16_spill] sm:$0xff] %v10018_v38  ;;  %v2386_v38 = vadd.f32 %v9911_v47, %v9925_v29  ;;  %v2391_v47 = vadd.f32 %v9937_v17, %v9955_v21  ;;  %v2397_v29 = vadd.f32 %v9952_v45, %v9970_v28  ;;  %v2627_v32 = vadd.f32 %v8212_v62, %v2388_v7 }
 0x17a   : > { %v8221_v34 = vpop.f32.mrf.mxu0  ;;  %v10020_v13 = vpop.f32.mrf.mxu1  ;;  %v2404_v45 = vadd.f32 %v9984_v42, %v9992_v26  ;;  %v2402_v21 = vadd.f32 %v9988_v3, %v2094_v12 }
 0x17b   : > { %11410 = vst [vmem:[#allocation17_spill] sm:$0xff] %v10020_v13  ;;  %v2389_v13 = vadd.f32 %v9914_v5, %v9930_v43  ;;  %v2396_v5 = vadd.f32 %v9942_v14, %v9960_v0  ;;  %v2398_v43 = vadd.f32 %v9967_v16, %v9982_v59  ;;  %v2399_v14 = vadd.f32 %v9977_v51, %v2091_v57  ;;  %v11415_v51 = vld [vmem:[#allocation8_spill] sm:$0xff]  ;;  %v11417_v57 = vld [vmem:[#allocation10_spill] sm:$0xff] }
 0x17c   : > { %v2581_v48 = vpop.f32.mrf.mxu0  ;;  %v10022_v40 = vpop.f32.mrf.mxu1  ;;  %v2632_v16 = vadd.f32 %v8217_v22, %v2393_v53  ;;  %v2630_v28 = vadd.f32 %v2565_v31, %v2391_v47  ;;  %v2636_v12 = vadd.f32 %v8221_v34, %v2397_v29 }
 0x17d   : > { %11411 = vst [vmem:[#allocation18_spill] sm:$0xff] %v10022_v40  ;;  %v2387_v40 = vadd.f32 %v9917_v8, %v9935_v25  ;;  %v2394_v8 = vadd.f32 %v9947_v46, %v9965_v63  ;;  %v2625_v25 = vadd.f32 %v2546_v37, %v2386_v38  ;;  %v2405_v63 = vadd.f32 %v9990_v30, %v9996_v55  ;;  %v11418_v30 = vld [vmem:[#allocation11_spill] sm:$0xff] }
 0x17e   : > { %v8224_v18 = vpop.f32.mrf.mxu0 }
 0x17f   : > { %v10024_v39 = vpop.f32.mrf.mxu1  ;;  %v2626_v46 = vadd.f32 %v2549_v1, %v2387_v40  ;;  %v3095_v40 = vadd.f32 %v9998_v52, %v2627_v32  ;;  %v2633_v59 = vadd.f32 %v2578_v19, %v2394_v8  ;;  %v10079_v52 = vld [vmem:[%s11382_s5] ss:$0 sm:$0xff] }
 0x180   : > { %11412 = vst [vmem:[#allocation19_spill] sm:$0xff] %v10024_v39  ;;  %v2594_v2 = vpop.f32.mrf.mxu0  ;;  %v11423_v7 = vld [vmem:[#allocation16_spill] sm:$0xff] }
 0x181   : > { %v10026_v15 = vpop.f32.mrf.mxu1  ;;  %v3094_v26 = vadd.f32 %v11417_v57, %v2626_v46  ;;  %v10091_v19 = vadd.f32 %v11423_v7, %v2633_v59 }
 0x182   : > { %11413 = vst [vmem:[#allocation20_spill] sm:$0xff] %v10026_v15  ;;  %v8225_v33 = vpop.f32.mrf.mxu0  ;;  %v2392_v15 = vadd.f32 %v9922_v49, %v9940_v11  ;;  %v2395_v49 = vadd.f32 %v9957_v10, %v9975_v27  ;;  %v2401_v11 = vadd.f32 %v9972_v23, %v9986_v20  ;;  %v2635_v27 = vadd.f32 %v8220_v60, %v2396_v5  ;;  %v11416_v20 = vld [vmem:[#allocation9_spill] sm:$0xff] }
 0x183   : > { %v10028_v44 = vpop.f32.mrf.mxu1  ;;  %v2403_v23 = vadd.f32 %v9994_v56, %v10000_v4  ;;  %v11420_v4 = vld [vmem:[#allocation13_spill] sm:$0xff] }
 0x184   : > { %11414 = vst [vmem:[#allocation21_spill] sm:$0xff] %v10028_v44  ;;  %v2597_v6 = vpop.f32.mrf.mxu0  ;;  %v2390_v44 = vadd.f32 %v9927_v61, %v9945_v35  ;;  %v2400_v61 = vadd.f32 %v9962_v9, %v9980_v24  ;;  %v2628_v35 = vadd.f32 %v8213_v36, %v2389_v13  ;;  %v2631_v10 = vadd.f32 %v8216_v58, %v2392_v15  ;;  %v11419_v36 = vld [vmem:[#allocation12_spill] sm:$0xff]  ;;  %v11421_v15 = vld [vmem:[#allocation14_spill] sm:$0xff]  ;;  %v11424_v13 = vld [vmem:[#allocation17_spill] sm:$0xff] }
 0x185   : > { %v10038_v39 = vpop.f32.mrf.mxu1  ;;  %v3093_v24 = vadd.f32 %v11415_v51, %v2625_v25  ;;  %v2634_v62 = vadd.f32 %v2581_v48, %v2395_v49  ;;  %v10082_v22 = vadd.f32 %v11420_v4, %v2632_v16  ;;  %v10085_v31 = vadd.f32 %v11421_v15, %v2630_v28  ;;  %v11422_v48 = vld [vmem:[#allocation15_spill] sm:$0xff]  ;;  %v11425_v47 = vld [vmem:[#allocation18_spill] sm:$0xff] }
 0x186   : > { %v8228_v41 = vpop.f32.mrf.mxu0  ;;  %v2629_v0 = vadd.f32 %v2562_v50, %v2390_v44  ;;  %v3096_v3 = vadd.f32 %v11416_v20, %v2628_v35  ;;  %v3099_v55 = vadd.f32 %v11418_v30, %v2631_v10  ;;  %v2639_v58 = vadd.f32 %v8224_v18, %v2400_v61 }
 0x187   : > { %v8250_v54 = vpop.f32.mrf.mxu1  ;;  %v2637_v50 = vadd.f32 %v2594_v2, %v2398_v43  ;;  %v10088_v44 = vadd.f32 %v11422_v48, %v2635_v27  ;;  %v2640_v2 = vadd.f32 %v8225_v33, %v2401_v11  ;;  %v2638_v18 = vadd.f32 %v2597_v6, %v2399_v14  ;;  %v11426_v61 = vld [vmem:[#allocation19_spill] sm:$0xff] }
 0x188   : > { %v2610_v17 = vpop.f32.mrf.mxu0  ;;  %v3097_v1 = vadd.f32 %v11419_v36, %v2629_v0  ;;  %v2643_v38 = vadd.f32 %v8228_v41, %v2404_v45  ;;  %v10094_v53 = vadd.f32 %v11424_v13, %v2636_v12  ;;  %v10097_v5 = vadd.f32 %v11425_v47, %v2634_v62 }
 0x189   : > { %v3078_v37 = vpop.f32.mrf.mxu1  ;;  %v10101_v43 = vadd.f32 %v11426_v61, %v2639_v58  ;;  %v11427_v32 = vld [vmem:[#allocation20_spill] sm:$0xff]  ;;  %v2641_v6 = vadd.f32 %v2610_v17, %v2402_v21  ;;  %v10111_v10 = vadd.f32 %v10038_v39, %v2638_v18 }
 0x18a   : > { %v8229_v9 = vpop.f32.mrf.mxu0  ;;  %v10104_v25 = vadd.f32 %v11427_v32, %v2637_v50  ;;  %v10113_v0 = vadd.f32 %v8250_v54, %v2643_v38  ;;  %v3783_v50 = vld [vmem:[#allocation2 + $0xc] sm:$0xf] }
 0x18b   : > { %v8251_v8 = vpop.f32.mrf.mxu1  ;;  %v2644_v33 = vadd.f32 %v8229_v9, %v2405_v63  ;;  %v11428_v46 = vld [vmem:[#allocation21_spill] sm:$0xff]  ;;  %v10116_v27 = vadd.f32 %v3078_v37, %v2641_v6 }
 0x18c   : > { %v2613_v42 = vpop.f32.mrf.mxu0  ;;  %v10108_v45 = vadd.f32 %v11428_v46, %v2640_v2 }
 0x18d   : > { %v2642_v16 = vadd.f32 %v2613_v42, %v2403_v23  ;;  %v3081_v21 = vpop.f32.mrf.mxu1 }
 0x18e   : > { %v8256_v56 = vpop.f32.mrf.mxu0 }
 0x18f   : > { %v3403_v60 = vadd.f32 %v8256_v56, %v3095_v40  ;;  %v10118_v40 = vadd.f32 %v8251_v8, %v2644_v33  ;;  %v10120_v23 = vadd.f32 %v3081_v21, %v2642_v16 }
 0x190   : > { %v3322_v34 = vpop.f32.mrf.mxu0 }
 0x191   : > { %v3430_v29 = vadd.f32 %v10079_v52, %v3403_v60  ;;  %v3401_v49 = vadd.f32 %v3322_v34, %v3093_v24  ;;  %v3774_v34 = vld [vmem:[#allocation2] sm:$0xf] }
 0x192   : > { %v8257_v41 = vpop.f32.mrf.mxu0 }
 0x193   : > { %vm3450_vm9 = vcmp.ge.f32.partialorder %v3430_v29, 0.0  ;;  %v3470_v11 = vmul.f32 0.2, %v3430_v29  ;;  %v3428_v14 = vadd.f32 %v10079_v52, %v3401_v49  ;;  %v3404_v35 = vadd.f32 %v8257_v41, %v3096_v3 }
 0x194   : > { %v3325_v17 = vpop.f32.mrf.mxu0 }
 0x195   : > { %v3490_v9 = vsel %vm3450_vm9, %v3430_v29, %v3470_v11  ;;  %vm3448_vm13 = vcmp.ge.f32.partialorder %v3428_v14, 0.0  ;;  %v3468_v63 = vmul.f32 0.2, %v3428_v14  ;;  %v3431_v28 = vadd.f32 %v10079_v52, %v3404_v35  ;;  %vm10173_vm9 = vmand %vm3778_vm11, %vm3772_vm8 }
 0x196   : > { %v7815_v51 = vpack.c.bf16 %v3490_v9, %v3490_v9  ;;  %v3402_v24 = vadd.f32 %v3325_v17, %v3094_v26  ;;  %v8260_v59 = vpop.f32.mrf.mxu0 }
 0x197   : > { %v3488_v39 = vsel %vm3448_vm13, %v3428_v14, %v3468_v63  ;;  %vm3451_vm14 = vcmp.ge.f32.partialorder %v3431_v28, 0.0  ;;  %v3471_v54 = vmul.f32 0.2, %v3431_v28  ;;  %v3407_v20 = vadd.f32 %v8260_v59, %v3099_v55  ;;  %v3787_v14 = vld [vmem:[#allocation2 + $0x14] sm:$0x1] }
 0x198   : > { %v3589_v42 = vshrl.u32 %v7815_v51, 16  ;;  %v7813_v3 = vpack.c.bf16 %v3488_v39, %v3488_v39  ;;  %v3429_v57 = vadd.f32 %v10079_v52, %v3402_v24  ;;  %v3338_v12 = vpop.f32.mrf.mxu0  ;;  %v3592_v62 = vshll.u32 %v7815_v51, 16 }
 0x199   : > { %v3491_v30 = vsel %vm3451_vm14, %v3431_v28, %v3471_v54  ;;  %v3434_v37 = vadd.f32 %v10079_v52, %v3407_v20  ;;  %v3405_v36 = vadd.f32 %v3338_v12, %v3097_v1 }
 0x19a   : > { %v3591_v58 = vrot.slane %v3589_v42, 7  ;;  %v3572_v26 = vshrl.u32 %v7813_v3, 16  ;;  %v3575_v56 = vshll.u32 %v7813_v3, 16  ;;  %v7816_v4 = vpack.c.bf16 %v3491_v30, %v3491_v30  ;;  %v8261_v15 = vpop.f32.mrf.mxu0 }
 0x19b   : > { %vm3449_vm1 = vcmp.ge.f32.partialorder %v3429_v57, 0.0  ;;  %v3469_v48 = vmul.f32 0.2, %v3429_v57  ;;  %vm3454_vm2 = vcmp.ge.f32.partialorder %v3434_v37, 0.0  ;;  %v3474_v60 = vmul.f32 0.2, %v3434_v37 }
 0x19c   : > { %v3594_v7 = vor.u32 %v3592_v62, %v3591_v58  ;;  %v3595_v2 = vrot.slane %v3591_v58, 4  ;;  %v3574_v18 = vrot.slane %v3572_v26, 7  ;;  %v3597_v1 = vshrl.u32 %v7816_v4, 16  ;;  %v3341_v38 = vpop.f32.mrf.mxu0 }
 0x19d   : > { %v3600_v13 = vshll.u32 %v7816_v4, 16  ;;  %v3489_v47 = vsel %vm3449_vm1, %v3429_v57, %v3469_v48  ;;  %v3494_v8 = vsel %vm3454_vm2, %v3434_v37, %v3474_v60  ;;  %v3432_v29 = vadd.f32 %v10079_v52, %v3405_v36  ;;  %v3797_v36 = vld [vmem:[#allocation2 + $0x24] sm:$0xf] }
 0x19e   : > { %v3784_v61 = vsel %vm10126_vm15, %v3594_v7, %v3783_v50  ;;  %v3577_v32 = vor.u32 %v3575_v56, %v3574_v18  ;;  %v3578_v6 = vrot.slane %v3574_v18, 4  ;;  %v3599_v33 = vrot.slane %v3597_v1, 7  ;;  %v8264_v41 = vpop.f32.mrf.mxu0 }
 0x19f   : > { %3785 = vst [vmem:[#allocation2 + $0xc] sm:$0xf] %v3784_v61  ;;  %v7814_v35 = vpack.c.bf16 %v3489_v47, %v3489_v47  ;;  %v7819_v46 = vpack.c.bf16 %v3494_v8, %v3494_v8  ;;  %vm3452_vm5 = vcmp.ge.f32.partialorder %v3432_v29, 0.0  ;;  %v3472_v16 = vmul.f32 0.2, %v3432_v29 }
 0x1a0   : > { %v3775_v17 = vsel %vm10126_vm15, %v3577_v32, %v3774_v34  ;;  %v3602_v21 = vor.u32 %v3600_v13, %v3599_v33  ;;  %v3604_v9 = vrot.slane %v3599_v33, 4  ;;  %v3408_v63 = vadd.f32 %v8261_v15, %v10082_v22  ;;  %v3354_v28 = vpop.f32.mrf.mxu0  ;;  %v3780_v22 = vld [vmem:[#allocation2 + $0x8] sm:$0x1]  ;;  %v3790_v33 = vld [vmem:[#allocation2 + $0x18] sm:$0xf] }
 0x1a1   : > { %3776 = vst [vmem:[#allocation2] sm:$0xf] %v3775_v17  ;;  %v3580_v51 = vshrl.u32 %v7814_v35, 16  ;;  %v3583_v24 = vshll.u32 %v7814_v35, 16  ;;  %v3623_v59 = vshrl.u32 %v7819_v46, 16  ;;  %v3626_v39 = vshll.u32 %v7819_v46, 16 }
 0x1a2   : > { %v3603_v54 = vsel %vm10141_vm3, %v3595_v2, %v3602_v21  ;;  %v3788_v20 = vsel %vm10133_vm0, %v3604_v9, %v3787_v14  ;;  %v3492_v42 = vsel %vm3452_vm5, %v3432_v29, %v3472_v16  ;;  %v3435_v3 = vadd.f32 %v10079_v52, %v3408_v63  ;;  %v8265_v57 = vpop.f32.mrf.mxu0 }
 0x1a3   : > { %3786 = vst [vmem:[#allocation2 + $0x10] sm:$0xf] %v3603_v54  ;;  %3789 = vst [vmem:[#allocation2 + $0x14] sm:$0x1] %v3788_v20  ;;  %v3582_v12 = vrot.slane %v3580_v51, 7  ;;  %v10153_v62 = vrot.slane %v3623_v59, 7  ;;  %v7817_v30 = vpack.c.bf16 %v3492_v42, %v3492_v42  ;;  %v3406_v37 = vadd.f32 %v3341_v38, %v10085_v31 }
 0x1a4   : > { %vm3455_vm6 = vcmp.ge.f32.partialorder %v3435_v3, 0.0  ;;  %v3475_v58 = vmul.f32 0.2, %v3435_v3  ;;  %v3411_v50 = vadd.f32 %v8264_v41, %v10088_v44  ;;  %v3409_v26 = vadd.f32 %v3354_v28, %v10091_v19  ;;  %v3357_v56 = vpop.f32.mrf.mxu0  ;;  %v3801_v54 = vld [vmem:[#allocation2 + $0x2c] sm:$0x1] }
 0x1a5   : > { %v3585_v4 = vor.u32 %v3583_v24, %v3582_v12  ;;  %v3587_v15 = vrot.slane %v3582_v12, 4  ;;  %v3628_v48 = vor.u32 %v3626_v39, %v10153_v62  ;;  %v3629_v60 = vrot.slane %v10153_v62, 4 }
 0x1a6   : > { %v3849_v7 = vld [vmem:[#allocation2 + $0xc] sm:$0x1]  ;;  %v3606_v2 = vshrl.u32 %v7817_v30, 16  ;;  %v3609_v18 = vshll.u32 %v7817_v30, 16  ;;  %v3495_v1 = vsel %vm3455_vm6, %v3435_v3, %v3475_v58  ;;  %v3433_v31 = vadd.f32 %v10079_v52, %v3406_v37  ;;  %v10161_v38 = vpop.f32.mrf.mxu0 }
 0x1a7   : > { %v3850_v44 = vsel %vm10133_vm0, 0, %v3849_v7  ;;  %v3586_v19 = vsel %vm10141_vm3, %v3578_v6, %v3585_v4  ;;  %v3781_v34 = vsel %vm10133_vm0, %v3587_v15, %v3780_v22  ;;  %v3798_v13 = vsel %vm10126_vm15, %v3628_v48, %v3797_v36 }
 0x1a8   : > { %3851 = vst [vmem:[#allocation2 + $0xc] sm:$0x1] %v3850_v44  ;;  %v3846_v8 = vld [vmem:[#allocation2] sm:$0x1]  ;;  %3777 = vst [vmem:[#allocation2 + $0x4] sm:$0xf] %v3586_v19  ;;  %v7820_v61 = vpack.c.bf16 %v3495_v1, %v3495_v1  ;;  %v3438_v41 = vadd.f32 %v10079_v52, %v3411_v50  ;;  %v3436_v14 = vadd.f32 %v10079_v52, %v3409_v26  ;;  %v10186_v63 = vpop.f32.mrf.mxu0 }
 0x1a9   : > { %3782 = vst [vmem:[#allocation2 + $0x8] sm:$0x1] %v3781_v34  ;;  %3799 = vst [vmem:[#allocation2 + $0x24] sm:$0xf] %v3798_v13  ;;  %v10177_v29 = vrot.slane %v3606_v2, 7  ;;  %vm3453_vm10 = vcmp.ge.f32.partialorder %v3433_v31, 0.0  ;;  %v3412_v35 = vadd.f32 %v8265_v57, %v10094_v53  ;;  %v3410_v57 = vadd.f32 %v3357_v56, %v10097_v5 }
 0x1aa   : > { %v3473_v32 = vmul.f32 0.2, %v3433_v31  ;;  %v3847_v6 = vsel %vm10133_vm0, 0, %v3846_v8  ;;  %v3880_v46 = vld [vmem:[#allocation2 + $0x14] sm:$0x1]  ;;  %v3631_v21 = vshrl.u32 %v7820_v61, 16  ;;  %v10194_v37 = vpop.f32.mrf.mxu0  ;;  %v3415_v34 = vadd.f32 %v10161_v38, %v10101_v43 }
 0x1ab   : > { %3848 = vst [vmem:[#allocation2] sm:$0x1] %v3847_v6  ;;  %v3611_v16 = vor.u32 %v3609_v18, %v10177_v29  ;;  %v3612_v17 = vrot.slane %v10177_v29, 4  ;;  %v3634_v9 = vshll.u32 %v7820_v61, 16  ;;  %v3881_v28 = vsel %vm10173_vm9, 0, %v3880_v46 }
 0x1ac   : > { %v3493_v51 = vsel %vm3453_vm10, %v3433_v31, %v3473_v32  ;;  %vm3458_vm8 = vcmp.ge.f32.partialorder %v3438_v41, 0.0  ;;  %v3478_v24 = vmul.f32 0.2, %v3438_v41  ;;  %3882 = vst [vmem:[#allocation2 + $0x14] sm:$0x1] %v3881_v28  ;;  %v3633_v59 = vrot.slane %v3631_v21, 7  ;;  %v3373_v13 = vpop.f32.mrf.mxu0 }
 0x1ad   : > { %v3791_v53 = vsel %vm10126_vm15, %v3611_v16, %v3790_v33  ;;  %v7818_v39 = vpack.c.bf16 %v3493_v51, %v3493_v51  ;;  %vm3456_vm11 = vcmp.ge.f32.partialorder %v3436_v14, 0.0  ;;  %v3476_v42 = vmul.f32 0.2, %v3436_v14  ;;  %v3794_v2 = vld [vmem:[#allocation2 + $0x20] sm:$0x1] }
 0x1ae   : > { %3792 = vst [vmem:[#allocation2 + $0x18] sm:$0xf] %v3791_v53  ;;  %v3498_v20 = vsel %vm3458_vm8, %v3438_v41, %v3478_v24  ;;  %v3439_v3 = vadd.f32 %v10079_v52, %v3412_v35  ;;  %v3636_v12 = vor.u32 %v3634_v9, %v3633_v59  ;;  %v3638_v22 = vrot.slane %v3633_v59, 4  ;;  %v3811_v6 = vld [vmem:[#allocation2 + $0x3c] sm:$0xf]  ;;  %v8272_v24 = vpop.f32.mrf.mxu0 }
 0x1af   : > { %v3614_v62 = vshrl.u32 %v7818_v39, 16  ;;  %v3617_v30 = vshll.u32 %v7818_v39, 16  ;;  %v7823_v50 = vpack.c.bf16 %v3498_v20, %v3498_v20  ;;  %v3496_v26 = vsel %vm3456_vm11, %v3436_v14, %v3476_v42  ;;  %v3804_v59 = vld [vmem:[#allocation2 + $0x30] sm:$0xf] }
 0x1b0   : > { %v3877_v36 = vld [vmem:[#allocation2 + $0x8] sm:$0x1]  ;;  %v3855_v58 = vld [vmem:[#allocation2 + $0x24] sm:$0x1]  ;;  %vm3459_vm12 = vcmp.ge.f32.partialorder %v3439_v3, 0.0  ;;  %v3437_v4 = vadd.f32 %v10079_v52, %v3410_v57  ;;  %v3637_v5 = vsel %vm10141_vm3, %v3629_v60, %v3636_v12  ;;  %v3802_v56 = vsel %vm10133_vm0, %v3638_v22, %v3801_v54 }
 0x1b1   : > { %v3878_v15 = vsel %vm10173_vm9, 0, %v3877_v36  ;;  %v3856_v48 = vsel %vm10133_vm0, 0, %v3855_v58  ;;  %3800 = vst [vmem:[#allocation2 + $0x28] sm:$0xf] %v3637_v5  ;;  %3803 = vst [vmem:[#allocation2 + $0x2c] sm:$0x1] %v3802_v56  ;;  %v7821_v31 = vpack.c.bf16 %v3496_v26, %v3496_v26  ;;  %v3442_v35 = vadd.f32 %v10079_v52, %v3415_v34 }
 0x1b2   : > { %3879 = vst [vmem:[#allocation2 + $0x8] sm:$0x1] %v3878_v15  ;;  %3857 = vst [vmem:[#allocation2 + $0x24] sm:$0x1] %v3856_v48  ;;  %v3616_v7 = vrot.slane %v3614_v62, 7  ;;  %v3657_v18 = vshrl.u32 %v7823_v50, 16  ;;  %v3416_v15 = vadd.f32 %v10194_v37, %v10108_v45  ;;  %v3414_v48 = vadd.f32 %v3373_v13, %v10111_v10 }
 0x1b3   : > { %v3660_v1 = vshll.u32 %v7823_v50, 16  ;;  %v3479_v44 = vmul.f32 0.2, %v3439_v3  ;;  %vm3457_vm13 = vcmp.ge.f32.partialorder %v3437_v4, 0.0  ;;  %v3477_v19 = vmul.f32 0.2, %v3437_v4 }
 0x1b4   : > { %v3619_v60 = vor.u32 %v3617_v30, %v3616_v7  ;;  %v3621_v8 = vrot.slane %v3616_v7, 4  ;;  %v3659_v29 = vrot.slane %v3657_v18, 7  ;;  %v3640_v61 = vshrl.u32 %v7821_v31, 16  ;;  %v3815_v26 = vld [vmem:[#allocation2 + $0x44] sm:$0x1] }
 0x1b5   : > { %v3852_v32 = vld [vmem:[#allocation2 + $0x18] sm:$0x1]  ;;  %v3643_v33 = vshll.u32 %v7821_v31, 16  ;;  %v3499_v41 = vsel %vm3459_vm12, %v3439_v3, %v3479_v44  ;;  %v3497_v14 = vsel %vm3457_vm13, %v3437_v4, %v3477_v19  ;;  %vm3462_vm14 = vcmp.ge.f32.partialorder %v3442_v35, 0.0 }
 0x1b6   : > { %v3853_v46 = vsel %vm10133_vm0, 0, %v3852_v32  ;;  %v3620_v16 = vsel %vm10141_vm3, %v3612_v17, %v3619_v60  ;;  %v3795_v43 = vsel %vm10133_vm0, %v3621_v8, %v3794_v2  ;;  %v3662_v38 = vor.u32 %v3660_v1, %v3659_v29  ;;  %v3808_v2 = vld [vmem:[#allocation2 + $0x38] sm:$0x1] }
 0x1b7   : > { %3854 = vst [vmem:[#allocation2 + $0x18] sm:$0x1] %v3853_v46  ;;  %3793 = vst [vmem:[#allocation2 + $0x1c] sm:$0xf] %v3620_v16  ;;  %v3663_v21 = vrot.slane %v3659_v29, 4  ;;  %v3642_v9 = vrot.slane %v3640_v61, 7  ;;  %v7824_v28 = vpack.c.bf16 %v3499_v41, %v3499_v41  ;;  %v7822_v51 = vpack.c.bf16 %v3497_v14, %v3497_v14 }
 0x1b8   : > { %3796 = vst [vmem:[#allocation2 + $0x20] sm:$0x1] %v3795_v43  ;;  %v3812_v53 = vsel %vm10126_vm15, %v3662_v38, %v3811_v6  ;;  %v3482_v39 = vmul.f32 0.2, %v3442_v35  ;;  %v3413_v17 = vadd.f32 %v10186_v63, %v10104_v25  ;;  %v3886_v54 = vld [vmem:[#allocation2 + $0x2c] sm:$0x1]  ;;  %v3386_v63 = vpop.f32.mrf.mxu0  ;;  %v3419_v5 = vadd.f32 %v8272_v24, %v10113_v0 }
 0x1b9   : > { %3813 = vst [vmem:[#allocation2 + $0x3c] sm:$0xf] %v3812_v53  ;;  %v3645_v20 = vor.u32 %v3643_v33, %v3642_v9  ;;  %v3646_v42 = vrot.slane %v3642_v9, 4  ;;  %v3665_v3 = vshrl.u32 %v7824_v28, 16  ;;  %v3668_v57 = vshll.u32 %v7824_v28, 16 }
 0x1ba   : > { %v3887_v12 = vsel %vm10173_vm9, 0, %v3886_v54  ;;  %v3648_v22 = vshrl.u32 %v7822_v51, 16  ;;  %v3651_v62 = vshll.u32 %v7822_v51, 16  ;;  %v3502_v30 = vsel %vm3462_vm14, %v3442_v35, %v3482_v39  ;;  %v8273_v37 = vpop.f32.mrf.mxu0  ;;  %v3825_v61 = vld [vmem:[#allocation2 + $0x54] sm:$0xf] }
 0x1bb   : > { %3888 = vst [vmem:[#allocation2 + $0x2c] sm:$0x1] %v3887_v12  ;;  %v3805_v36 = vsel %vm10126_vm15, %v3645_v20, %v3804_v59  ;;  %v3667_v58 = vrot.slane %v3665_v3, 7  ;;  %v7827_v50 = vpack.c.bf16 %v3502_v30, %v3502_v30  ;;  %v3440_v25 = vadd.f32 %v10079_v52, %v3413_v17 }
 0x1bc   : > { %3806 = vst [vmem:[#allocation2 + $0x30] sm:$0xf] %v3805_v36  ;;  %v3650_v4 = vrot.slane %v3648_v22, 7  ;;  %v3443_v6 = vadd.f32 %v10079_v52, %v3416_v15  ;;  %v3441_v16 = vadd.f32 %v10079_v52, %v3414_v48  ;;  %v3446_v43 = vadd.f32 %v10079_v52, %v3419_v5  ;;  %v3389_v24 = vpop.f32.mrf.mxu0  ;;  %v3829_v48 = vld [vmem:[#allocation2 + $0x5c] sm:$0x1] }
 0x1bd   : > { %v3670_v56 = vor.u32 %v3668_v57, %v3667_v58  ;;  %v3672_v7 = vrot.slane %v3667_v58, 4  ;;  %v3691_v18 = vshrl.u32 %v7827_v50, 16  ;;  %v3694_v1 = vshll.u32 %v7827_v50, 16 }
 0x1be   : > { %v3653_v44 = vor.u32 %v3651_v62, %v3650_v4  ;;  %v3655_v19 = vrot.slane %v3650_v4, 4  ;;  %vm3460_vm1 = vcmp.ge.f32.partialorder %v3440_v25, 0.0  ;;  %v3480_v34 = vmul.f32 0.2, %v3440_v25 }
 0x1bf   : > { %v3883_v31 = vld [vmem:[#allocation2 + $0x20] sm:$0x1]  ;;  %v3671_v45 = vsel %vm10141_vm3, %v3663_v21, %v3670_v56  ;;  %v3816_v10 = vsel %vm10133_vm0, %v3672_v7, %v3815_v26  ;;  %v10234_v0 = vrot.slane %v3691_v18, 7  ;;  %vm3463_vm2 = vcmp.ge.f32.partialorder %v3443_v6, 0.0 }
 0x1c0   : > { %v3884_v60 = vsel %vm10173_vm9, 0, %v3883_v31  ;;  %v3861_v13 = vld [vmem:[#allocation2 + $0x3c] sm:$0x1]  ;;  %3814 = vst [vmem:[#allocation2 + $0x40] sm:$0xf] %v3671_v45  ;;  %v3654_v8 = vsel %vm10141_vm3, %v3646_v42, %v3653_v44  ;;  %v3809_v29 = vsel %vm10133_vm0, %v3655_v19, %v3808_v2  ;;  %v3500_v32 = vsel %vm3460_vm1, %v3440_v25, %v3480_v34 }
 0x1c1   : > { %3885 = vst [vmem:[#allocation2 + $0x20] sm:$0x1] %v3884_v60  ;;  %3817 = vst [vmem:[#allocation2 + $0x44] sm:$0x1] %v3816_v10  ;;  %v3862_v33 = vsel %vm10133_vm0, 0, %v3861_v13  ;;  %v3696_v41 = vor.u32 %v3694_v1, %v10234_v0  ;;  %v3697_v14 = vrot.slane %v10234_v0, 4  ;;  %v7825_v35 = vpack.c.bf16 %v3500_v32, %v3500_v32 }
 0x1c2   : > { %3807 = vst [vmem:[#allocation2 + $0x34] sm:$0xf] %v3654_v8  ;;  %3810 = vst [vmem:[#allocation2 + $0x38] sm:$0x1] %v3809_v29  ;;  %v3483_v46 = vmul.f32 0.2, %v3443_v6  ;;  %v3417_v51 = vadd.f32 %v3386_v63, %v10116_v27  ;;  %v3420_v12 = vadd.f32 %v8273_v37, %v10118_v40  ;;  %v3418_v27 = vadd.f32 %v3389_v24, %v10120_v23 }
 0x1c3   : > { %3863 = vst [vmem:[#allocation2 + $0x3c] sm:$0x1] %v3862_v33  ;;  %v3858_v38 = vld [vmem:[#allocation2 + $0x30] sm:$0x1]  ;;  %v3826_v21 = vsel %vm10126_vm15, %v3696_v41, %v3825_v61  ;;  %v3674_v9 = vshrl.u32 %v7825_v35, 16  ;;  %v3677_v28 = vshll.u32 %v7825_v35, 16 }
 0x1c4   : > { %v3859_v53 = vsel %vm10133_vm0, 0, %v3858_v38  ;;  %3827 = vst [vmem:[#allocation2 + $0x54] sm:$0xf] %v3826_v21  ;;  %v3503_v59 = vsel %vm3463_vm2, %v3443_v6, %v3483_v46  ;;  %vm3461_vm5 = vcmp.ge.f32.partialorder %v3441_v16, 0.0  ;;  %v3481_v39 = vmul.f32 0.2, %v3441_v16 }
 0x1c5   : > { %3860 = vst [vmem:[#allocation2 + $0x30] sm:$0x1] %v3859_v53  ;;  %v3676_v17 = vrot.slane %v3674_v9, 7  ;;  %v7828_v54 = vpack.c.bf16 %v3503_v59, %v3503_v59  ;;  %vm3466_vm6 = vcmp.ge.f32.partialorder %v3446_v43, 0.0  ;;  %v3486_v20 = vmul.f32 0.2, %v3446_v43 }
 0x1c6   : > { %v3818_v42 = vld [vmem:[#allocation2 + $0x48] sm:$0xf]  ;;  %v3501_v3 = vsel %vm3461_vm5, %v3441_v16, %v3481_v39  ;;  %v3444_v57 = vadd.f32 %v10079_v52, %v3417_v51  ;;  %v3447_v2 = vadd.f32 %v10079_v52, %v3420_v12  ;;  %v3822_v37 = vld [vmem:[#allocation2 + $0x50] sm:$0x1]  ;;  %v3839_v32 = vld [vmem:[#allocation2 + $0x6c] sm:$0xf]  ;;  %v3445_v33 = vadd.f32 %v10079_v52, %v3418_v27 }
 0x1c7   : > { %v3679_v62 = vor.u32 %v3677_v28, %v3676_v17  ;;  %v3680_v30 = vrot.slane %v3676_v17, 4  ;;  %v3699_v36 = vshrl.u32 %v7828_v54, 16  ;;  %v3702_v58 = vshll.u32 %v7828_v54, 16  ;;  %v3832_v24 = vld [vmem:[#allocation2 + $0x60] sm:$0xf] }
 0x1c8   : > { %v3892_v22 = vld [vmem:[#allocation2 + $0x44] sm:$0x1]  ;;  %v7826_v63 = vpack.c.bf16 %v3501_v3, %v3501_v3  ;;  %v3506_v26 = vsel %vm3466_vm6, %v3446_v43, %v3486_v20  ;;  %vm3464_vm10 = vcmp.ge.f32.partialorder %v3444_v57, 0.0  ;;  %v3484_v7 = vmul.f32 0.2, %v3444_v57 }
 0x1c9   : > { %v3893_v50 = vsel %vm10173_vm9, 0, %v3892_v22  ;;  %v3889_v25 = vld [vmem:[#allocation2 + $0x38] sm:$0x1]  ;;  %v3819_v40 = vsel %vm10126_vm15, %v3679_v62, %v3818_v42  ;;  %v3701_v23 = vrot.slane %v3699_v36, 7  ;;  %v7831_v15 = vpack.c.bf16 %v3506_v26, %v3506_v26  ;;  %v3843_v12 = vld [vmem:[#allocation2 + $0x74] sm:$0x1] }
 0x1ca   : > { %3894 = vst [vmem:[#allocation2 + $0x44] sm:$0x1] %v3893_v50  ;;  %v3890_v4 = vsel %vm10173_vm9, 0, %v3889_v25  ;;  %3820 = vst [vmem:[#allocation2 + $0x48] sm:$0xf] %v3819_v40  ;;  %v3682_v5 = vshrl.u32 %v7826_v63, 16  ;;  %v3504_v45 = vsel %vm3464_vm10, %v3444_v57, %v3484_v7 }
 0x1cb   : > { %3891 = vst [vmem:[#allocation2 + $0x38] sm:$0x1] %v3890_v4  ;;  %v3685_v56 = vshll.u32 %v7826_v63, 16  ;;  %v3867_v18 = vld [vmem:[#allocation2 + $0x54] sm:$0x1]  ;;  %v3704_v1 = vor.u32 %v3702_v58, %v3701_v23  ;;  %v3706_v31 = vrot.slane %v3701_v23, 4  ;;  %v7829_v8 = vpack.c.bf16 %v3504_v45, %v3504_v45 }
 0x1cc   : > { %v3725_v44 = vshrl.u32 %v7831_v15, 16  ;;  %v3728_v19 = vshll.u32 %v7831_v15, 16  ;;  %v3868_v34 = vsel %vm10133_vm0, 0, %v3867_v18  ;;  %v3684_v60 = vrot.slane %v3682_v5, 7  ;;  %v3836_v40 = vld [vmem:[#allocation2 + $0x68] sm:$0x1] }
 0x1cd   : > { %vm3467_vm8 = vcmp.ge.f32.partialorder %v3447_v2, 0.0  ;;  %3869 = vst [vmem:[#allocation2 + $0x54] sm:$0x1] %v3868_v34  ;;  %v3705_v10 = vsel %vm10141_vm3, %v3697_v14, %v3704_v1  ;;  %v3830_v0 = vsel %vm10133_vm0, %v3706_v31, %v3829_v48  ;;  %v3487_v6 = vmul.f32 0.2, %v3447_v2 }
 0x1ce   : > { %v3727_v13 = vrot.slane %v3725_v44, 7  ;;  %3828 = vst [vmem:[#allocation2 + $0x58] sm:$0xf] %v3705_v10  ;;  %3831 = vst [vmem:[#allocation2 + $0x5c] sm:$0x1] %v3830_v0  ;;  %v3687_v29 = vor.u32 %v3685_v56, %v3684_v60  ;;  %v3689_v61 = vrot.slane %v3684_v60, 4 }
 0x1cf   : > { %v3708_v35 = vshrl.u32 %v7829_v8, 16  ;;  %v3711_v46 = vshll.u32 %v7829_v8, 16  ;;  %v3507_v43 = vsel %vm3467_vm8, %v3447_v2, %v3487_v6  ;;  %vm3465_vm11 = vcmp.ge.f32.partialorder %v3445_v33, 0.0 }
 0x1d0   : > { %v3730_v41 = vor.u32 %v3728_v19, %v3727_v13  ;;  %v3688_v14 = vsel %vm10141_vm3, %v3680_v30, %v3687_v29  ;;  %v3823_v16 = vsel %vm10133_vm0, %v3689_v61, %v3822_v37  ;;  %v7832_v52 = vpack.c.bf16 %v3507_v43, %v3507_v43 }
 0x1d1   : > { %v3864_v38 = vld [vmem:[#allocation2 + $0x48] sm:$0x1]  ;;  %3821 = vst [vmem:[#allocation2 + $0x4c] sm:$0xf] %v3688_v14  ;;  %3824 = vst [vmem:[#allocation2 + $0x50] sm:$0x1] %v3823_v16 }
 0x1d2   : > { %v3840_v21 = vsel %vm10126_vm15, %v3730_v41, %v3839_v32  ;;  %v3710_v9 = vrot.slane %v3708_v35, 7  ;;  %v3485_v28 = vmul.f32 0.2, %v3445_v33  ;;  %v3865_v51 = vsel %vm10133_vm0, 0, %v3864_v38 }
 0x1d3   : > { %3841 = vst [vmem:[#allocation2 + $0x6c] sm:$0xf] %v3840_v21  ;;  %3866 = vst [vmem:[#allocation2 + $0x48] sm:$0x1] %v3865_v51  ;;  %v3733_v59 = vshrl.u32 %v7832_v52, 16  ;;  %v3736_v42 = vshll.u32 %v7832_v52, 16 }
 0x1d4   : > { %v3713_v53 = vor.u32 %v3711_v46, %v3710_v9  ;;  %v3505_v39 = vsel %vm3465_vm11, %v3445_v33, %v3485_v28  ;;  %v3731_v27 = vrot.slane %v3727_v13, 4  ;;  %v3714_v23 = vrot.slane %v3710_v9, 4 }
 0x1d5   : > { %v3898_v17 = vld [vmem:[#allocation2 + $0x5c] sm:$0x1]  ;;  %v3735_v20 = vrot.slane %v3733_v59, 7  ;;  %v7830_v3 = vpack.c.bf16 %v3505_v39, %v3505_v39 }
 0x1d6   : > { %v3833_v54 = vsel %vm10126_vm15, %v3713_v53, %v3832_v24  ;;  %v3899_v57 = vsel %vm10173_vm9, 0, %v3898_v17 }
 0x1d7   : > { %3834 = vst [vmem:[#allocation2 + $0x60] sm:$0xf] %v3833_v54  ;;  %3900 = vst [vmem:[#allocation2 + $0x5c] sm:$0x1] %v3899_v57  ;;  %v3738_v22 = vor.u32 %v3736_v42, %v3735_v20  ;;  %v3740_v62 = vrot.slane %v3735_v20, 4  ;;  %v3716_v30 = vshrl.u32 %v7830_v3, 16 }
 0x1d8   : > { %v3895_v36 = vld [vmem:[#allocation2 + $0x50] sm:$0x1]  ;;  %v3719_v58 = vshll.u32 %v7830_v3, 16 }
 0x1d9   : > { %v3896_v50 = vsel %vm10173_vm9, 0, %v3895_v36  ;;  %v3739_v25 = vsel %vm10141_vm3, %v3731_v27, %v3738_v22  ;;  %v3844_v63 = vsel %vm10133_vm0, %v3740_v62, %v3843_v12  ;;  %v3718_v26 = vrot.slane %v3716_v30, 7 }
 0x1da   : > { %v3873_v55 = vld [vmem:[#allocation2 + $0x6c] sm:$0x1]  ;;  %3897 = vst [vmem:[#allocation2 + $0x50] sm:$0x1] %v3896_v50  ;;  %3842 = vst [vmem:[#allocation2 + $0x70] sm:$0xf] %v3739_v25 }
 0x1db   : > { %v3874_v4 = vsel %vm10133_vm0, 0, %v3873_v55  ;;  %3845 = vst [vmem:[#allocation2 + $0x74] sm:$0x1] %v3844_v63  ;;  %v3721_v15 = vor.u32 %v3719_v58, %v3718_v26  ;;  %v3723_v48 = vrot.slane %v3718_v26, 4 }
 0x1dc   : > { %3875 = vst [vmem:[#allocation2 + $0x6c] sm:$0x1] %v3874_v4 }
 0x1dd   : > { %v3722_v56 = vsel %vm10141_vm3, %v3714_v23, %v3721_v15  ;;  %v3837_v7 = vsel %vm10133_vm0, %v3723_v48, %v3836_v40 }
 0x1de   : > { %v3870_v5 = vld [vmem:[#allocation2 + $0x60] sm:$0x1]  ;;  %3835 = vst [vmem:[#allocation2 + $0x64] sm:$0xf] %v3722_v56  ;;  %3838 = vst [vmem:[#allocation2 + $0x68] sm:$0x1] %v3837_v7 }
 0x1df   : > { %v3871_v2 = vsel %vm10133_vm0, 0, %v3870_v5 }
 0x1e0   : > { %3872 = vst [vmem:[#allocation2 + $0x60] sm:$0x1] %v3871_v2 }
 0x1e2   : > { %v3904_v18 = vld [vmem:[#allocation2 + $0x74] sm:$0x1] }
 0x1e3   : > { %v3905_v1 = vsel %vm10173_vm9, 0, %v3904_v18  ;;  %3910 = sbr.rel (%p7509_p8) target bundleno = 491 (0x1eb), region = 60 }
 0x1e4   : > { %3906 = vst [vmem:[#allocation2 + $0x74] sm:$0x1] %v3905_v1 }
 0x1e5   : > { %v3901_v31 = vld [vmem:[#allocation2 + $0x68] sm:$0x1] }
 0x1e6   : > { %v3902_v44 = vsel %vm10173_vm9, 0, %v3901_v31 }
 0x1e7   : > { %3903 = vst [vmem:[#allocation2 + $0x68] sm:$0x1] %v3902_v44 }
 0x1e8   : > { %v8782_v11 = vmov 0  }
 0x1e9   : > { %3911 = vst [vmem:[#allocation2] sm:$0xf] %v8782_v11  ;;  %3912 = vst [vmem:[#allocation2 + $0x4] sm:$0xf] %v8782_v11 }
 0x1ea   : > { %3913 = vst [vmem:[#allocation2 + $0x8] sm:$0x1] %v8782_v11 }
 0x1eb PF: > { %p7510_p9 = scmp.ne.s32.totalorder %s8764_s30, 1 }
 0x1ed   : > { %3917 = sbr.rel (%p7510_p9) target bundleno = 501 (0x1f5), region = 64 }
 0x1f2   : > { %v8783_v49 = vmov 0  }
 0x1f3   : > { %3919 = vst [vmem:[#allocation2 + $0x6c] sm:$0xf] %v8783_v49  ;;  %3920 = vst [vmem:[#allocation2 + $0x70] sm:$0xf] %v8783_v49 }
 0x1f4   : > { %3921 = vst [vmem:[#allocation2 + $0x74] sm:$0x1] %v8783_v49 }
 0x1f5 PF: > { %v8646_v47 = vld [vmem:[%s11383_s6 + $0x78] sm:$0xff]   ;;  %v8647_v19 = vld [vmem:[%s11383_s6 + $0x70] sm:$0xff]   ;;  %v8648_v34 = vld [vmem:[%s11383_s6 + $0x68] sm:$0xff]   ;;  %s8784_s25 = smov 4   ;;  %s8785_s27 = smov 124  }
 0x1f6   : > { %8274 = vmatprep.subr.bf16.mxu1 %v8646_v47  ;;  %v8649_v60 = vld [vmem:[%s11383_s6 + $0x60] sm:$0xff]   ;;  %v8654_v45 = vld [vmem:[%s11383_s6 + $0xb8] sm:$0xff]   ;;  %v10322_v37 = vld [vmem:[#allocation2 + $0x8] sm:$0x1]  ;;  %s11461_s17 = scalar_lea.vmem %s11379_s2, %s11474_s10 }
 0x1f7   : > { %8275 = vmatpush3.bf16.msra.mxu1 %v8646_v47  ;;  %v10318_v10 = vld [vmem:[#allocation2] sm:$0xf]  ;;  %v10320_v0 = vld [vmem:[#allocation2 + $0x4] sm:$0xf]  ;;  %v8650_v13 = vld [vmem:[%s11383_s6 + $0x58] sm:$0xff]   ;;  %8338 = vmatprep.subr.bf16.mxu0 %v8654_v45  ;;  %v3982_v33 = vshll.u32 %v10322_v37, 16 }
 0x1f8   : > { %8276 = vmatprep.subr.bf16.mxu1 %v8647_v19  ;;  %v3963_v8 = vshrl.u32 %v10318_v10, 16  ;;  %v3966_v29 = vshll.u32 %v10318_v10, 16  ;;  %v3972_v61 = vshll.u32 %v10320_v0, 16  ;;  %v3976_v32 = vshrl.u32 %v10320_v0, 16  ;;  %v10331_v6 = vld [vmem:[#allocation2 + $0xc] sm:$0xf]  ;;  %8339 = vmatpush3.bf16.msra.mxu0 %v8654_v45 }
 0x1f9   : > { %v10334_v41 = vld [vmem:[#allocation2 + $0x10] sm:$0xf]  ;;  %v10336_v35 = vld [vmem:[#allocation2 + $0x14] sm:$0x1]  ;;  %v3987_v46 = vshrl.u32 %v10331_v6, 16  ;;  %v3984_v21 = vrot.slane %v3982_v33, 5 }
 0x1fa   : > { %v3965_v14 = vrot.slane %v3963_v8, 4  ;;  %v3968_v16 = vrot.slane %v3966_v29, 5  ;;  %v3974_v43 = vrot.slane %v3972_v61, 5  ;;  %v3978_v38 = vrot.slane %v3976_v32, 4  ;;  %v8656_v39 = vld [vmem:[%s11383_s6 + $0xb0] sm:$0xff]   ;;  %v8658_v58 = vld [vmem:[%s11383_s6 + $0xa8] sm:$0xff]  }
 0x1fb   : > { %8277 = vmatpush3.bf16.msra.mxu1 %v8647_v19  ;;  %v3989_v9 = vrot.slane %v3987_v46, 4  ;;  %v3990_v52 = vshll.u32 %v10331_v6, 16  ;;  %v3996_v28 = vshll.u32 %v10334_v41, 16  ;;  %v4000_v53 = vshrl.u32 %v10334_v41, 16  ;;  %v8651_v20 = vld [vmem:[%s11383_s6 + $0x50] sm:$0xff]   ;;  %8340 = vmatprep.subr.bf16.mxu0 %v8656_v39  ;;  %v8652_v63 = vld [vmem:[%s11383_s6 + $0x48] sm:$0xff]  }
 0x1fc   : > { %8278 = vmatprep.subr.bf16.mxu1 %v8648_v34  ;;  %v3969_v51 = vor.u32 %v3968_v16, %v3965_v14  ;;  %v3979_v24 = vor.u32 %v3978_v38, %v3974_v43  ;;  %v4006_v59 = vshll.u32 %v10336_v35, 16  ;;  %8341 = vmatpush3.bf16.msra.mxu0 %v8656_v39  ;;  %v10359_v50 = vld [vmem:[#allocation2 + $0x18] sm:$0xf]  ;;  %v10361_v55 = vld [vmem:[#allocation2 + $0x1c] sm:$0xf]  ;;  %v4567_v25 = vrot.slane %v10320_v0, 5 }
 0x1fd   : > { %v3992_v17 = vrot.slane %v3990_v52, 5  ;;  %v10346_v54 = vrot.slane %v3996_v28, 5  ;;  %v4002_v57 = vrot.slane %v4000_v53, 4  ;;  %v10367_v40 = vld [vmem:[#allocation2 + $0x20] sm:$0x1]  ;;  %v4011_v23 = vshrl.u32 %v10359_v50, 16  ;;  %8342 = vmatprep.subr.bf16.mxu0 %v8658_v58 }
 0x1fe   : > { %v3970_v42 = vrot.slane %v3969_v51, 4  ;;  %v3980_v3 = vrot.slane %v3979_v24, 4  ;;  %v4008_v27 = vrot.slane %v4006_v59, 5  ;;  %v4014_v15 = vshll.u32 %v10359_v50, 16  ;;  %v10374_v2 = vld [vmem:[#allocation2 + $0x24] sm:$0xf] }
 0x1ff   : > { %8279 = vmatpush3.bf16.msra.mxu1 %v8648_v34  ;;  %v3993_v12 = vor.u32 %v3992_v17, %v3989_v9  ;;  %v4003_v36 = vor.u32 %v4002_v57, %v10346_v54  ;;  %v4020_v5 = vshll.u32 %v10361_v55, 16  ;;  %v4024_v56 = vshrl.u32 %v10361_v55, 16  ;;  %v10376_v31 = vld [vmem:[#allocation2 + $0x28] sm:$0xf]  ;;  %v10378_v44 = vld [vmem:[#allocation2 + $0x2c] sm:$0x1] }
 0x200   : > { %8280 = vmatprep.subr.bf16.mxu1 %v8649_v60  ;;  %v3975_v62 = vsel %vm8976_vm4, %v3970_v42, %v3974_v43  ;;  %v3985_v30 = vsel %vm8976_vm4, %v3980_v3, %v3984_v21  ;;  %v4030_v7 = vshll.u32 %v10367_v40, 16  ;;  %8343 = vmatpush3.bf16.msra.mxu0 %v8658_v58  ;;  %v4013_v18 = vrot.slane %v4011_v23, 4  ;;  %v8660_v34 = vld [vmem:[%s11383_s6 + $0xa0] sm:$0xff]   ;;  %v8662_v38 = vld [vmem:[%s11383_s6 + $0x98] sm:$0xff]   ;;  %v10407_v39 = vld [vmem:[#allocation2 + $0x30] sm:$0xf] }
 0x201   : > { %v7527_v26 = vcombine.low %v3975_v62, %v3985_v30  ;;  %v3994_v4 = vrot.slane %v3993_v12, 4  ;;  %v4004_v48 = vrot.slane %v4003_v36, 4  ;;  %v4016_v1 = vrot.slane %v4014_v15, 5  ;;  %v8653_v29 = vld [vmem:[%s11383_s6 + $0x40] sm:$0xff]   ;;  %8344 = vmatprep.subr.bf16.mxu0 %v8660_v34  ;;  %v8655_v21 = vld [vmem:[%s11383_s6 + $0x38] sm:$0xff]   ;;  %v8657_v58 = vld [vmem:[%s11383_s6 + $0x30] sm:$0xff]  }
 0x202   : > { %v4022_v49 = vrot.slane %v4020_v5, 5  ;;  %v4026_v47 = vrot.slane %v4024_v56, 4  ;;  %v4032_v19 = vrot.slane %v4030_v7, 5  ;;  %v4038_v8 = vshll.u32 %v10374_v2, 16  ;;  %v10414_v42 = vld [vmem:[#allocation2 + $0x38] sm:$0x1] }
 0x203   : > { %8281 = vmatpush3.bf16.msra.mxu1 %v8649_v60  ;;  %8290 = vmatprep.mubr.bf16.mxu1 %v7527_v26  ;;  %v3999_v11 = vsel %vm8976_vm4, %v3994_v4, %v10346_v54  ;;  %v4009_v60 = vsel %vm8976_vm4, %v4004_v48, %v4008_v27  ;;  %v4017_v45 = vor.u32 %v4016_v1, %v4013_v18  ;;  %v4044_v32 = vshll.u32 %v10376_v31, 16  ;;  %v10420_v36 = vld [vmem:[#allocation2 + $0x3c] sm:$0xf]  ;;  %v10426_v15 = vld [vmem:[#allocation2 + $0x40] sm:$0xf]  ;;  %v8664_v1 = vld [vmem:[%s11383_s6 + $0x90] sm:$0xff]  }
 0x204   : > { %8282 = vmatprep.subr.bf16.mxu1 %v8650_v13  ;;  %v4027_v61 = vor.u32 %v4026_v47, %v4022_v49  ;;  %v4048_v33 = vshrl.u32 %v10376_v31, 16  ;;  %v4054_v46 = vshll.u32 %v10378_v44, 16  ;;  %v4040_v43 = vrot.slane %v4038_v8, 5  ;;  %8345 = vmatpush3.bf16.msra.mxu0 %v8660_v34  ;;  %v10428_v7 = vld [vmem:[#allocation2 + $0x44] sm:$0x1] }
 0x205   : > { %v4018_v14 = vrot.slane %v4017_v45, 4  ;;  %v10402_v52 = vrot.slane %v4044_v32, 5  ;;  %v4570_v51 = vrot.slane %v10322_v37, 5  ;;  %v7528_v24 = vcombine.low %v3999_v11, %v4009_v60  ;;  %8346 = vmatprep.subr.bf16.mxu0 %v8662_v38  ;;  %v8665_v37 = vld [vmem:[%s11383_s6 + $0x10] sm:$0xff]  }
 0x206   : > { %v4028_v9 = vrot.slane %v4027_v61, 4  ;;  %v4050_v28 = vrot.slane %v4048_v33, 4  ;;  %v4059_v3 = vshrl.u32 %v10407_v39, 16  ;;  %v4062_v57 = vshll.u32 %v10407_v39, 16  ;;  %v8659_v33 = vld [vmem:[%s11383_s6 + $0x28] sm:$0xff]  }
 0x207   : > { %8283 = vmatpush3.bf16.msra.mxu1 %v8650_v13  ;;  %v4035_v13 = vshrl.u32 %v10374_v2, 16  ;;  %v4023_v53 = vsel %vm8976_vm4, %v4018_v14, %v4022_v49  ;;  %v4056_v27 = vrot.slane %v4054_v46, 5  ;;  %v4078_v23 = vshll.u32 %v10414_v42, 16 }
 0x208   : > { %8284 = vmatprep.subr.bf16.mxu1 %v8651_v20  ;;  %v4033_v17 = vsel %vm8976_vm4, %v4028_v9, %v4032_v19  ;;  %v4051_v54 = vor.u32 %v4050_v28, %v10402_v52  ;;  %8347 = vmatpush3.bf16.msra.mxu0 %v8662_v38  ;;  %v4061_v26 = vrot.slane %v4059_v3, 4  ;;  %v4064_v4 = vrot.slane %v4062_v57, 5 }
 0x209   : > { %v4037_v16 = vrot.slane %v4035_v13, 4  ;;  %v7529_v48 = vcombine.low %v4023_v53, %v4033_v17  ;;  %v4083_v18 = vshrl.u32 %v10420_v36, 16  ;;  %v4080_v47 = vrot.slane %v4078_v23, 5  ;;  %8348 = vmatprep.subr.bf16.mxu0 %v8664_v1  ;;  %v10455_v53 = vld [vmem:[#allocation2 + $0x4c] sm:$0xf]  ;;  %v8661_v23 = vld [vmem:[%s11383_s6 + $0x20] sm:$0xff]  }
 0x20a   : > { %v4065_v49 = vor.u32 %v4064_v4, %v4061_v26  ;;  %v4086_v19 = vshll.u32 %v10420_v36, 16  ;;  %v4092_v13 = vshll.u32 %v10426_v15, 16  ;;  %v4096_v61 = vshrl.u32 %v10426_v15, 16  ;;  %v10468_v4 = vld [vmem:[#allocation2 + $0x5c] sm:$0x1] }
 0x20b   : > { %8285 = vmatpush3.bf16.msra.mxu1 %v8651_v20  ;;  %v4041_v59 = vor.u32 %v4040_v43, %v4037_v16  ;;  %v10412_v20 = vld [vmem:[#allocation2 + $0x34] sm:$0xf]  ;;  %v4085_v45 = vrot.slane %v4083_v18, 4  ;;  %v4102_v32 = vshll.u32 %v10428_v7, 16  ;;  %v8666_v16 = vld [vmem:[%s11383_s6 + $0x88] sm:$0xff]  }
 0x20c   : > { %8286 = vmatprep.subr.bf16.mxu1 %v8652_v63  ;;  %v4068_v62 = vshll.u32 %v10412_v20, 16  ;;  %v4072_v30 = vshrl.u32 %v10412_v20, 16  ;;  %v4066_v8 = vrot.slane %v4065_v49, 4  ;;  %8349 = vmatpush3.bf16.msra.mxu0 %v8664_v1  ;;  %v4094_v14 = vrot.slane %v4092_v13, 5 }
 0x20d   : > { %v4042_v12 = vrot.slane %v4041_v59, 4  ;;  %v4098_v9 = vrot.slane %v4096_v61, 4  ;;  %8350 = vmatprep.subr.bf16.mxu0 %v8666_v16  ;;  %v10457_v59 = vld [vmem:[#allocation2 + $0x50] sm:$0x1] }
 0x20e   : > { %v4070_v5 = vrot.slane %v4068_v62, 5  ;;  %v4074_v56 = vrot.slane %v4072_v30, 4  ;;  %v4116_v30 = vshll.u32 %v10455_v53, 16  ;;  %v4126_v26 = vshll.u32 %v10457_v59, 16 }
 0x20f   : > { %8287 = vmatpush3.bf16.msra.mxu1 %v8652_v63  ;;  %v4052_v63 = vrot.slane %v4051_v54, 4  ;;  %v4047_v11 = vsel %vm8976_vm4, %v4042_v12, %v10402_v52  ;;  %v4104_v52 = vrot.slane %v4102_v32, 5  ;;  %v4099_v3 = vor.u32 %v4098_v9, %v4094_v14  ;;  %v10460_v12 = vld [vmem:[#allocation2 + $0x54] sm:$0xf] }
 0x210   : > { %8288 = vmatprep.subr.bf16.mxu1 %v8653_v29  ;;  %v4075_v60 = vor.u32 %v4074_v56, %v4070_v5  ;;  %v4071_v43 = vsel %vm8976_vm4, %v4066_v8, %v4070_v5  ;;  %8351 = vmatpush3.bf16.msra.mxu0 %v8666_v16  ;;  %v4131_v56 = vshrl.u32 %v10460_v12, 16  ;;  %v4118_v1 = vrot.slane %v4116_v30, 5  ;;  %v8663_v8 = vld [vmem:[%s11383_s6 + $0x18] sm:$0xff]  }
 0x211   : > { %v4057_v34 = vsel %vm8976_vm4, %v4052_v63, %v4056_v27  ;;  %v10462_v27 = vld [vmem:[#allocation2 + $0x58] sm:$0xf]  ;;  %v4120_v63 = vshrl.u32 %v10455_v53, 16  ;;  %v4100_v5 = vrot.slane %v4099_v3, 4  ;;  %v4128_v49 = vrot.slane %v4126_v26, 5 }
 0x212   : > { %v4076_v46 = vrot.slane %v4075_v60, 4  ;;  %v7530_v28 = vcombine.low %v4047_v11, %v4057_v34  ;;  %v4134_v34 = vshll.u32 %v10460_v12, 16  ;;  %v4140_v60 = vshll.u32 %v10462_v27, 16 }
 0x213   : > { %8289 = vmatpush3.bf16.msra.mxu1 %v8653_v29  ;;  %v4088_v29 = vrot.slane %v4086_v19, 5  ;;  %v4122_v11 = vrot.slane %v4120_v63, 4  ;;  %v4133_v19 = vrot.slane %v4131_v56, 4  ;;  %v4144_v32 = vshrl.u32 %v10462_v27, 16 }
 0x214   : > { %8306 = vmatprep.subr.bf16.mxu1 %v8655_v21  ;;  %v4150_v16 = vshll.u32 %v10468_v4, 16 }
 0x215   : > { %v4089_v38 = vor.u32 %v4088_v29, %v4085_v45  ;;  %v8668_v45 = vld [vmem:[%s11383_s6 + $0x80] sm:$0xff]   ;;  %v4123_v61 = vor.u32 %v4122_v11, %v4118_v1  ;;  %v4146_v9 = vrot.slane %v4144_v32, 4 }
 0x216   : > { %8291 = vmatmul.mubr.bf16.vlgmr.msra.gmra.mxu1 %v7528_v24  ;;  %v10453_v24 = vld [vmem:[#allocation2 + $0x48] sm:$0xf]  ;;  %8352 = vmatprep.subr.bf16.mxu0 %v8668_v45 }
 0x217   : > { %8307 = vmatpush3.bf16.msra.mxu1 %v8655_v21  ;;  %8294 = vmatprep.mubr.bf16.mxu1 %v7529_v48  ;;  %v4081_v21 = vsel %vm8976_vm4, %v4076_v46, %v4080_v47  ;;  %v4090_v54 = vrot.slane %v4089_v38, 4  ;;  %v4107_v57 = vshrl.u32 %v10453_v24, 16  ;;  %v4110_v62 = vshll.u32 %v10453_v24, 16 }
 0x218   : > { %8308 = vmatprep.subr.bf16.mxu1 %v8657_v58  ;;  %v7531_v17 = vcombine.low %v4071_v43, %v4081_v21  ;;  %v4105_v47 = vsel %vm8976_vm4, %v4100_v5, %v4104_v52  ;;  %v4136_v46 = vrot.slane %v4134_v34, 5  ;;  %v4569_v43 = vrot.slane %v4567_v25, 4  ;;  %8353 = vmatpush3.bf16.msra.mxu0 %v8668_v45  ;;  %v4541_v52 = vld [vmem:[#allocation2] sm:$0xe]  ;;  %v8670_v5 = vld [vmem:[%s11383_s6 + $0x138] sm:$0xff]  }
 0x219   : > { %v4095_v48 = vsel %vm8976_vm4, %v4090_v54, %v4094_v14  ;;  %v4112_v18 = vrot.slane %v4110_v62, 5  ;;  %v4142_v14 = vrot.slane %v4140_v60, 5  ;;  %v4124_v38 = vrot.slane %v4123_v61, 4  ;;  %v4542_v62 = vld [vmem:[#allocation2 + $0xc] sm:$0xe]  ;;  %8402 = vmatprep.subr.bf16.mxu0 %v8670_v5 }
 0x21a   : > { %v7532_v13 = vcombine.low %v4095_v48, %v4105_v47  ;;  %v4137_v21 = vor.u32 %v4136_v46, %v4133_v19  ;;  %v7559_v54 = vrot.slane %v4541_v52, 9  ;;  %v7560_v48 = vrot.slane %v4542_v62, 9  ;;  %v8667_v47 = vld [vmem:[%s11383_s6 + $0x8] sm:$0xff]   ;;  %v4543_v19 = vld [vmem:[#allocation2 + $0x18] sm:$0xe] }
 0x21b   : > { %8309 = vmatpush3.bf16.msra.mxu1 %v8657_v58  ;;  %v4109_v58 = vrot.slane %v4107_v57, 4  ;;  %v4571_v57 = vsel %vm9130_vm7, %v4569_v43, %v4570_v51  ;;  %v4129_v63 = vsel %vm8976_vm4, %v4124_v38, %v4128_v49  ;;  %v4147_v26 = vor.u32 %v4146_v9, %v4142_v14  ;;  %v4544_v61 = vld [vmem:[#allocation2 + $0x24] sm:$0xe] }
 0x21c   : > { %8310 = vmatprep.subr.bf16.mxu1 %v8659_v33  ;;  %v4577_v49 = vrot.slane %v10336_v35, 5  ;;  %v4581_v34 = vrot.slane %v10361_v55, 5  ;;  %v4584_v60 = vrot.slane %v10367_v40, 5  ;;  %v7562_v32 = vrot.slane %v4544_v61, 9  ;;  %v8669_v9 = vld [vmem:[%s11383_s6] sm:$0xff]  }
 0x21d   : > { %v4113_v29 = vor.u32 %v4112_v18, %v4109_v58  ;;  %v4138_v58 = vrot.slane %v4137_v21, 4  ;;  %v4148_v18 = vrot.slane %v4147_v26, 4  ;;  %v8673_v26 = vld [vmem:[%s11383_s6 + $0xf8] sm:$0xff]   ;;  %v7546_v61 = vcombine.low %v10374_v2, %v10376_v31 }
 0x21e   : > { %8295 = vmatmul.mubr.bf16.gmra.mxu1 %v7530_v28  ;;  %v4574_v28 = vrot.slane %v10334_v41, 5  ;;  %v7547_v2 = vcombine.low %v10407_v39, %v10412_v20 }
 0x21f   : > { %8311 = vmatpush3.bf16.msra.mxu1 %v8659_v33  ;;  %8298 = vmatprep.mubr.bf16.mxu1 %v7531_v17  ;;  %v4114_v33 = vrot.slane %v4113_v29, 4  ;;  %v4152_v17 = vrot.slane %v4150_v16, 5  ;;  %v7561_v29 = vrot.slane %v4543_v19, 9  ;;  %v4591_v16 = vrot.slane %v10378_v44, 5  ;;  %v4545_v44 = vld [vmem:[#allocation2 + $0x30] sm:$0xe] }
 0x220   : > { %8312 = vmatprep.subr.bf16.mxu1 %v8661_v23  ;;  %v4576_v56 = vrot.slane %v4574_v28, 4  ;;  %v4575_v11 = vsel %vm9130_vm7, %v7560_v48, %v4574_v28  ;;  %v4616_v19 = vrot.slane %v10462_v27, 5 }
 0x221   : > { %v4119_v30 = vsel %vm8976_vm4, %v4114_v33, %v4118_v1  ;;  %v4153_v45 = vsel %vm8976_vm4, %v4148_v18, %v4152_v17  ;;  %v4582_v46 = vsel %vm9130_vm7, %v7561_v29, %v4581_v34  ;;  %v7543_v33 = vcombine.low %v10318_v10, %v10320_v0  ;;  %v8680_v18 = vld [vmem:[%s11383_s6 + $0x120] sm:$0xff]  }
 0x222   : > { %v7533_v51 = vcombine.low %v4119_v30, %v4129_v63  ;;  %v4578_v35 = vsel %vm9130_vm7, %v4576_v56, %v4577_v49  ;;  %v4595_v17 = vrot.slane %v10412_v20, 5  ;;  %v7563_v10 = vrot.slane %v4545_v44, 9  ;;  %v4546_v30 = vld [vmem:[#allocation2 + $0x3c] sm:$0xe]  ;;  %v4547_v56 = vld [vmem:[#allocation2 + $0x48] sm:$0xe] }
 0x223   : > { %8313 = vmatpush3.bf16.msra.mxu1 %v8661_v23  ;;  %v4568_v23 = vsel %vm9130_vm7, %v7559_v54, %v4567_v25  ;;  %v4143_v25 = vsel %vm8976_vm4, %v4138_v58, %v4142_v14  ;;  %v7584_v40 = vcombine.low %v4575_v11, %v4578_v35  ;;  %v4588_v14 = vrot.slane %v10376_v31, 5  ;;  %v8686_v31 = vld [vmem:[%s11383_s6 + $0x110] sm:$0xff]   ;;  %v8681_v44 = vld [vmem:[%s11383_s6 + $0xe0] sm:$0xff]  }
 0x224   : > { %8314 = vmatprep.subr.bf16.mxu1 %v8663_v8  ;;  %v7583_v1 = vcombine.low %v4568_v23, %v4571_v57  ;;  %v7534_v43 = vcombine.low %v4143_v25, %v4153_v45  ;;  %v4598_v0 = vrot.slane %v10414_v42, 5  ;;  %v8676_v57 = vld [vmem:[%s11383_s6 + $0x128] sm:$0xff]   ;;  %v4597_v62 = vrot.slane %v4595_v17, 4 }
 0x225   : > { %v4589_v28 = vsel %vm9130_vm7, %v7562_v32, %v4588_v14  ;;  %v4590_v21 = vrot.slane %v4588_v14, 4  ;;  %v4602_v63 = vrot.slane %v10426_v15, 5  ;;  %v4596_v42 = vsel %vm9130_vm7, %v7563_v10, %v4595_v17  ;;  %v5074_v32 = vld [vmem:[#allocation2 + $0xc] sm:$0xf] }
 0x226   : > { %8299 = vmatmul.mubr.bf16.gmra.mxu1 %v7532_v13  ;;  %v8674_v13 = vld [vmem:[%s11383_s6 + $0x130] sm:$0xff]   ;;  %8354 = vmatprep.mubr.bf16.mxu0 %v7583_v1  ;;  %v7565_v1 = vrot.slane %v4547_v56, 9  ;;  %v4609_v11 = vrot.slane %v10455_v53, 5  ;;  %v7544_v49 = vcombine.low %v10331_v6, %v10334_v41  ;;  %v8682_v41 = vld [vmem:[%s11383_s6 + $0x118] sm:$0xff]   ;;  %v4619_v35 = vrot.slane %v10468_v4, 5 }
 0x227   : > { %8315 = vmatpush3.bf16.msra.mxu1 %v8663_v8  ;;  %8302 = vmatprep.mubr.bf16.mxu1 %v7533_v51  ;;  %v4583_v8 = vrot.slane %v4581_v34, 4  ;;  %v4592_v54 = vsel %vm9130_vm7, %v4590_v21, %v4591_v16  ;;  %v7564_v51 = vrot.slane %v4546_v30, 9  ;;  %v4604_v58 = vrot.slane %v4602_v63, 4  ;;  %v8675_v34 = vld [vmem:[%s11383_s6 + $0xf0] sm:$0xff]   ;;  %v10601_v21 = vld [vmem:[#allocation2 + $0x1c] sm:$0xf] }
 0x228   : > { %8316 = vmatprep.subr.bf16.mxu1 %v8665_v37  ;;  %8355 = vmatmul.mubr.bf16.vlgmr.msra.gmra.mxu0 %v7584_v40  ;;  %v7586_v48 = vcombine.low %v4589_v28, %v4592_v54  ;;  %v4611_v6 = vrot.slane %v4609_v11, 4  ;;  %v4610_v45 = vsel %vm9130_vm7, %v7565_v1, %v4609_v11  ;;  %v8679_v40 = vld [vmem:[%s11383_s6 + $0xe8] sm:$0xff]   ;;  %v10585_v4 = vld [vmem:[#allocation2 + $0x10] sm:$0xf]  ;;  %v5099_v14 = vshrl.u32 %v5074_v32, 16 }
 0x229   : > { %v4585_v38 = vsel %vm9130_vm7, %v4583_v8, %v4584_v60  ;;  %8403 = vmatpush3.bf16.msra.mxu0 %v8670_v5  ;;  %v4605_v5 = vrot.slane %v10428_v7, 5  ;;  %v4612_v7 = vrot.slane %v10457_v59, 5  ;;  %v7545_v60 = vcombine.low %v10359_v50, %v10361_v55  ;;  %v5077_v28 = vld [vmem:[#allocation2 + $0x18] sm:$0xf] }
 0x22a   : > { %v7585_v52 = vcombine.low %v4582_v46, %v4585_v38  ;;  %8404 = vmatprep.subr.bf16.mxu0 %v8674_v13  ;;  %v4603_v25 = vsel %vm9130_vm7, %v7564_v51, %v4602_v63  ;;  %v10587_v46 = vld [vmem:[#allocation2 + $0x14] sm:$0x1]  ;;  %v5102_v16 = vshll.u32 %v5074_v32, 16  ;;  %v5101_v39 = vrot.slane %v5099_v14, 4  ;;  %v5083_v32 = vld [vmem:[#allocation2 + $0x30] sm:$0xf] }
 0x22b   : > { %8317 = vmatpush3.bf16.msra.mxu1 %v8665_v37  ;;  %v4599_v37 = vsel %vm9130_vm7, %v4597_v62, %v4598_v0  ;;  %v4606_v59 = vsel %vm9130_vm7, %v4604_v58, %v4605_v5  ;;  %v4613_v50 = vsel %vm9130_vm7, %v4611_v6, %v4612_v7  ;;  %v10606_v0 = vld [vmem:[#allocation2 + $0x20] sm:$0x1]  ;;  %v5126_v62 = vshll.u32 %v5077_v28, 16  ;;  %v8688_v5 = vld [vmem:[%s11383_s6 + $0x108] sm:$0xff]   ;;  %v8685_v7 = vld [vmem:[%s11383_s6 + $0xd8] sm:$0xff]  }
 0x22c   : > { %8318 = vmatprep.subr.bf16.mxu1 %v8667_v47  ;;  %8358 = vmatprep.mubr.bf16.mxu0 %v7585_v52  ;;  %v7587_v23 = vcombine.low %v4596_v42, %v4599_v37  ;;  %v7588_v29 = vcombine.low %v4603_v25, %v4606_v59  ;;  %v7589_v8 = vcombine.low %v4610_v45, %v4613_v50  ;;  %v5118_v52 = vshll.u32 %v10587_v46, 16  ;;  %v5080_v6 = vld [vmem:[#allocation2 + $0x24] sm:$0xf]  ;;  %v10628_v50 = vld [vmem:[#allocation2 + $0x28] sm:$0xf] }
 0x22d   : > { %8405 = vmatpush3.bf16.msra.mxu0 %v8674_v13  ;;  %v4618_v13 = vrot.slane %v4616_v19, 4  ;;  %v5104_v20 = vrot.slane %v5102_v16, 5  ;;  %v5132_v30 = vshll.u32 %v10601_v21, 16  ;;  %v5142_v42 = vshll.u32 %v10606_v0, 16  ;;  %v8694_v16 = vld [vmem:[%s11383_s6 + $0x1b8] sm:$0xff]  }
 0x22e   : > { %8303 = vmatmul.mubr.bf16.gmra.mxu1 %v7534_v43  ;;  %8406 = vmatprep.subr.bf16.mxu0 %v8676_v57  ;;  %v5108_v43 = vshll.u32 %v10585_v4, 16  ;;  %v5120_v54 = vrot.slane %v5118_v52, 5  ;;  %v5128_v51 = vrot.slane %v5126_v62, 5  ;;  %v7549_v45 = vcombine.low %v10453_v24, %v10455_v53 }
 0x22f   : > { %8319 = vmatpush3.bf16.msra.mxu1 %v8667_v47  ;;  %8322 = vmatprep.mubr.bf16.mxu1 %v7543_v33  ;;  %v4548_v47 = vld [vmem:[#allocation2 + $0x54] sm:$0xe]  ;;  %v5112_v33 = vshrl.u32 %v10585_v4, 16  ;;  %v5105_v63 = vor.u32 %v5104_v20, %v5101_v39  ;;  %v5134_v58 = vrot.slane %v5132_v30, 5  ;;  %v5160_v24 = vshrl.u32 %v10628_v50, 16 }
 0x230   : > { %8320 = vmatprep.subr.bf16.mxu1 %v8669_v9  ;;  %8359 = vmatmul.mubr.bf16.gmra.mxu0 %v7586_v48  ;;  %v7566_v55 = vrot.slane %v4548_v47, 9  ;;  %v5110_v17 = vrot.slane %v5108_v43, 5  ;;  %v5136_v48 = vshrl.u32 %v10601_v21, 16  ;;  %v5171_v52 = vshrl.u32 %v5083_v32, 16 }
 0x231   : > { %8362 = vmatprep.mubr.bf16.mxu0 %v7587_v23  ;;  %8407 = vmatpush3.bf16.msra.mxu0 %v8676_v57  ;;  %v5114_v10 = vrot.slane %v5112_v33, 4  ;;  %v5123_v57 = vshrl.u32 %v5077_v28, 16  ;;  %v5106_v56 = vrot.slane %v5105_v63, 4  ;;  %v5174_v28 = vshll.u32 %v5083_v32, 16  ;;  %v8698_v63 = vld [vmem:[%s11383_s6 + $0x1b0] sm:$0xff]  }
 0x232   : > { %8408 = vmatprep.subr.bf16.mxu0 %v8680_v18  ;;  %v4617_v38 = vsel %vm9130_vm7, %v7566_v55, %v4616_v19  ;;  %v5138_v1 = vrot.slane %v5136_v48, 4  ;;  %v10630_v55 = vld [vmem:[#allocation2 + $0x2c] sm:$0x1] }
 0x233   : > { %8321 = vmatpush3.bf16.msra.mxu1 %v8669_v9  ;;  %v4620_v9 = vsel %vm9130_vm7, %v4618_v13, %v4619_v35  ;;  %v5125_v37 = vrot.slane %v5123_v57, 4  ;;  %v5147_v13 = vshrl.u32 %v5080_v6, 16  ;;  %v5173_v57 = vrot.slane %v5171_v52, 4 }
 0x234   : > { %8370 = vmatprep.subr.bf16.mxu1 %v8673_v26  ;;  %v7590_v23 = vcombine.low %v4617_v38, %v4620_v9  ;;  %v5139_v19 = vor.u32 %v5138_v1, %v5134_v58  ;;  %v10647_v9 = vld [vmem:[#allocation2 + $0x38] sm:$0x1]  ;;  %v5176_v62 = vrot.slane %v5174_v28, 5 }
 0x235   : > { %8409 = vmatpush3.bf16.msra.mxu0 %v8680_v18  ;;  %v5129_v11 = vor.u32 %v5128_v51, %v5125_v37  ;;  %v8693_v37 = vld [vmem:[%s11383_s6 + $0xc0] sm:$0xff]  }
 0x236   : > { %8323 = vmatmul.mubr.bf16.vlgmr.msra.gmra.mxu1 %v7544_v49  ;;  %8410 = vmatprep.subr.bf16.mxu0 %v8682_v41  ;;  %v5111_v49 = vsel %vm8976_vm4, %v5106_v56, %v5110_v17  ;;  %v5140_v35 = vrot.slane %v5139_v19, 4  ;;  %v5177_v51 = vor.u32 %v5176_v62, %v5173_v57  ;;  %v5086_v19 = vld [vmem:[#allocation2 + $0x3c] sm:$0xf] }
 0x237   : > { %8371 = vmatpush3.bf16.msra.mxu1 %v8673_v26  ;;  %8326 = vmatprep.mubr.bf16.mxu1 %v7545_v60  ;;  %v5115_v26 = vor.u32 %v5114_v10, %v5110_v17  ;;  %v8692_v60 = vld [vmem:[%s11383_s6 + $0x100] sm:$0xff]   ;;  %v5130_v59 = vrot.slane %v5129_v11, 4  ;;  %v5190_v10 = vshll.u32 %v10647_v9, 16 }
 0x238   : > { %8372 = vmatprep.subr.bf16.mxu1 %v8675_v34  ;;  %8363 = vmatmul.mubr.bf16.gmra.mxu0 %v7588_v29  ;;  %v8687_v29 = vld [vmem:[%s11383_s6 + $0xd0] sm:$0xff]  }
 0x239   : > { %8366 = vmatprep.mubr.bf16.mxu0 %v7589_v8  ;;  %8411 = vmatpush3.bf16.msra.mxu0 %v8682_v41  ;;  %v5116_v18 = vrot.slane %v5115_v26, 4  ;;  %v7548_v41 = vcombine.low %v10420_v36, %v10426_v15  ;;  %v5150_v36 = vshll.u32 %v5080_v6, 16  ;;  %v5156_v15 = vshll.u32 %v10628_v50, 16 }
 0x23a   : > { %8412 = vmatprep.subr.bf16.mxu0 %v8686_v31  ;;  %v5166_v8 = vshll.u32 %v10630_v55, 16  ;;  %v5192_v11 = vrot.slane %v5190_v10, 5  ;;  %v5195_v6 = vshrl.u32 %v5086_v19, 16 }
 0x23b   : > { %8373 = vmatpush3.bf16.msra.mxu1 %v8675_v34  ;;  %v5121_v47 = vsel %vm8976_vm4, %v5116_v18, %v5120_v54  ;;  %v5144_v34 = vrot.slane %v5142_v42, 5  ;;  %v5152_v43 = vrot.slane %v5150_v36, 5  ;;  %v5158_v33 = vrot.slane %v5156_v15, 5  ;;  %v8691_v54 = vld [vmem:[%s11383_s6 + $0xc8] sm:$0xff]   ;;  %v8704_v15 = vld [vmem:[%s11383_s6 + $0x1a0] sm:$0xff]  }
 0x23c   : > { %8374 = vmatprep.subr.bf16.mxu1 %v8679_v40  ;;  %v7647_v25 = vcombine.low %v5111_v49, %v5121_v47  ;;  %v5168_v38 = vrot.slane %v5166_v8, 5  ;;  %v8700_v47 = vld [vmem:[%s11383_s6 + $0x1a8] sm:$0xff]  }
 0x23d   : > { %8413 = vmatpush3.bf16.msra.mxu0 %v8686_v31  ;;  %v5145_v53 = vsel %vm8976_vm4, %v5140_v35, %v5144_v34  ;;  %v10645_v31 = vld [vmem:[#allocation2 + $0x34] sm:$0xf]  ;;  %v10672_v34 = vld [vmem:[#allocation2 + $0x40] sm:$0xf]  ;;  %v5089_v8 = vld [vmem:[#allocation2 + $0x48] sm:$0xf] }
 0x23e   : > { %8327 = vmatmul.mubr.bf16.gmra.mxu1 %v7546_v61  ;;  %8414 = vmatprep.subr.bf16.mxu0 %v8688_v5  ;;  %v5135_v61 = vsel %vm8976_vm4, %v5130_v59, %v5134_v58  ;;  %v5184_v17 = vshrl.u32 %v10645_v31, 16  ;;  %v5534_v58 = vrot.slane %v10585_v4, 5  ;;  %v10679_v59 = vld [vmem:[#allocation2 + $0x44] sm:$0x1]  ;;  %v5219_v52 = vshrl.u32 %v5089_v8, 16  ;;  %v8721_v4 = vld [vmem:[%s11383_s6 + $0x1f8] sm:$0xff]  }
 0x23f   : > { %8375 = vmatpush3.bf16.msra.mxu1 %v8679_v40  ;;  %8330 = vmatprep.mubr.bf16.mxu1 %v7547_v2  ;;  %v5149_v40 = vrot.slane %v5147_v13, 4  ;;  %v7648_v14 = vcombine.low %v5135_v61, %v5145_v53  ;;  %v5162_v2 = vrot.slane %v5160_v24, 4  ;;  %v5208_v13 = vshrl.u32 %v10672_v34, 16  ;;  %v8696_v61 = vld [vmem:[#allocation2 + $0x18] sm:$0xff]  }
 0x240   : > { %8376 = vmatprep.subr.bf16.mxu1 %v8681_v44  ;;  %8367 = vmatmul.mubr.bf16.gmra.mxu0 %v7590_v23  ;;  %v5186_v42 = vrot.slane %v5184_v17, 4  ;;  %v8695_v23 = vld [vmem:[#allocation2 + $0xc] sm:$0xff]   ;;  %v5197_v24 = vrot.slane %v5195_v6, 4  ;;  %v5222_v28 = vshll.u32 %v5089_v8, 16 }
 0x241   : > { %8418 = vmatprep.mubr.bf16.mxu0 %v7647_v25  ;;  %8415 = vmatpush3.bf16.msra.mxu0 %v8688_v5  ;;  %v5153_v39 = vor.u32 %v5152_v43, %v5149_v40  ;;  %v5163_v20 = vor.u32 %v5162_v2, %v5158_v33  ;;  %v7550_v5 = vcombine.low %v10460_v12, %v10462_v27  ;;  %v5178_v27 = vrot.slane %v5177_v51, 4  ;;  %v10691_v43 = vld [vmem:[#allocation2 + $0x50] sm:$0x1]  ;;  %v8701_v2 = vld [vmem:[#allocation2 + $0x24] sm:$0xff]  }
 0x242   : > { %8416 = vmatprep.subr.bf16.mxu0 %v8692_v60  ;;  %v5210_v32 = vrot.slane %v5208_v13, 4  ;;  %v5238_v17 = vshll.u32 %v10691_v43, 16  ;;  %v5224_v57 = vrot.slane %v5222_v28, 5 }
 0x243   : > { %8377 = vmatpush3.bf16.msra.mxu1 %v8681_v44  ;;  %v5180_v44 = vshll.u32 %v10645_v31, 16  ;;  %v5154_v26 = vrot.slane %v5153_v39, 4  ;;  %v5164_v48 = vrot.slane %v5163_v20, 4 }
 0x244   : > { %8378 = vmatprep.subr.bf16.mxu1 %v8685_v7 }
 0x245   : > { %8417 = vmatpush3.bf16.msra.mxu0 %v8692_v60  ;;  %v5182_v30 = vrot.slane %v5180_v44, 5  ;;  %v5159_v56 = vsel %vm8976_vm4, %v5154_v26, %v5158_v33  ;;  %v5169_v18 = vsel %vm8976_vm4, %v5164_v48, %v5168_v38  ;;  %v8697_v60 = vld [vmem:[%s11383_s6 + $0x178] sm:$0xff]   ;;  %v8699_v33 = vld [vmem:[%s11383_s6 + $0x170] sm:$0xff]   ;;  %v10704_v48 = vrot.slane %v5534_v58, 4 }
 0x246   : > { %8331 = vmatmul.mubr.bf16.gmra.mxu1 %v7548_v41  ;;  %8466 = vmatprep.subr.bf16.mxu0 %v8694_v16  ;;  %v7649_v12 = vcombine.low %v5159_v56, %v5169_v18  ;;  %v5198_v41 = vshll.u32 %v5086_v19, 16  ;;  %v8706_v26 = vld [vmem:[%s11383_s6 + $0x198] sm:$0xff]   ;;  %v5240_v56 = vrot.slane %v5238_v17, 5  ;;  %v8702_v18 = vld [vmem:[#allocation2 + $0x30] sm:$0xff]  }
 0x247   : > { %8379 = vmatpush3.bf16.msra.mxu1 %v8685_v7  ;;  %8334 = vmatprep.mubr.bf16.mxu1 %v7549_v45  ;;  %v5187_v1 = vor.u32 %v5186_v42, %v5182_v30  ;;  %v5537_v7 = vrot.slane %v10587_v46, 5  ;;  %v5183_v25 = vsel %vm8976_vm4, %v5178_v27, %v5182_v30  ;;  %v5204_v45 = vshll.u32 %v10672_v34, 16  ;;  %v5092_v27 = vld [vmem:[#allocation2 + $0x54] sm:$0xf]  ;;  %v10718_v19 = vld [vmem:[#allocation2 + $0x5c] sm:$0x1] }
 0x248   : > { %8380 = vmatprep.subr.bf16.mxu1 %v8687_v29  ;;  %8419 = vmatmul.mubr.bf16.vlgmr.msra.gmra.mxu0 %v7648_v14  ;;  %v5200_v53 = vrot.slane %v5198_v41, 5  ;;  %v8705_v41 = vld [vmem:[%s11383_s6 + $0x160] sm:$0xff]   ;;  %v5262_v13 = vshll.u32 %v10718_v19, 16 }
 0x249   : > { %8467 = vmatpush3.bf16.msra.mxu0 %v8694_v16  ;;  %v5188_v49 = vrot.slane %v5187_v1, 4  ;;  %8422 = vmatprep.mubr.bf16.mxu0 %v7649_v12  ;;  %v5206_v40 = vrot.slane %v5204_v45, 5  ;;  %v10689_v16 = vld [vmem:[#allocation2 + $0x4c] sm:$0xf]  ;;  %v8710_v12 = vld [vmem:[%s11383_s6 + $0x190] sm:$0xff]   ;;  %v8717_v46 = vld [vmem:[%s11383_s6 + $0x140] sm:$0xff]  }
 0x24a   : > { %8468 = vmatprep.subr.bf16.mxu0 %v8698_v63  ;;  %v5201_v38 = vor.u32 %v5200_v53, %v5197_v24  ;;  %v5228_v44 = vshll.u32 %v10689_v16, 16  ;;  %v5232_v20 = vshrl.u32 %v10689_v16, 16  ;;  %v5095_v53 = vld [vmem:[#allocation2 + $0x60] sm:$0xf] }
 0x24b   : > { %8381 = vmatpush3.bf16.msra.mxu1 %v8687_v29  ;;  %v5193_v35 = vsel %vm8976_vm4, %v5188_v49, %v5192_v11  ;;  %v5214_v29 = vshll.u32 %v10679_v59, 16  ;;  %v5211_v39 = vor.u32 %v5210_v32, %v5206_v40  ;;  %v10716_v49 = vld [vmem:[#allocation2 + $0x58] sm:$0xf]  ;;  %v5264_v32 = vrot.slane %v5262_v13, 5  ;;  %v5500_v13 = vld [vmem:[#allocation2 + $0xc] sm:$0xe] }
 0x24c   : > { %8382 = vmatprep.subr.bf16.mxu1 %v8691_v54  ;;  %v7650_v36 = vcombine.low %v5183_v25, %v5193_v35  ;;  %v5202_v10 = vrot.slane %v5201_v38, 4  ;;  %v5230_v62 = vrot.slane %v5228_v44, 5  ;;  %v5246_v25 = vshll.u32 %v5092_v27, 16  ;;  %v8712_v44 = vld [vmem:[%s11383_s6 + $0x188] sm:$0xff]  }
 0x24d   : > { %8469 = vmatpush3.bf16.msra.mxu0 %v8698_v63  ;;  %v5216_v14 = vrot.slane %v5214_v29, 5  ;;  %v5212_v30 = vrot.slane %v5211_v39, 4  ;;  %v5234_v63 = vrot.slane %v5232_v20, 4  ;;  %v5252_v6 = vshll.u32 %v10716_v49, 16 }
 0x24e   : > { %8335 = vmatmul.mubr.bf16.gmra.mxu1 %v7550_v5  ;;  %8470 = vmatprep.subr.bf16.mxu0 %v8700_v47  ;;  %v5207_v42 = vsel %vm8976_vm4, %v5202_v10, %v5206_v40  ;;  %v5256_v35 = vshrl.u32 %v10716_v49, 16 }
 0x24f   : > { %8383 = vmatpush3.bf16.msra.mxu1 %v8691_v54  ;;  %8386 = vmatprep.mubr.bf16.mxu1 %v8695_v23  ;;  %v5221_v54 = vrot.slane %v5219_v52, 4  ;;  %v5217_v51 = vsel %vm8976_vm4, %v5212_v30, %v5216_v14  ;;  %v5235_v23 = vor.u32 %v5234_v63, %v5230_v62  ;;  %v5254_v24 = vrot.slane %v5252_v6, 5  ;;  %v10730_v14 = vld [vmem:[#allocation2 + $0x64] sm:$0xf]  ;;  %v8708_v30 = vld [vmem:[#allocation2 + $0x48] sm:$0xff]   ;;  %v8709_v63 = vld [vmem:[%s11383_s6 + $0x158] sm:$0xff]  }
 0x250   : > { %8384 = vmatprep.subr.bf16.mxu1 %v8693_v37  ;;  %8423 = vmatmul.mubr.bf16.gmra.mxu0 %v7650_v36  ;;  %v7651_v1 = vcombine.low %v5207_v42, %v5217_v51  ;;  %v5258_v8 = vrot.slane %v5256_v35, 4  ;;  %v5270_v52 = vshll.u32 %v5095_v53, 16  ;;  %v5276_v28 = vshll.u32 %v10730_v14, 16  ;;  %v8720_v35 = vld [vmem:[%s11383_s6 + $0x238] sm:$0xff]  }
 0x251   : > { %8471 = vmatpush3.bf16.msra.mxu0 %v8700_v47  ;;  %v5225_v5 = vor.u32 %v5224_v57, %v5221_v54  ;;  %v5236_v47 = vrot.slane %v5235_v23, 4  ;;  %v5280_v20 = vshrl.u32 %v10730_v14, 16 }
 0x252   : > { %8472 = vmatprep.subr.bf16.mxu0 %v8704_v15  ;;  %8426 = vmatprep.mubr.bf16.mxu0 %v7651_v1  ;;  %v5259_v39 = vor.u32 %v5258_v8, %v5254_v24  ;;  %v5272_v57 = vrot.slane %v5270_v52, 5  ;;  %v5544_v8 = vrot.slane %v10606_v0, 5  ;;  %v5555_v0 = vrot.slane %v10645_v31, 5 }
 0x253   : > { %8385 = vmatpush3.bf16.msra.mxu1 %v8693_v37  ;;  %v8703_v37 = vld [vmem:[%s11383_s6 + $0x168] sm:$0xff]   ;;  %v5226_v11 = vrot.slane %v5225_v5, 4  ;;  %v5241_v29 = vsel %vm8976_vm4, %v5236_v47, %v5240_v56  ;;  %v5282_v42 = vrot.slane %v5280_v20, 4 }
 0x254   : > { %8434 = vmatprep.subr.bf16.mxu1 %v8697_v60 }
 0x255   : > { %8473 = vmatpush3.bf16.msra.mxu0 %v8704_v15  ;;  %v5231_v45 = vsel %vm8976_vm4, %v5226_v11, %v5230_v62  ;;  %v5248_v15 = vrot.slane %v5246_v25, 5  ;;  %v5278_v62 = vrot.slane %v5276_v28, 5  ;;  %v5541_v25 = vrot.slane %v10601_v21, 5 }
 0x256   : > { %8387 = vmatmul.mubr.bf16.vlgmr.msra.gmra.mxu1 %v8696_v61  ;;  %8474 = vmatprep.subr.bf16.mxu0 %v8706_v26  ;;  %v8707_v61 = vld [vmem:[#allocation2 + $0x3c] sm:$0xff]   ;;  %v7652_v40 = vcombine.low %v5231_v45, %v5241_v29  ;;  %v5501_v29 = vld [vmem:[#allocation2 + $0x18] sm:$0xe]  ;;  %v7663_v21 = vrot.slane %v5500_v13, 9 }
 0x257   : > { %8435 = vmatpush3.bf16.msra.mxu1 %v8697_v60  ;;  %8390 = vmatprep.mubr.bf16.mxu1 %v8701_v2  ;;  %v5243_v60 = vshrl.u32 %v5092_v27, 16  ;;  %v10732_v2 = vld [vmem:[#allocation2 + $0x68] sm:$0x1]  ;;  %v5283_v23 = vor.u32 %v5282_v42, %v5278_v62  ;;  %v8711_v27 = vld [vmem:[%s11383_s6 + $0x150] sm:$0xff]   ;;  %v5569_v42 = vrot.slane %v10689_v16, 5 }
 0x258   : > { %8436 = vmatprep.subr.bf16.mxu1 %v8699_v33  ;;  %8427 = vmatmul.mubr.bf16.gmra.mxu0 %v7652_v40  ;;  %v5286_v17 = vshll.u32 %v10732_v2, 16  ;;  %v5535_v40 = vsel %vm9130_vm7, %v7663_v21, %v5534_v58  ;;  %v8723_v58 = vld [vmem:[#allocation2 + $0x30] sm:$0xff]   ;;  %v5586_v13 = vrot.slane %v10732_v2, 5 }
 0x259   : > { %v5245_v36 = vrot.slane %v5243_v60, 4  ;;  %8475 = vmatpush3.bf16.msra.mxu0 %v8706_v26  ;;  %v5260_v26 = vrot.slane %v5259_v39, 4  ;;  %v5284_v47 = vrot.slane %v5283_v23, 4  ;;  %v5503_v39 = vld [vmem:[#allocation2 + $0x30] sm:$0xe] }
 0x25a   : > { %8476 = vmatprep.subr.bf16.mxu0 %v8710_v12  ;;  %v5288_v56 = vrot.slane %v5286_v17, 5  ;;  %v5558_v17 = vrot.slane %v10647_v9, 5  ;;  %v5505_v23 = vld [vmem:[#allocation2 + $0x48] sm:$0xe]  ;;  %v5506_v21 = vld [vmem:[#allocation2 + $0x54] sm:$0xe] }
 0x25b   : > { %8437 = vmatpush3.bf16.msra.mxu1 %v8699_v33  ;;  %v5249_v38 = vor.u32 %v5248_v15, %v5245_v36  ;;  %v5267_v33 = vshrl.u32 %v5095_v53, 16  ;;  %v5538_v36 = vsel %vm9130_vm7, %v10704_v48, %v5537_v7  ;;  %v5543_v15 = vrot.slane %v5541_v25, 4  ;;  %v8714_v53 = vld [vmem:[#allocation2 + $0x60] sm:$0xff]   ;;  %v8734_v2 = vld [vmem:[%s11383_s6 + $0x210] sm:$0xff]  }
 0x25c   : > { %8438 = vmatprep.subr.bf16.mxu1 %v8703_v37  ;;  %v5289_v6 = vsel %vm8976_vm4, %v5284_v47, %v5288_v56  ;;  %v7687_v7 = vcombine.low %v5535_v40, %v5538_v36  ;;  %v7664_v48 = vrot.slane %v5501_v29, 9  ;;  %v8727_v56 = vld [vmem:[%s11383_s6 + $0x1e8] sm:$0xff]   ;;  %v5572_v47 = vrot.slane %v10691_v43, 5  ;;  %v8730_v43 = vld [vmem:[%s11383_s6 + $0x1e0] sm:$0xff]   ;;  %v8731_v29 = vld [vmem:[#allocation2 + $0x54] sm:$0xff]  }
 0x25d   : > { %v5250_v10 = vrot.slane %v5249_v38, 4  ;;  %v5269_v54 = vrot.slane %v5267_v33, 4  ;;  %8477 = vmatpush3.bf16.msra.mxu0 %v8710_v12  ;;  %v8716_v12 = vld [vmem:[%s11383_s6 + $0x180] sm:$0xff]   ;;  %v5545_v28 = vsel %vm9130_vm7, %v5543_v15, %v5544_v8 }
 0x25e   : > { %8391 = vmatmul.mubr.bf16.gmra.mxu1 %v8702_v18  ;;  %8478 = vmatprep.subr.bf16.mxu0 %v8712_v44  ;;  %v8713_v18 = vld [vmem:[#allocation2 + $0x54] sm:$0xff]   ;;  %v5502_v33 = vld [vmem:[#allocation2 + $0x24] sm:$0xe]  ;;  %v5542_v52 = vsel %vm9130_vm7, %v7664_v48, %v5541_v25  ;;  %v5507_v36 = vld [vmem:[#allocation2 + $0x60] sm:$0xe] }
 0x25f   : > { %8439 = vmatpush3.bf16.msra.mxu1 %v8703_v37  ;;  %8394 = vmatprep.mubr.bf16.mxu1 %v8707_v61  ;;  %v5255_v5 = vsel %vm8976_vm4, %v5250_v10, %v5254_v24  ;;  %v5273_v51 = vor.u32 %v5272_v57, %v5269_v54  ;;  %v5265_v37 = vsel %vm8976_vm4, %v5260_v26, %v5264_v32  ;;  %v8715_v61 = vld [vmem:[%s11383_s6 + $0x148] sm:$0xff]   ;;  %v5548_v24 = vrot.slane %v10628_v50, 5  ;;  %v8724_v57 = vld [vmem:[%s11383_s6 + $0x1f0] sm:$0xff]   ;;  %v8735_v40 = vld [vmem:[#allocation2 + $0x60] sm:$0xff]  }
 0x260   : > { %8440 = vmatprep.subr.bf16.mxu1 %v8705_v41  ;;  %v7653_v1 = vcombine.low %v5255_v5, %v5265_v37  ;;  %v8719_v32 = vld [vmem:[#allocation2 + $0x24] sm:$0xff]   ;;  %v5551_v50 = vrot.slane %v10630_v55, 5  ;;  %v8722_v55 = vld [vmem:[%s11383_s6 + $0x230] sm:$0xff]   ;;  %v5562_v10 = vrot.slane %v10672_v34, 5  ;;  %v7688_v54 = vcombine.low %v5542_v52, %v5545_v28 }
 0x261   : > { %v5274_v11 = vrot.slane %v5273_v51, 4  ;;  %8479 = vmatpush3.bf16.msra.mxu0 %v8712_v44  ;;  %v5550_v38 = vrot.slane %v5548_v24, 4  ;;  %v7665_v44 = vrot.slane %v5502_v33, 9  ;;  %v7666_v26 = vrot.slane %v5503_v39, 9  ;;  %v8729_v5 = vld [vmem:[#allocation2 + $0x48] sm:$0xff]  }
 0x262   : > { %8430 = vmatprep.mubr.bf16.mxu0 %v7653_v1  ;;  %8480 = vmatprep.subr.bf16.mxu0 %v8716_v12  ;;  %v5565_v34 = vrot.slane %v10679_v59, 5  ;;  %v5504_v51 = vld [vmem:[#allocation2 + $0x3c] sm:$0xe]  ;;  %v5564_v37 = vrot.slane %v5562_v10, 4  ;;  %v5576_v1 = vrot.slane %v10716_v49, 5  ;;  %v7670_v15 = vrot.slane %v5507_v36, 9 }
 0x263   : > { %8441 = vmatpush3.bf16.msra.mxu1 %v8705_v41  ;;  %v5279_v60 = vsel %vm8976_vm4, %v5274_v11, %v5278_v62  ;;  %v8718_v41 = vld [vmem:[#allocation2 + $0x18] sm:$0xff]   ;;  %v5549_v20 = vsel %vm9130_vm7, %v7665_v44, %v5548_v24  ;;  %v5552_v31 = vsel %vm9130_vm7, %v5550_v38, %v5551_v50  ;;  %v5557_v62 = vrot.slane %v5555_v0, 4  ;;  %v8728_v11 = vld [vmem:[%s11383_s6 + $0x220] sm:$0xff]   ;;  %v6045_v28 = vld [vmem:[#allocation2 + $0x28] sm:$0xf] }
 0x264   : > { %8442 = vmatprep.subr.bf16.mxu1 %v8709_v63  ;;  %v7654_v45 = vcombine.low %v5279_v60, %v5289_v6  ;;  %v7689_v9 = vcombine.low %v5549_v20, %v5552_v31  ;;  %v5556_v59 = vsel %vm9130_vm7, %v7666_v26, %v5555_v0  ;;  %v8732_v49 = vld [vmem:[%s11383_s6 + $0x218] sm:$0xff]   ;;  %v5566_v25 = vsel %vm9130_vm7, %v5564_v37, %v5565_v34  ;;  %v6043_v50 = vld [vmem:[#allocation2 + $0x20] sm:$0x1]  ;;  %v6046_v20 = vld [vmem:[#allocation2 + $0x2c] sm:$0x1] }
 0x265   : > { %8481 = vmatpush3.bf16.msra.mxu0 %v8716_v12  ;;  %v5559_v16 = vsel %vm9130_vm7, %v5557_v62, %v5558_v17  ;;  %v5583_v12 = vrot.slane %v10730_v14, 5  ;;  %v5579_v6 = vrot.slane %v10718_v19, 5  ;;  %v7669_v19 = vrot.slane %v5506_v21, 9  ;;  %v6042_v38 = vld [vmem:[#allocation2 + $0x1c] sm:$0xf] }
 0x266   : > { %8395 = vmatmul.mubr.bf16.gmra.mxu1 %v8708_v30  ;;  %8431 = vmatmul.mubr.bf16.gmra.mxu0 %v7654_v45  ;;  %v8725_v30 = vld [vmem:[#allocation2 + $0x3c] sm:$0xff]   ;;  %v7690_v14 = vcombine.low %v5556_v59, %v5559_v16  ;;  %v5578_v45 = vrot.slane %v5576_v1, 4  ;;  %v6467_v33 = vld [vmem:[#allocation2 + $0x18] sm:$0xe]  ;;  %v6501_v0 = vrot.slane %v6042_v38, 5  ;;  %v6504_v52 = vrot.slane %v6043_v50, 5 }
 0x267   : > { %8443 = vmatpush3.bf16.msra.mxu1 %v8709_v63  ;;  %8398 = vmatprep.mubr.bf16.mxu1 %v8713_v18  ;;  %v8726_v63 = vld [vmem:[%s11383_s6 + $0x228] sm:$0xff]   ;;  %v7667_v18 = vrot.slane %v5504_v51, 9  ;;  %v7767_v39 = vrot.slane %v6467_v33, 9  ;;  %v6468_v31 = vld [vmem:[#allocation2 + $0x24] sm:$0xe]  ;;  %v6508_v17 = vrot.slane %v6045_v28, 5 }
 0x268   : > { %8444 = vmatprep.subr.bf16.mxu1 %v8711_v27  ;;  %8530 = vmatprep.subr.bf16.mxu0 %v8720_v35  ;;  %v5580_v8 = vsel %vm9130_vm7, %v5578_v45, %v5579_v6  ;;  %v6041_v62 = vld [vmem:[#allocation2 + $0x18] sm:$0xf]  ;;  %v8737_v51 = vld [vmem:[#allocation2 + $0x6c] sm:$0xff]   ;;  %v6103_v45 = vshrl.u32 %v6045_v28, 16  ;;  %v6109_v21 = vshll.u32 %v6046_v20, 16 }
 0x269   : > { %8482 = vmatprep.mubr.bf16.mxu0 %v8718_v41  ;;  %v5563_v60 = vsel %vm9130_vm7, %v7667_v18, %v5562_v10  ;;  %v7668_v41 = vrot.slane %v5505_v23, 9  ;;  %v6503_v10 = vrot.slane %v6501_v0, 4  ;;  %v6502_v26 = vsel %vm9130_vm7, %v7767_v39, %v6501_v0  ;;  %v8739_v6 = vld [vmem:[%s11383_s6 + $0x1c8] sm:$0xff]   ;;  %v10881_v36 = vld [vmem:[#allocation2 + $0x38] sm:$0x1] }
 0x26a   : > { %v6066_v34 = vshrl.u32 %v6041_v62, 16  ;;  %v6079_v18 = vshrl.u32 %v6042_v38, 16  ;;  %v6518_v0 = vrot.slane %v10881_v36, 5 }
 0x26b   : > { %8445 = vmatpush3.bf16.msra.mxu1 %v8711_v27  ;;  %v5571_v27 = vrot.slane %v5569_v42, 4  ;;  %v5570_v24 = vsel %vm9130_vm7, %v7668_v41, %v5569_v42  ;;  %v6069_v42 = vshll.u32 %v6041_v62, 16  ;;  %v6505_v37 = vsel %vm9130_vm7, %v6503_v10, %v6504_v52  ;;  %v10892_v52 = vld [vmem:[#allocation2 + $0x44] sm:$0x1] }
 0x26c   : > { %8446 = vmatprep.subr.bf16.mxu1 %v8715_v61  ;;  %v6068_v16 = vrot.slane %v6066_v34, 4  ;;  %v6099_v41 = vshll.u32 %v6045_v28, 16  ;;  %v6047_v28 = vld [vmem:[#allocation2 + $0x30] sm:$0xf]  ;;  %v6050_v34 = vld [vmem:[#allocation2 + $0x3c] sm:$0xf] }
 0x26e   : > { %8399 = vmatmul.mubr.bf16.gmra.mxu1 %v8714_v53  ;;  %8483 = vmatmul.mubr.bf16.vlgmr.msra.gmra.mxu0 %v8719_v32  ;;  %v5573_v53 = vsel %vm9130_vm7, %v5571_v27, %v5572_v47  ;;  %v8733_v32 = vld [vmem:[%s11383_s6 + $0x1d8] sm:$0xff]   ;;  %v6081_v47 = vrot.slane %v6079_v18, 4 }
 0x26f   : > { %8447 = vmatpush3.bf16.msra.mxu1 %v8715_v61  ;;  %8450 = vmatprep.mubr.bf16.mxu1 %v7687_v7  ;;  %v7691_v61 = vcombine.low %v5563_v60, %v5566_v25  ;;  %v10842_v7 = vsel %vm9130_vm7, %v7670_v15, %v5583_v12  ;;  %v10876_v25 = vld [vmem:[#allocation2 + $0x34] sm:$0xf] }
 0x270   : > { %8448 = vmatprep.subr.bf16.mxu1 %v8717_v46  ;;  %8531 = vmatpush3.bf16.msra.mxu0 %v8720_v35  ;;  %v5585_v35 = vrot.slane %v5583_v12, 4  ;;  %v8740_v12 = vld [vmem:[%s11383_s6 + $0x200] sm:$0xff]   ;;  %v6127_v18 = vshrl.u32 %v10876_v25, 16 }
 0x271   : > { %8486 = vmatprep.mubr.bf16.mxu0 %v8723_v58  ;;  %8532 = vmatprep.subr.bf16.mxu0 %v8722_v55  ;;  %v8738_v58 = vld [vmem:[%s11383_s6 + $0x208] sm:$0xff]  }
 0x272   : > { %v10846_v48 = vsel %vm9130_vm7, %v5585_v35, %v5586_v13  ;;  %v6469_v35 = vld [vmem:[#allocation2 + $0x30] sm:$0xe] }
 0x273   : > { %8449 = vmatpush3.bf16.msra.mxu1 %v8717_v46  ;;  %v5577_v46 = vsel %vm9130_vm7, %v7669_v19, %v5576_v1  ;;  %v7694_v44 = vcombine.low %v10842_v7, %v10846_v48  ;;  %v7791_v1 = vcombine.low %v6502_v26, %v6505_v37  ;;  %v6117_v26 = vshll.u32 %v6047_v28, 16 }
 0x274   : > { %8498 = vmatprep.subr.bf16.mxu1 %v8721_v4  ;;  %8533 = vmatpush3.bf16.msra.mxu0 %v8722_v55  ;;  %v7693_v55 = vcombine.low %v5577_v46, %v5580_v8  ;;  %v7769_v46 = vrot.slane %v6469_v35, 9 }
 0x275   : > { %8534 = vmatprep.subr.bf16.mxu0 %v8726_v63  ;;  %v6119_v37 = vrot.slane %v6117_v26, 5 }
 0x276   : > { %8451 = vmatmul.mubr.bf16.vlgmr.msra.gmra.mxu1 %v7688_v54  ;;  %8487 = vmatmul.mubr.bf16.gmra.mxu0 %v8725_v30  ;;  %v7768_v54 = vrot.slane %v6468_v31, 9  ;;  %v6075_v30 = vshll.u32 %v6042_v38, 16  ;;  %v10884_v38 = vld [vmem:[#allocation2 + $0x40] sm:$0xf] }
 0x277   : > { %8499 = vmatpush3.bf16.msra.mxu1 %v8721_v4  ;;  %8454 = vmatprep.mubr.bf16.mxu1 %v7689_v9  ;;  %v7692_v4 = vcombine.low %v5570_v24, %v5573_v53  ;;  %v6510_v9 = vrot.slane %v6508_v17, 4  ;;  %v6101_v24 = vrot.slane %v6099_v41, 5  ;;  %v6105_v53 = vrot.slane %v6103_v45, 4 }
 0x278   : > { %8500 = vmatprep.subr.bf16.mxu1 %v8724_v57  ;;  %8535 = vmatpush3.bf16.msra.mxu0 %v8726_v63  ;;  %v8736_v63 = vld [vmem:[%s11383_s6 + $0x1d0] sm:$0xff]   ;;  %v10865_v23 = vsel %vm9130_vm7, %v7768_v54, %v6508_v17 }
 0x279   : > { %8490 = vmatprep.mubr.bf16.mxu0 %v8729_v5  ;;  %8536 = vmatprep.subr.bf16.mxu0 %v8728_v11  ;;  %v6044_v5 = vld [vmem:[#allocation2 + $0x24] sm:$0xf]  ;;  %v6106_v33 = vor.u32 %v6105_v53, %v6101_v24 }
 0x27a   : > { %v6090_v60 = vshrl.u32 %v6044_v5, 16 }
 0x27b   : > { %8501 = vmatpush3.bf16.msra.mxu1 %v8724_v57  ;;  %v6511_v57 = vrot.slane %v6046_v20, 5  ;;  %v6107_v54 = vrot.slane %v6106_v33, 4 }
 0x27c   : > { %8502 = vmatprep.subr.bf16.mxu1 %v8727_v56  ;;  %8537 = vmatpush3.bf16.msra.mxu0 %v8728_v11  ;;  %v6071_v11 = vrot.slane %v6069_v42, 5 }
 0x27d   : > { %8538 = vmatprep.subr.bf16.mxu0 %v8732_v49  ;;  %v10869_v59 = vsel %vm9130_vm7, %v6510_v9, %v6511_v57  ;;  %v6522_v57 = vrot.slane %v10884_v38, 5 }
 0x27e   : > { %8455 = vmatmul.mubr.bf16.gmra.mxu1 %v7690_v14  ;;  %8491 = vmatmul.mubr.bf16.gmra.mxu0 %v8731_v29  ;;  %v7792_v27 = vcombine.low %v10865_v23, %v10869_v59  ;;  %v6072_v14 = vor.u32 %v6071_v11, %v6068_v16  ;;  %v6138_v11 = vshrl.u32 %v6050_v34, 16 }
 0x27f   : > { %8503 = vmatpush3.bf16.msra.mxu1 %v8727_v56  ;;  %8458 = vmatprep.mubr.bf16.mxu1 %v7691_v61  ;;  %v6077_v56 = vrot.slane %v6075_v30, 5  ;;  %v6092_v61 = vrot.slane %v6090_v60, 4  ;;  %v6525_v30 = vrot.slane %v10892_v52, 5  ;;  %v6524_v9 = vrot.slane %v6522_v57, 4 }
 0x280   : > { %8504 = vmatprep.subr.bf16.mxu1 %v8730_v43  ;;  %8539 = vmatpush3.bf16.msra.mxu0 %v8732_v49  ;;  %v6085_v49 = vshll.u32 %v6043_v50, 16  ;;  %v6073_v19 = vrot.slane %v6072_v14, 4  ;;  %v8741_v50 = vld [vmem:[%s11383_s6 + $0x1c0] sm:$0xff]   ;;  %v6129_v60 = vrot.slane %v6127_v18, 4  ;;  %v6147_v14 = vshll.u32 %v10884_v38, 16 }
 0x281   : > { %8494 = vmatprep.mubr.bf16.mxu0 %v8735_v40  ;;  %8540 = vmatprep.subr.bf16.mxu0 %v8734_v2  ;;  %v6082_v13 = vor.u32 %v6081_v47, %v6077_v56  ;;  %v6470_v40 = vld [vmem:[#allocation2 + $0x3c] sm:$0xe]  ;;  %v6526_v23 = vsel %vm9130_vm7, %v6524_v9, %v6525_v30  ;;  %v6471_v47 = vld [vmem:[#allocation2 + $0x48] sm:$0xe]  ;;  %v6140_v45 = vrot.slane %v6138_v11, 4 }
 0x282   : > { %v6087_v29 = vrot.slane %v6085_v49, 5  ;;  %v7770_v31 = vrot.slane %v6470_v40, 9 }
 0x283   : > { %8505 = vmatpush3.bf16.msra.mxu1 %v8730_v43  ;;  %v6093_v43 = vshll.u32 %v6044_v5, 16  ;;  %v6083_v8 = vrot.slane %v6082_v13, 4  ;;  %v10920_v13 = vld [vmem:[#allocation2 + $0x58] sm:$0xf] }
 0x284   : > { %8506 = vmatprep.subr.bf16.mxu1 %v8733_v32  ;;  %8541 = vmatpush3.bf16.msra.mxu0 %v8734_v2  ;;  %v6111_v2 = vrot.slane %v6109_v21, 5  ;;  %v6523_v5 = vsel %vm9130_vm7, %v7770_v31, %v6522_v57  ;;  %v6149_v21 = vrot.slane %v6147_v14, 5  ;;  %v6056_v57 = vld [vmem:[#allocation2 + $0x54] sm:$0xf]  ;;  %v6061_v14 = vld [vmem:[#allocation2 + $0x68] sm:$0x1] }
 0x285   : > { %8542 = vmatprep.subr.bf16.mxu0 %v8738_v58  ;;  %v6095_v15 = vrot.slane %v6093_v43, 5  ;;  %v7794_v59 = vcombine.low %v6523_v5, %v6526_v23  ;;  %v6055_v43 = vld [vmem:[#allocation2 + $0x50] sm:$0x1] }
 0x286   : > { %8459 = vmatmul.mubr.bf16.gmra.mxu1 %v7692_v4  ;;  %8495 = vmatmul.mubr.bf16.gmra.mxu0 %v8737_v51  ;;  %v6078_v4 = vsel %vm8976_vm4, %v6073_v19, %v6077_v56  ;;  %v6112_v48 = vsel %vm8976_vm4, %v6107_v54, %v6111_v2  ;;  %v6123_v56 = vshll.u32 %v10876_v25, 16  ;;  %v7771_v19 = vrot.slane %v6471_v47, 9  ;;  %v6058_v2 = vld [vmem:[#allocation2 + $0x5c] sm:$0x1] }
 0x287   : > { %8507 = vmatpush3.bf16.msra.mxu1 %v8733_v32  ;;  %8462 = vmatprep.mubr.bf16.mxu1 %v7693_v55  ;;  %v6515_v32 = vrot.slane %v10876_v25, 5  ;;  %v6088_v55 = vsel %vm8976_vm4, %v6083_v8, %v6087_v29  ;;  %v6151_v25 = vshrl.u32 %v10884_v38, 16  ;;  %v6472_v29 = vld [vmem:[#allocation2 + $0x54] sm:$0xe]  ;;  %v6181_v5 = vshll.u32 %v6055_v43, 16 }
 0x288   : > { %8508 = vmatprep.subr.bf16.mxu1 %v8736_v63  ;;  %8543 = vmatpush3.bf16.msra.mxu0 %v8738_v58  ;;  %v6096_v58 = vor.u32 %v6095_v15, %v6092_v61  ;;  %v7751_v17 = vcombine.low %v6078_v4, %v6088_v55  ;;  %v6125_v49 = vrot.slane %v6123_v56, 5  ;;  %v7808_v15 = vld [vmem:[%s11385_s8] ss:$0 sm:$0xff]  ;;  %v7772_v4 = vrot.slane %v6472_v29, 9 }
 0x289   : > { %8546 = vmatprep.mubr.bf16.mxu0 %v7791_v1  ;;  %8544 = vmatprep.subr.bf16.mxu0 %v8740_v12  ;;  %v6516_v39 = vsel %vm9130_vm7, %v7769_v46, %v6515_v32  ;;  %v6517_v20 = vrot.slane %v6515_v32, 4  ;;  %v6133_v1 = vshll.u32 %v10881_v36, 16  ;;  %v6157_v36 = vshll.u32 %v10892_v52, 16  ;;  %v6053_v46 = vld [vmem:[#allocation2 + $0x48] sm:$0xf] }
 0x28a   : > { %v6097_v10 = vrot.slane %v6096_v58, 4  ;;  %v6130_v61 = vor.u32 %v6129_v60, %v6125_v49  ;;  %v6153_v40 = vrot.slane %v6151_v25, 4  ;;  %6794 = vrot.lane.b32.xlu0 %v7808_v15, %s8784_s25  ;;  %v6536_v55 = vrot.slane %v10920_v13, 5  ;;  %v6474_v25 = vld [vmem:[#allocation2 + $0x6c] sm:$0xe] }
 0x28b   : > { %8509 = vmatpush3.bf16.msra.mxu1 %v8736_v63  ;;  %v6519_v62 = vsel %vm9130_vm7, %v6517_v20, %v6518_v0  ;;  %v6114_v63 = vshrl.u32 %v6047_v28, 16  ;;  %v6159_v38 = vrot.slane %v6157_v36, 5  ;;  %v6162_v20 = vshrl.u32 %v6053_v46, 16 }
 0x28c   : > { %8510 = vmatprep.subr.bf16.mxu1 %v8739_v6  ;;  %8545 = vmatpush3.bf16.msra.mxu0 %v8740_v12  ;;  %v6102_v7 = vsel %vm8976_vm4, %v6097_v10, %v6101_v24  ;;  %v6141_v12 = vshll.u32 %v6050_v34, 16  ;;  %v6131_v32 = vrot.slane %v6130_v61, 4  ;;  %v6154_v33 = vor.u32 %v6153_v40, %v6149_v21 }
 0x28d   : > { %v7752_v42 = vcombine.low %v6102_v7, %v6112_v48  ;;  %v6116_v51 = vrot.slane %v6114_v63, 4  ;;  %v6537_v30 = vsel %vm9130_vm7, %v7772_v4, %v6536_v55  ;;  %v6538_v63 = vrot.slane %v6536_v55, 4 }
 0x28e   : > { %8463 = vmatmul.mubr.bf16.gmra.mxu1 %v7694_v44  ;;  %v7793_v44 = vcombine.low %v6516_v39, %v6519_v62  ;;  %v6143_v35 = vrot.slane %v6141_v12, 5  ;;  %v6539_v39 = vrot.slane %v6058_v2, 5  ;;  %v6155_v10 = vrot.slane %v6154_v33, 4 }
 0x28f   : > { %8511 = vmatpush3.bf16.msra.mxu1 %v8739_v6  ;;  %8514 = vmatprep.mubr.bf16.mxu1 %v7751_v17  ;;  %v6120_v16 = vor.u32 %v6119_v37, %v6116_v51  ;;  %v6135_v6 = vrot.slane %v6133_v1, 5  ;;  %v6164_v26 = vrot.slane %v6162_v20, 4  ;;  %v6165_v48 = vshll.u32 %v6053_v46, 16  ;;  %v6060_v37 = vld [vmem:[#allocation2 + $0x64] sm:$0xf] }
 0x290   : > { %8512 = vmatprep.subr.bf16.mxu1 %v8741_v50  ;;  %8547 = vmatmul.mubr.bf16.vlgmr.msra.gmra.mxu0 %v7792_v27  ;;  %v10916_v27 = vld [vmem:[#allocation2 + $0x4c] sm:$0xf]  ;;  %v6144_v53 = vor.u32 %v6143_v35, %v6140_v45  ;;  %v6160_v7 = vsel %vm8976_vm4, %v6155_v10, %v6159_v38  ;;  %v6186_v51 = vshrl.u32 %v6056_v57, 16  ;;  %v6189_v12 = vshll.u32 %v6056_v57, 16 }
 0x291   : > { %8550 = vmatprep.mubr.bf16.mxu0 %v7793_v44  ;;  %v6121_v41 = vrot.slane %v6120_v16, 4  ;;  %v6529_v8 = vrot.slane %v10916_v27, 5  ;;  %v6136_v28 = vsel %vm8976_vm4, %v6131_v32, %v6135_v6  ;;  %v6171_v44 = vshll.u32 %v10916_v27, 16  ;;  %v6062_v10 = vld [vmem:[#allocation2 + $0x6c] sm:$0xf] }
 0x292   : > { %v6145_v58 = vrot.slane %v6144_v53, 4  ;;  %v6175_v9 = vshrl.u32 %v10916_v27, 16  ;;  %v6167_v56 = vrot.slane %v6165_v48, 5  ;;  %v6183_v16 = vrot.slane %v6181_v5, 5 }
 0x293   : > { %8513 = vmatpush3.bf16.msra.mxu1 %v8741_v50  ;;  %v6126_v24 = vsel %vm8976_vm4, %v6121_v41, %v6125_v49  ;;  %v6532_v50 = vrot.slane %v6055_v43, 5  ;;  %v6530_v0 = vsel %vm9130_vm7, %v7771_v19, %v6529_v8  ;;  %v6531_v52 = vrot.slane %v6529_v8, 4  ;;  %v6063_v19 = vld [vmem:[#allocation2 + $0x70] sm:$0xf]  ;;  %v6064_v8 = vld [vmem:[#allocation2 + $0x74] sm:$0x1] }
 0x294   : > { %v7753_v31 = vcombine.low %v6126_v24, %v6136_v28  ;;  %v6150_v17 = vsel %vm8976_vm4, %v6145_v58, %v6149_v21  ;;  %v6173_v18 = vrot.slane %v6171_v44, 5  ;;  %v6177_v1 = vrot.slane %v6175_v9, 4 }
 0x295   : > { %v6533_v54 = vsel %vm9130_vm7, %v6531_v52, %v6532_v50  ;;  %v7754_v34 = vcombine.low %v6150_v17, %v6160_v7  ;;  %v6188_v11 = vrot.slane %v6186_v51, 4  ;;  %v6195_v47 = vshll.u32 %v10920_v13, 16 }
 0x296   : > { %8515 = vmatmul.mubr.bf16.vlgmr.msra.gmra.mxu1 %v7752_v42  ;;  %v7795_v62 = vcombine.low %v6530_v0, %v6533_v54  ;;  %v6540_v42 = vsel %vm9130_vm7, %v6538_v63, %v6539_v39  ;;  %v6168_v27 = vor.u32 %v6167_v56, %v6164_v26  ;;  %v6178_v49 = vor.u32 %v6177_v1, %v6173_v18 }
 0x297   : > { %8518 = vmatprep.mubr.bf16.mxu1 %v7753_v31  ;;  %v7796_v23 = vcombine.low %v6537_v30, %v6540_v42  ;;  %v6199_v60 = vshrl.u32 %v10920_v13, 16  ;;  %v6205_v6 = vshll.u32 %v6058_v2, 16  ;;  %v6191_v43 = vrot.slane %v6189_v12, 5  ;;  %v6059_v13 = vld [vmem:[#allocation2 + $0x60] sm:$0xf] }
 0x298   : > { %8551 = vmatmul.mubr.bf16.gmra.mxu0 %v7794_v59  ;;  %v6473_v59 = vld [vmem:[#allocation2 + $0x60] sm:$0xe]  ;;  %v6197_v41 = vrot.slane %v6195_v47, 5  ;;  %v6543_v35 = vrot.slane %v6060_v37, 5  ;;  %v6169_v29 = vrot.slane %v6168_v27, 4  ;;  %v6179_v61 = vrot.slane %v6178_v49, 4 }
 0x299   : > { %8554 = vmatprep.mubr.bf16.mxu0 %v7795_v62  ;;  %v7773_v45 = vrot.slane %v6473_v59, 9  ;;  %v6201_v21 = vrot.slane %v6199_v60, 4  ;;  %v6207_v36 = vrot.slane %v6205_v6, 5  ;;  %v6192_v15 = vor.u32 %v6191_v43, %v6188_v11 }
 0x29a   : > { %v6545_v53 = vrot.slane %v6543_v35, 4  ;;  %v6546_v40 = vrot.slane %v6061_v14, 5  ;;  %v6174_v2 = vsel %vm8976_vm4, %v6169_v29, %v6173_v18  ;;  %v6184_v46 = vsel %vm8976_vm4, %v6179_v61, %v6183_v16 }
 0x29b   : > { %v6544_v24 = vsel %vm9130_vm7, %v7773_v45, %v6543_v35  ;;  %v6202_v32 = vor.u32 %v6201_v21, %v6197_v41  ;;  %v7774_v38 = vrot.slane %v6474_v25, 9  ;;  %v7755_v50 = vcombine.low %v6174_v2, %v6184_v46 }
 0x29c   : > { %v6193_v4 = vrot.slane %v6192_v15, 4  ;;  %v6547_v58 = vsel %vm9130_vm7, %v6545_v53, %v6546_v40  ;;  %v6550_v33 = vrot.slane %v6063_v19, 5  ;;  %v6553_v28 = vrot.slane %v6064_v8, 5 }
 0x29d   : > { %v6203_v0 = vrot.slane %v6202_v32, 4  ;;  %v7797_v52 = vcombine.low %v6544_v24, %v6547_v58  ;;  %v6210_v55 = vshrl.u32 %v6059_v13, 16  ;;  %v6213_v17 = vshll.u32 %v6059_v13, 16 }
 0x29e   : > { %8519 = vmatmul.mubr.bf16.gmra.mxu1 %v7754_v34  ;;  %v6198_v39 = vsel %vm8976_vm4, %v6193_v4, %v6197_v41  ;;  %v6551_v20 = vsel %vm9130_vm7, %v7774_v38, %v6550_v33  ;;  %v6552_v31 = vrot.slane %v6550_v33, 4  ;;  %v6219_v62 = vshll.u32 %v6060_v37, 16 }
 0x29f   : > { %8522 = vmatprep.mubr.bf16.mxu1 %v7755_v50  ;;  %v6208_v54 = vsel %vm8976_vm4, %v6203_v0, %v6207_v36  ;;  %v6212_v57 = vrot.slane %v6210_v55, 4  ;;  %v6223_v30 = vshrl.u32 %v6060_v37, 16  ;;  %v6215_v7 = vrot.slane %v6213_v17, 5 }
 0x2a0   : > { %8555 = vmatmul.mubr.bf16.gmra.mxu0 %v7796_v23  ;;  %v7756_v63 = vcombine.low %v6198_v39, %v6208_v54  ;;  %v6554_v26 = vsel %vm9130_vm7, %v6552_v31, %v6553_v28  ;;  %v6229_v48 = vshll.u32 %v6061_v14, 16  ;;  %v6221_v9 = vrot.slane %v6219_v62, 5 }
 0x2a1   : > { %8558 = vmatprep.mubr.bf16.mxu0 %v7797_v52  ;;  %v7798_v44 = vcombine.low %v6551_v20, %v6554_v26  ;;  %v6225_v34 = vrot.slane %v6223_v30, 4  ;;  %v6234_v42 = vshrl.u32 %v6062_v10, 16  ;;  %v6216_v5 = vor.u32 %v6215_v7, %v6212_v57 }
 0x2a2   : > { %v6231_v51 = vrot.slane %v6229_v48, 5  ;;  %v6237_v23 = vshll.u32 %v6062_v10, 16  ;;  %v6243_v56 = vshll.u32 %v6063_v19, 16  ;;  %v6247_v59 = vshrl.u32 %v6063_v19, 16 }
 0x2a3   : > { %v6226_v18 = vor.u32 %v6225_v34, %v6221_v9  ;;  %v6236_v1 = vrot.slane %v6234_v42, 4  ;;  %v6253_v37 = vshll.u32 %v6064_v8, 16  ;;  %v6217_v16 = vrot.slane %v6216_v5, 4 }
 0x2a4   : > { %v6239_v11 = vrot.slane %v6237_v23, 5  ;;  %v6245_v3 = vrot.slane %v6243_v56, 5  ;;  %v6249_v47 = vrot.slane %v6247_v59, 4 }
 0x2a5   : > { %v6227_v12 = vrot.slane %v6226_v18, 4  ;;  %v6222_v27 = vsel %vm8976_vm4, %v6217_v16, %v6221_v9  ;;  %v6255_v14 = vrot.slane %v6253_v37, 5 }
 0x2a6   : > { %8523 = vmatmul.mubr.bf16.gmra.mxu1 %v7756_v63  ;;  %v6240_v49 = vor.u32 %v6239_v11, %v6236_v1  ;;  %v6250_v6 = vor.u32 %v6249_v47, %v6245_v3 }
 0x2a7   : > { %v6232_v60 = vsel %vm8976_vm4, %v6227_v12, %v6231_v51 }
 0x2a8   : > { %8559 = vmatmul.mubr.bf16.gmra.mxu0 %v7798_v44  ;;  %v7757_v43 = vcombine.low %v6222_v27, %v6232_v60  ;;  %v6241_v41 = vrot.slane %v6240_v49, 4  ;;  %v6251_v45 = vrot.slane %v6250_v6, 4 }
 0x2aa   : > { %8526 = vmatprep.mubr.bf16.mxu1 %v7757_v43  ;;  %v6246_v35 = vsel %vm8976_vm4, %v6241_v41, %v6245_v3  ;;  %v6256_v25 = vsel %vm8976_vm4, %v6251_v45, %v6255_v14  ;;  %vm6987_vm4 = vcmask 31744  }
 0x2ab   : > { %v7758_v29 = vcombine.low %v6246_v35, %v6256_v25 }
 0x2ae   : > { %8527 = vmatmul.mubr.bf16.gmra.mxu1 %v7758_v29 }
 0x2d6   : > { %v8292_v61 = vpop.f32.mrf.mxu1 }
 0x2d8   : > { %v4285_v21 = vpop.f32.mrf.mxu1 }
 0x2da   : > { %v8293_v36 = vpop.f32.mrf.mxu1 }
 0x2dc   : > { %v4288_v19 = vpop.f32.mrf.mxu1 }
 0x2de   : > { %v8296_v15 = vpop.f32.mrf.mxu1 }
 0x2e0   : > { %v4301_v24 = vpop.f32.mrf.mxu1 }
 0x2e2   : > { %v8297_v53 = vpop.f32.mrf.mxu1 }
 0x2e4   : > { %v4304_v40 = vpop.f32.mrf.mxu1 }
 0x2e6   : > { %v8300_v8 = vpop.f32.mrf.mxu1 }
 0x2e8   : > { %v4317_v13 = vpop.f32.mrf.mxu1  ;;  %v8356_v46 = vpop.f32.mrf.mxu0 }
 0x2ea   : > { %v8301_v2 = vpop.f32.mrf.mxu1  ;;  %v4752_v38 = vpop.f32.mrf.mxu0 }
 0x2ec   : > { %v4320_v32 = vpop.f32.mrf.mxu1  ;;  %v8357_v4 = vpop.f32.mrf.mxu0 }
 0x2ee   : > { %v8304_v50 = vpop.f32.mrf.mxu1  ;;  %v4755_v58 = vpop.f32.mrf.mxu0 }
 0x2f0   : > { %v4333_v22 = vpop.f32.mrf.mxu1  ;;  %v8360_v0 = vpop.f32.mrf.mxu0 }
 0x2f2   : > { %v8305_v33 = vpop.f32.mrf.mxu1  ;;  %v4768_v28 = vpop.f32.mrf.mxu0 }
 0x2f4   : > { %v4336_v52 = vpop.f32.mrf.mxu1  ;;  %v8361_v39 = vpop.f32.mrf.mxu0 }
 0x2f6   : > { %v8324_v55 = vpop.f32.mrf.mxu1  ;;  %v4771_v17 = vpop.f32.mrf.mxu0 }
 0x2f7   : > { %v4487_v20 = vadd.f32 %v8324_v55, %v8292_v61 }
 0x2f8   : > { %v4478_v31 = vpop.f32.mrf.mxu1  ;;  %v8364_v62 = vpop.f32.mrf.mxu0 }
 0x2f9   : > { %v4479_v10 = vadd.f32 %v4478_v31, %v4285_v21  ;;  %v10972_v54 = vadd.f32 %v8356_v46, %v4487_v20 }
 0x2fa   : > { %v8325_v57 = vpop.f32.mrf.mxu1  ;;  %v4784_v7 = vpop.f32.mrf.mxu0 }
 0x2fb   : > { %v4490_v30 = vadd.f32 %v8325_v57, %v8293_v36  ;;  %v10974_v63 = vadd.f32 %v4752_v38, %v4479_v10 }
 0x2fc   : > { %v4481_v26 = vpop.f32.mrf.mxu1  ;;  %v8365_v34 = vpop.f32.mrf.mxu0 }
 0x2fd   : > { %v4482_v48 = vadd.f32 %v4481_v26, %v4288_v19  ;;  %v10976_v44 = vadd.f32 %v8357_v4, %v4490_v30 }
 0x2fe   : > { %v8328_v9 = vpop.f32.mrf.mxu1  ;;  %v4787_v23 = vpop.f32.mrf.mxu0 }
 0x2ff   : > { %v4503_v42 = vadd.f32 %v8328_v9, %v8296_v15  ;;  %v10978_v5 = vadd.f32 %v4755_v58, %v4482_v48 }
 0x300   : > { %v4494_v51 = vpop.f32.mrf.mxu1  ;;  %v8368_v59 = vpop.f32.mrf.mxu0 }
 0x301   : > { %v4495_v56 = vadd.f32 %v4494_v51, %v4301_v24  ;;  %v10980_v18 = vadd.f32 %v8360_v0, %v4503_v42 }
 0x302   : > { %v8329_v1 = vpop.f32.mrf.mxu1  ;;  %v4800_v3 = vpop.f32.mrf.mxu0 }
 0x303   : > { %v4506_v37 = vadd.f32 %v8329_v1, %v8297_v53  ;;  %v10982_v16 = vadd.f32 %v4768_v28, %v4495_v56 }
 0x304   : > { %v4497_v11 = vpop.f32.mrf.mxu1  ;;  %v8369_v49 = vpop.f32.mrf.mxu0 }
 0x305   : > { %v4498_v12 = vadd.f32 %v4497_v11, %v4304_v40  ;;  %v10984_v47 = vadd.f32 %v8361_v39, %v4506_v37 }
 0x306   : > { %v8332_v27 = vpop.f32.mrf.mxu1  ;;  %v4803_v43 = vpop.f32.mrf.mxu0 }
 0x307   : > { %v4519_v60 = vadd.f32 %v8332_v27, %v8300_v8  ;;  %v10986_v6 = vadd.f32 %v4771_v17, %v4498_v12 }
 0x308   : > { %v4510_v14 = vpop.f32.mrf.mxu1  ;;  %v10990_v29 = vpop.f32.mrf.mxu0 }
 0x309   : > { %v4511_v41 = vadd.f32 %v4510_v14, %v4317_v13  ;;  %v10988_v45 = vadd.f32 %v8364_v62, %v4519_v60 }
 0x30a   : > { %v8333_v35 = vpop.f32.mrf.mxu1  ;;  %v10992_v19 = vpop.f32.mrf.mxu0 }
 0x30b   : > { %v4522_v25 = vadd.f32 %v8333_v35, %v8301_v2  ;;  %v4823_v61 = vadd.f32 %v4784_v7, %v4511_v41 }
 0x30c   : > { %v4513_v21 = vpop.f32.mrf.mxu1  ;;  %v10996_v40 = vpop.f32.mrf.mxu0 }
 0x30d   : > { %v4514_v36 = vadd.f32 %v4513_v21, %v4320_v32  ;;  %v10994_v15 = vadd.f32 %v8365_v34, %v4522_v25 }
 0x30e   : > { %v8336_v24 = vpop.f32.mrf.mxu1  ;;  %v10998_v38 = vpop.f32.mrf.mxu0 }
 0x30f   : > { %v4535_v53 = vadd.f32 %v8336_v24, %v8304_v50  ;;  %v4824_v8 = vadd.f32 %v4787_v23, %v4514_v36 }
 0x310   : > { %v4526_v46 = vpop.f32.mrf.mxu1  ;;  %v11000_v0 = vpop.f32.mrf.mxu0 }
 0x311   : > { %v4527_v13 = vadd.f32 %v4526_v46, %v4333_v22  ;;  %v4829_v4 = vadd.f32 %v8368_v59, %v4535_v53 }
 0x312   : > { %v8337_v2 = vpop.f32.mrf.mxu1  ;;  %v11002_v39 = vpop.f32.mrf.mxu0 }
 0x313   : > { %v4538_v58 = vadd.f32 %v8337_v2, %v8305_v33  ;;  %v4827_v28 = vadd.f32 %v4800_v3, %v4527_v13 }
 0x314   : > { %v4529_v32 = vpop.f32.mrf.mxu1  ;;  %v11006_v50 = vpop.f32.mrf.mxu0 }
 0x315   : > { %v4530_v55 = vadd.f32 %v4529_v32, %v4336_v52  ;;  %v4830_v20 = vadd.f32 %v8369_v49, %v4538_v58 }
 0x316   : > { %v11004_v31 = vpop.f32.mrf.mxu1  ;;  %v11012_v57 = vpop.f32.mrf.mxu0 }
 0x317   : > { %v4828_v17 = vadd.f32 %v4803_v43, %v4530_v55 }
 0x318   : > { %v11008_v10 = vpop.f32.mrf.mxu1  ;;  %v11018_v30 = vpop.f32.mrf.mxu0 }
 0x31a   : > { %v11010_v22 = vpop.f32.mrf.mxu1  ;;  %v5453_v26 = vpop.f32.mrf.mxu0 }
 0x31c   : > { %v11014_v33 = vpop.f32.mrf.mxu1  ;;  %v11024_v48 = vpop.f32.mrf.mxu0 }
 0x31e   : > { %v11016_v62 = vpop.f32.mrf.mxu1  ;;  %v5456_v34 = vpop.f32.mrf.mxu0 }
 0x320   : > { %v11020_v52 = vpop.f32.mrf.mxu1 }
 0x322   : > { %v11022_v7 = vpop.f32.mrf.mxu1 }
 0x324   : > { %v11026_v9 = vpop.f32.mrf.mxu1 }
 0x326   : > { %v11028_v42 = vpop.f32.mrf.mxu1  ;;  %v8432_v56 = vpop.f32.mrf.mxu0 }
 0x328   : > { %v5027_v51 = vpop.f32.mrf.mxu1  ;;  %v5469_v59 = vpop.f32.mrf.mxu0 }
 0x329   : > { %v5066_v23 = vadd.f32 %v5027_v51, %v4823_v61 }
 0x32a   : > { %v11030_v1 = vpop.f32.mrf.mxu1  ;;  %v8433_v12 = vpop.f32.mrf.mxu0 }
 0x32b   : > { %v11032_v37 = vadd.f32 %v5453_v26, %v5066_v23 }
 0x32c   : > { %v5030_v11 = vpop.f32.mrf.mxu1  ;;  %v5472_v60 = vpop.f32.mrf.mxu0 }
 0x32d   : > { %v5067_v3 = vadd.f32 %v5030_v11, %v4824_v8 }
 0x32e   : > { %v8400_v27 = vpop.f32.mrf.mxu1  ;;  %v8484_v35 = vpop.f32.mrf.mxu0 }
 0x32f   : > { %v5072_v49 = vadd.f32 %v8400_v27, %v4829_v4  ;;  %v11034_v14 = vadd.f32 %v5456_v34, %v5067_v3 }
 0x330   : > { %v5043_v43 = vpop.f32.mrf.mxu1  ;;  %v5962_v36 = vpop.f32.mrf.mxu0 }
 0x331   : > { %v5070_v41 = vadd.f32 %v5043_v43, %v4827_v28  ;;  %v11036_v25 = vadd.f32 %v8432_v56, %v5072_v49 }
 0x332   : > { %v8401_v61 = vpop.f32.mrf.mxu1  ;;  %v8485_v13 = vpop.f32.mrf.mxu0 }
 0x333   : > { %11439 = vst [vmem:[#allocation8_spill] sm:$0xff] %v11036_v25  ;;  %v5073_v21 = vadd.f32 %v8401_v61, %v4830_v20  ;;  %v11038_v24 = vadd.f32 %v5469_v59, %v5070_v41  ;;  %v5060_v61 = vadd.f32 %v11004_v31, %v10972_v54  ;;  %v5059_v54 = vadd.f32 %v11014_v33, %v10978_v5 }
 0x334   : > { %v5046_v53 = vpop.f32.mrf.mxu1  ;;  %v11042_v4 = vpop.f32.mrf.mxu0 }
 0x335   : > { %11440 = vst [vmem:[#allocation9_spill] sm:$0xff] %v11038_v24  ;;  %v5071_v46 = vadd.f32 %v5046_v53, %v4828_v17  ;;  %v11040_v8 = vadd.f32 %v8433_v12, %v5073_v21  ;;  %v5061_v24 = vadd.f32 %v11010_v22, %v10976_v44  ;;  %v5064_v44 = vadd.f32 %v11016_v62, %v10980_v18 }
 0x336   : > { %v8452_v2 = vpop.f32.mrf.mxu1  ;;  %v11046_v28 = vpop.f32.mrf.mxu0  ;;  %v5065_v18 = vadd.f32 %v11022_v7, %v10984_v47 }
 0x337   : > { %11441 = vst [vmem:[#allocation10_spill] sm:$0xff] %v11040_v8  ;;  %v11044_v58 = vadd.f32 %v5472_v60, %v5071_v46  ;;  %v5058_v46 = vadd.f32 %v11008_v10, %v10974_v63 }
 0x338   : > { %v5719_v32 = vpop.f32.mrf.mxu1  ;;  %v11048_v26 = vpop.f32.mrf.mxu0 }
 0x339   : > { %11442 = vst [vmem:[#allocation11_spill] sm:$0xff] %v11044_v58 }
 0x33a   : > { %v8453_v55 = vpop.f32.mrf.mxu1  ;;  %v11050_v34 = vpop.f32.mrf.mxu0 }
 0x33c   : > { %v5722_v20 = vpop.f32.mrf.mxu1  ;;  %v11052_v23 = vpop.f32.mrf.mxu0 }
 0x33e   : > { %v8456_v51 = vpop.f32.mrf.mxu1  ;;  %v11054_v56 = vpop.f32.mrf.mxu0 }
 0x340   : > { %v5735_v17 = vpop.f32.mrf.mxu1  ;;  %v11058_v11 = vpop.f32.mrf.mxu0 }
 0x342   : > { %v11056_v59 = vpop.f32.mrf.mxu1  ;;  %v11062_v12 = vpop.f32.mrf.mxu0 }
 0x343   : > { %11443 = vst [vmem:[#allocation12_spill] sm:$0xff] %v11062_v12 }
 0x344   : > { %v11060_v3 = vpop.f32.mrf.mxu1  ;;  %v11066_v49 = vpop.f32.mrf.mxu0 }
 0x345   : > { %11444 = vst [vmem:[#allocation13_spill] sm:$0xff] %v11066_v49 }
 0x346   : > { %v11064_v27 = vpop.f32.mrf.mxu1  ;;  %v11070_v43 = vpop.f32.mrf.mxu0 }
 0x347   : > { %11445 = vst [vmem:[#allocation14_spill] sm:$0xff] %v11070_v43  ;;  %v5486_v43 = vadd.f32 %v10990_v29, %v5060_v61  ;;  %v5485_v61 = vadd.f32 %v10998_v38, %v5059_v54 }
 0x348   : > { %v11068_v60 = vpop.f32.mrf.mxu1  ;;  %v11076_v21 = vpop.f32.mrf.mxu0 }
 0x349   : > { %11446 = vst [vmem:[#allocation15_spill] sm:$0xff] %v11076_v21  ;;  %v5784_v31 = vadd.f32 %v8452_v2, %v5486_v43  ;;  %v5484_v21 = vadd.f32 %v10992_v19, %v5058_v46  ;;  %v5062_v19 = vadd.f32 %v11020_v52, %v10982_v16  ;;  %v5783_v2 = vadd.f32 %v5722_v20, %v5485_v61  ;;  %v11107_v46 = vpop.permute.xlu0 %6794 }
 0x34a   : > { %v11072_v41 = vpop.f32.mrf.mxu1  ;;  %v11082_v58 = vpop.f32.mrf.mxu0  ;;  %v5063_v16 = vadd.f32 %v11026_v9, %v10986_v6 }
 0x34b   : > { %11447 = vst [vmem:[#allocation16_spill] sm:$0xff] %v11082_v58  ;;  %v5782_v58 = vadd.f32 %v5719_v32, %v5484_v21 }
 0x34c   : > { %v11078_v53 = vpop.f32.mrf.mxu1  ;;  %v11089_v25 = vpop.f32.mrf.mxu0 }
 0x34d   : > { %11449 = vst [vmem:[#allocation18_spill] sm:$0xff] %v11089_v25  ;;  %v6027_v25 = vadd.f32 %v8484_v35, %v5784_v31  ;;  %v6025_v32 = vadd.f32 %v5962_v36, %v5782_v58 }
 0x34e   : > { %v11084_v8 = vpop.f32.mrf.mxu1 }
 0x34f   : > { %11448 = vst [vmem:[#allocation17_spill] sm:$0xff] %v11084_v8  ;;  %v5487_v8 = vadd.f32 %v10996_v40, %v5061_v24  ;;  %v5490_v40 = vadd.f32 %v11000_v0, %v5064_v44 }
 0x350   : > { %v11091_v49 = vpop.f32.mrf.mxu1  ;;  %v8548_v63 = vpop.f32.mrf.mxu0 }
 0x351   : > { %v5785_v22 = vadd.f32 %v8453_v55, %v5487_v8  ;;  %v5788_v52 = vadd.f32 %v8456_v51, %v5490_v40  ;;  %v6026_v55 = vadd.f32 %v11042_v4, %v5783_v2  ;;  %v5489_v51 = vadd.f32 %v11012_v57, %v5063_v16 }
 0x352   : > { %v11096_v10 = vpop.f32.mrf.mxu1  ;;  %v6686_v12 = vpop.f32.mrf.mxu0 }
 0x353   : > { %v6028_v35 = vadd.f32 %v8485_v13, %v5785_v22  ;;  %v5491_v13 = vadd.f32 %v11006_v50, %v5065_v18  ;;  %v5068_v50 = vadd.f32 %v11028_v42, %v10988_v45  ;;  %v5787_v61 = vadd.f32 %v11060_v3, %v5489_v51 }
 0x354   : > { %v11101_v29 = vpop.f32.mrf.mxu1  ;;  %v8549_v5 = vpop.f32.mrf.mxu0  ;;  %v5069_v45 = vadd.f32 %v11030_v1, %v10994_v15  ;;  %v5790_v1 = vadd.f32 %v11068_v60, %v11032_v37  ;;  %v5791_v37 = vadd.f32 %v11078_v53, %v11034_v14  ;;  %v11451_v14 = vld [vmem:[#allocation13_spill] sm:$0xff] }
 0x355   : > { %v5789_v4 = vadd.f32 %v11056_v59, %v5491_v13  ;;  %v5494_v42 = vadd.f32 %v11018_v30, %v5068_v50 }
 0x356   : > { %v8516_v33 = vpop.f32.mrf.mxu1  ;;  %v6689_v21 = vpop.f32.mrf.mxu0  ;;  %v5495_v15 = vadd.f32 %v11024_v48, %v5069_v45  ;;  %v6034_v53 = vadd.f32 %v11451_v14, %v5791_v37  ;;  %v11453_v51 = vld [vmem:[#allocation17_spill] sm:$0xff]  ;;  %v6816_v14 = vld [vmem:[%s8907_s14 + $0x18] sm:$0xff] }
 0x357   : > { %v6453_v43 = vadd.f32 %v8516_v33, %v6027_v25  ;;  %v5488_v25 = vadd.f32 %v11002_v39, %v5062_v19  ;;  %v6032_v2 = vadd.f32 %v11050_v34, %v5789_v4  ;;  %v11452_v4 = vld [vmem:[#allocation8_spill] sm:$0xff] }
 0x358   : > { %v6388_v24 = vpop.f32.mrf.mxu1  ;;  %v8552_v8 = vpop.f32.mrf.mxu0 }
 0x359   : > { %v11111_v62 = vadd.f32 %v8548_v63, %v6453_v43  ;;  %v6451_v38 = vadd.f32 %v6388_v24, %v6025_v32  ;;  %v5786_v7 = vadd.f32 %v5735_v17, %v5488_v25  ;;  %v6031_v17 = vadd.f32 %v11046_v28, %v5788_v52 }
 0x35a   : > { %v8517_v36 = vpop.f32.mrf.mxu1  ;;  %v6702_v20 = vpop.f32.mrf.mxu0  ;;  %v5792_v24 = vadd.f32 %v11064_v27, %v5494_v42  ;;  %v5793_v27 = vadd.f32 %v11072_v41, %v5495_v15  ;;  %v6033_v25 = vadd.f32 %v11058_v11, %v5790_v1 }
 0x35b   : > { %v11116_v58 = vadd.f32 %v6686_v12, %v6451_v38  ;;  %v6454_v0 = vadd.f32 %v8517_v36, %v6028_v35  ;;  %v6799_v47 = vadd.f32 %v11107_v46, %v11111_v62  ;;  %v6029_v44 = vadd.f32 %v11048_v26, %v5786_v7 }
 0x35c   : > { %v6391_v54 = vpop.f32.mrf.mxu1  ;;  %v8553_v39 = vpop.f32.mrf.mxu0  ;;  %v6035_v16 = vadd.f32 %v11054_v56, %v5792_v24  ;;  %v11450_v56 = vld [vmem:[#allocation12_spill] sm:$0xff] }
 0x35d   : > { %v11122_v31 = vadd.f32 %v8549_v5, %v6454_v0  ;;  %v6452_v6 = vadd.f32 %v6391_v54, %v6026_v55  ;;  %6927 = vrot.lane.b32.xlu1 %v6799_v47, %s8785_s27  ;;  %v6797_v9 = vadd.f32 %v11107_v46, %v11116_v58 }
 0x35e   : > { %v8520_v63 = vpop.f32.mrf.mxu1  ;;  %v6705_v22 = vpop.f32.mrf.mxu0 }
 0x35f   : > { %v11129_v12 = vadd.f32 %v6689_v21, %v6452_v6  ;;  %6923 = vrot.lane.b32.xlu0 %v6797_v9, %s8785_s27  ;;  %v6457_v5 = vadd.f32 %v8520_v63, %v6031_v17  ;;  %v6800_v57 = vadd.f32 %v11107_v46, %v11122_v31  ;;  %v6030_v21 = vadd.f32 %v11052_v23, %v5787_v61  ;;  %v11454_v63 = vld [vmem:[#allocation9_spill] sm:$0xff] }
 0x360   : > { %v6404_v19 = vpop.f32.mrf.mxu1  ;;  %v8556_v3 = vpop.f32.mrf.mxu0  ;;  %v5796_v17 = vadd.f32 %v11453_v51, %v11452_v4 }
 0x361   : > { %v6798_v59 = vadd.f32 %v11107_v46, %v11129_v12  ;;  %v11141_v28 = vadd.f32 %v8552_v8, %v6457_v5  ;;  %v6455_v33 = vadd.f32 %v6404_v19, %v6029_v44  ;;  %v5794_v44 = vadd.f32 %v11091_v49, %v11454_v63  ;;  %v11457_v49 = vld [vmem:[#allocation11_spill] sm:$0xff] }
 0x362   : > { %v8521_v26 = vpop.f32.mrf.mxu1  ;;  %v6718_v30 = vpop.f32.mrf.mxu0  ;;  %v5795_v42 = vadd.f32 %v11101_v29, %v11457_v49  ;;  %v6820_v49 = vld [vmem:[%s8907_s14 + $0x38] sm:$0xff] }
 0x363   : > { %6925 = vrot.lane.b32.xlu1 %v6798_v59, %s8785_s27  ;;  %6929 = vrot.lane.b32.xlu0 %v6800_v57, %s8785_s27  ;;  %v11149_v43 = vadd.f32 %v6702_v20, %v6455_v33  ;;  %v6458_v32 = vadd.f32 %v8521_v26, %v6032_v2  ;;  %v6803_v40 = vadd.f32 %v11107_v46, %v11141_v28  ;;  %v11455_v57 = vld [vmem:[#allocation14_spill] sm:$0xff]  ;;  %v11458_v26 = vld [vmem:[#allocation15_spill] sm:$0xff] }
 0x364   : > { %v6407_v34 = vpop.f32.mrf.mxu1  ;;  %v8557_v52 = vpop.f32.mrf.mxu0  ;;  %v6036_v20 = vadd.f32 %v11450_v56, %v5793_v27  ;;  %v6039_v19 = vadd.f32 %v11455_v57, %v5796_v17  ;;  %v11456_v2 = vld [vmem:[#allocation10_spill] sm:$0xff]  ;;  %v6815_v56 = vld [vmem:[%s8907_s14 + $0x10] sm:$0xff] }
 0x365   : > { %v11155_v18 = vadd.f32 %v8553_v39, %v6458_v32  ;;  %v6456_v38 = vadd.f32 %v6407_v34, %v6030_v21  ;;  %v6801_v8 = vadd.f32 %v11107_v46, %v11149_v43  ;;  %v5797_v45 = vadd.f32 %v11096_v10, %v11456_v2  ;;  %v11460_v10 = vld [vmem:[#allocation18_spill] sm:$0xff] }
 0x366   : > { %v8524_v48 = vpop.f32.mrf.mxu1  ;;  %v6721_v47 = vpop.f32.mrf.mxu0 }
 0x367   : > { %6935 = vrot.lane.b32.xlu1 %v6803_v40, %s8785_s27  ;;  %v11161_v35 = vadd.f32 %v6705_v22, %v6456_v38  ;;  %v6804_v23 = vadd.f32 %v11107_v46, %v11155_v18  ;;  %v6461_v60 = vadd.f32 %v8524_v48, %v6035_v16 }
 0x368   : > { %v6420_v0 = vpop.f32.mrf.mxu1  ;;  %v8560_v50 = vpop.f32.mrf.mxu0 }
 0x369   : > { %6937 = vrot.lane.b32.xlu0 %v6804_v23, %s8785_s27  ;;  %v6802_v36 = vadd.f32 %v11107_v46, %v11161_v35  ;;  %v11176_v55 = vadd.f32 %v8556_v3, %v6461_v60  ;;  %v6459_v41 = vadd.f32 %v6420_v0, %v6033_v25  ;;  %v6037_v3 = vadd.f32 %v11458_v26, %v5794_v44  ;;  %v6819_v44 = vld [vmem:[%s8907_s14 + $0x30] sm:$0xff] }
 0x36a   : > { %v8525_v7 = vpop.f32.mrf.mxu1  ;;  %v6734_v59 = vpop.f32.mrf.mxu0  ;;  %v6038_v23 = vadd.f32 %v11460_v10, %v5795_v42  ;;  %v6817_v42 = vld [vmem:[%s8907_s14 + $0x20] sm:$0xff] }
 0x36b   : > { %6931 = vrot.lane.b32.xlu1 %v6801_v8, %s8785_s27  ;;  %v11180_v54 = vadd.f32 %v6718_v30, %v6459_v41  ;;  %v6462_v13 = vadd.f32 %v8525_v7, %v6036_v20  ;;  %v6807_v11 = vadd.f32 %v11107_v46, %v11176_v55  ;;  %v11459_v30 = vld [vmem:[#allocation16_spill] sm:$0xff]  ;;  %v11234_v41 = vld [vmem:[%s11384_s7] ss:$0 sm:$0xff] }
 0x36c   : > { %v6423_v6 = vpop.f32.mrf.mxu1  ;;  %v8561_v24 = vpop.f32.mrf.mxu0  ;;  %v6040_v1 = vadd.f32 %v11459_v30, %v5797_v45  ;;  %v11242_v20 = vld [vmem:[%s11461_s17] ss:$0 sm:$0xff]  ;;  %v6774_v7 = vadd.f32 %v11234_v41, %v11111_v62  ;;  %v6775_v51 = vadd.f32 %v11234_v41, %v11122_v31 }
 0x36d   : > { %6933 = vrot.lane.b32.xlu0 %v6802_v36, %s8785_s27  ;;  %v11185_v39 = vadd.f32 %v8557_v52, %v6462_v13  ;;  %v6460_v9 = vadd.f32 %v6423_v6, %v6034_v53  ;;  %v6805_v5 = vadd.f32 %v11107_v46, %v11180_v54  ;;  %v11253_v13 = vld [vmem:[%s427_s20] ss:$0 sm:$0xff]  ;;  %v6772_v53 = vadd.f32 %v11234_v41, %v11116_v58  ;;  %v6814_v6 = vld [vmem:[%s8907_s14 + $0x8] sm:$0xff] }
 0x36e   : > { %v8528_v33 = vpop.f32.mrf.mxu1  ;;  %v6737_v52 = vpop.f32.mrf.mxu0  ;;  %v6877_v4 = vadd.f32 1.0, %v6774_v7  ;;  %v6839_v62 = vsub.f32 %v6816_v14, %v11242_v20  ;;  %v6837_v17 = vsub.f32 %v6814_v6, %v11242_v20  ;;  %v6878_v31 = vadd.f32 1.0, %v6775_v51  ;;  %v6824_v6 = vld [vmem:[%s8907_s14 + $0x58] sm:$0xff] }
 0x36f   : > { %6943 = vrot.lane.b32.xlu1 %v6807_v11, %s8785_s27  ;;  %v11192_v22 = vadd.f32 %v6721_v47, %v6460_v9  ;;  %v6808_v61 = vadd.f32 %v11107_v46, %v11185_v39  ;;  %v6465_v40 = vadd.f32 %v8528_v33, %v6039_v19  ;;  %v6813_v47 = vld [vmem:[%s8907_s14] sm:$0xff]  ;;  %v6875_v63 = vadd.f32 1.0, %v6772_v53 }
 0x370   : > { %v6436_v21 = vpop.f32.mrf.mxu1  ;;  %v6836_v11 = vsub.f32 %v6813_v47, %v11242_v20  ;;  %v6860_v57 = vmul.f32 %v11253_v13, %v6837_v17  ;;  %v6842_v19 = vsub.f32 %v6819_v44, %v11242_v20  ;;  %v6782_v14 = vadd.f32 %v11234_v41, %v11176_v55 }
 0x371   : > { %6945 = vrot.lane.b32.xlu0 %v6808_v61, %s8785_s27  ;;  %v6806_v32 = vadd.f32 %v11107_v46, %v11192_v22  ;;  %v6463_v34 = vadd.f32 %v6436_v21, %v6037_v3  ;;  %v11213_v29 = vadd.f32 %v8560_v50, %v6465_v40  ;;  %v6773_v50 = vadd.f32 %v11234_v41, %v11129_v12 }
 0x372   : > { %v8529_v38 = vpop.f32.mrf.mxu1  ;;  %v6859_v58 = vmul.f32 %v11253_v13, %v6836_v11  ;;  %v6778_v12 = vadd.f32 %v11234_v41, %v11141_v28  ;;  %v6865_v21 = vmul.f32 %v11253_v13, %v6842_v19  ;;  %v6843_v40 = vsub.f32 %v6820_v49, %v11242_v20 }
 0x373   : > { %6939 = vrot.lane.b32.xlu1 %v6805_v5, %s8785_s27  ;;  %v11209_v15 = vadd.f32 %v6734_v59, %v6463_v34  ;;  %v6466_v27 = vadd.f32 %v8529_v38, %v6040_v1  ;;  %v6811_v25 = vadd.f32 %v11107_v46, %v11213_v29  ;;  %v6862_v5 = vmul.f32 %v11253_v13, %v6839_v62  ;;  %v6818_v1 = vld [vmem:[%s8907_s14 + $0x28] sm:$0xff] }
 0x374   : > { %v6439_v8 = vpop.f32.mrf.mxu1  ;;  %v6891_v2 = vmul.f32 %v6875_v63, %v6859_v58  ;;  %v6876_v45 = vadd.f32 1.0, %v6773_v50  ;;  %v6840_v34 = vsub.f32 %v6817_v42, %v11242_v20  ;;  %v6776_v28 = vadd.f32 %v11234_v41, %v11149_v43 }
 0x375   : > { %6941 = vrot.lane.b32.xlu0 %v6806_v32, %s8785_s27  ;;  %v6464_v16 = vadd.f32 %v6439_v8, %v6038_v23  ;;  %v6809_v48 = vadd.f32 %v11107_v46, %v11209_v15  ;;  %v11220_v60 = vadd.f32 %v8561_v24, %v6466_v27  ;;  %v6894_v32 = vmul.f32 %v6878_v31, %v6862_v5 }
 0x376   : > { %v6779_v24 = vadd.f32 %v11234_v41, %v11155_v18  ;;  %v6892_v38 = vmul.f32 %v6876_v45, %v6860_v57  ;;  %v6881_v30 = vadd.f32 1.0, %v6778_v12  ;;  %v6841_v43 = vsub.f32 %v6818_v1, %v11242_v20  ;;  %v6827_v1 = vld [vmem:[%s8907_s14 + $0x70] sm:$0xff] }
 0x377   : > { %v11217_v37 = vadd.f32 %v6737_v52, %v6464_v16  ;;  %6947 = vrot.lane.b32.xlu1 %v6809_v48, %s8785_s27  ;;  %v6812_v0 = vadd.f32 %v11107_v46, %v11220_v60  ;;  %v6866_v16 = vmul.f32 %v11253_v13, %v6843_v40  ;;  %v6863_v48 = vmul.f32 %v11253_v13, %v6840_v34 }
 0x378   : > { %v6777_v18 = vadd.f32 %v11234_v41, %v11161_v35  ;;  %v6897_v52 = vmul.f32 %v6881_v30, %v6865_v21  ;;  %v6864_v7 = vmul.f32 %v11253_v13, %v6841_v43  ;;  %v6847_v58 = vsub.f32 %v6824_v6, %v11242_v20 }
 0x379   : > { %v6810_v36 = vadd.f32 %v11107_v46, %v11217_v37  ;;  %v6838_v46 = vsub.f32 %v6815_v56, %v11242_v20  ;;  %v6780_v63 = vadd.f32 %v11234_v41, %v11180_v54  ;;  %v6783_v44 = vadd.f32 %v11234_v41, %v11185_v39 }
 0x37a   : > { %v6880_v11 = vadd.f32 1.0, %v6777_v18  ;;  %v6885_v5 = vadd.f32 1.0, %v6782_v14  ;;  %v6870_v19 = vmul.f32 %v11253_v13, %v6847_v58  ;;  %v6781_v39 = vadd.f32 %v11234_v41, %v11192_v22 }
 0x37b   : > { %6951 = vrot.lane.b32.xlu1 %v6811_v25, %s8785_s27  ;;  %6949 = vrot.lane.b32.xlu0 %v6810_v36, %s8785_s27  ;;  %v6861_v9 = vmul.f32 %v11253_v13, %v6838_v46  ;;  %v6882_v25 = vadd.f32 1.0, %v6779_v24  ;;  %v6879_v36 = vadd.f32 1.0, %v6776_v28  ;;  %v6883_v45 = vadd.f32 1.0, %v6780_v63 }
 0x37c   : > { %v6884_v40 = vadd.f32 1.0, %v6781_v39  ;;  %v6784_v24 = vadd.f32 %v11234_v41, %v11209_v15  ;;  %v6786_v15 = vadd.f32 %v11234_v41, %v11213_v29  ;;  %v6785_v43 = vadd.f32 %v11234_v41, %v11217_v37 }
 0x37d   : > { %v6893_v61 = vmul.f32 %v6877_v4, %v6861_v9  ;;  %v6898_v35 = vmul.f32 %v6882_v25, %v6866_v16  ;;  %v6895_v53 = vmul.f32 %v6879_v36, %v6863_v48  ;;  %v6821_v9 = vld [vmem:[%s8907_s14 + $0x40] sm:$0xff]  ;;  %v6850_v16 = vsub.f32 %v6827_v1, %v11242_v20  ;;  %v6828_v25 = vld [vmem:[%s8907_s14 + $0x78] sm:$0xff] }
 0x37e   : > { %v6844_v55 = vsub.f32 %v6821_v9, %v11242_v20 }
 0x37f   : > { %6953 = vrot.lane.b32.xlu0 %v6812_v0, %s8785_s27  ;;  %v6823_v0 = vld [vmem:[%s8907_s14 + $0x50] sm:$0xff]  ;;  %v6873_v36 = vmul.f32 %v11253_v13, %v6850_v16 }
 0x380   : > { %v6846_v46 = vsub.f32 %v6823_v0, %v11242_v20  ;;  %v6867_v12 = vmul.f32 %v11253_v13, %v6844_v55 }
 0x382   : > { %v6869_v50 = vmul.f32 %v11253_v13, %v6846_v46  ;;  %v6888_v46 = vadd.f32 1.0, %v6785_v43 }
 0x3cf   : > { %v6928_v59 = vpop.permute.xlu1 %6927 }
 0x3d0   : > { %v6973_v33 = vadd.f32 %v6928_v59, %v6893_v61  ;;  %v6896_v61 = vmul.f32 %v6880_v11, %v6864_v7  ;;  %v6822_v59 = vld [vmem:[%s8907_s14 + $0x48] sm:$0xff]  ;;  %v6889_v7 = vadd.f32 1.0, %v6786_v15 }
 0x3d1   : > { %v6924_v26 = vpop.permute.xlu0 %6923  ;;  %v6845_v54 = vsub.f32 %v6822_v59, %v11242_v20 }
 0x3d2   : > { %6990 = vst.msk [vmem:[%s8912_s29 + $0x10] sm:$0xff] %vm6987_vm4, %v6973_v33  ;;  %v6971_v3 = vadd.f32 %v6924_v26, %v6891_v2  ;;  %v6901_v33 = vmul.f32 %v6885_v5, %v6869_v50  ;;  %v6886_v2 = vadd.f32 1.0, %v6783_v44  ;;  %v6825_v26 = vld [vmem:[%s8907_s14 + $0x60] sm:$0xff] }
 0x3d3   : > { %v6868_v21 = vmul.f32 %v11253_v13, %v6845_v54  ;;  %v6848_v28 = vsub.f32 %v6825_v26, %v11242_v20 }
 0x3d4   : > { %6988 = vst.msk [vmem:[%s8912_s29] sm:$0xff] %vm6987_vm4, %v6971_v3  ;;  %v6902_v3 = vmul.f32 %v6886_v2, %v6870_v19 }
 0x3d5   : > { %v6926_v10 = vpop.permute.xlu1 %6925  ;;  %v6930_v23 = vpop.permute.xlu0 %6929 }
 0x3d6   : > { %v6972_v8 = vadd.f32 %v6926_v10, %v6892_v38  ;;  %v6974_v27 = vadd.f32 %v6930_v23, %v6894_v32  ;;  %v6899_v32 = vmul.f32 %v6883_v45, %v6867_v12  ;;  %v6826_v10 = vld [vmem:[%s8907_s14 + $0x68] sm:$0xff]  ;;  %v6900_v23 = vmul.f32 %v6884_v40, %v6868_v21 }
 0x3d7   : > { %v6849_v48 = vsub.f32 %v6826_v10, %v11242_v20 }
 0x3d8   : > { %6989 = vst.msk [vmem:[%s8912_s29 + $0x8] sm:$0xff] %vm6987_vm4, %v6972_v8  ;;  %6991 = vst.msk [vmem:[%s8912_s29 + $0x18] sm:$0xff] %vm6987_vm4, %v6974_v27  ;;  %v6871_v27 = vmul.f32 %v11253_v13, %v6848_v28 }
 0x3d9   : > { %v6936_v56 = vpop.permute.xlu1 %6935  ;;  %v6872_v0 = vmul.f32 %v11253_v13, %v6849_v48 }
 0x3da   : > { %v6977_v47 = vadd.f32 %v6936_v56, %v6897_v52  ;;  %v6887_v52 = vadd.f32 1.0, %v6784_v24  ;;  %v6851_v56 = vsub.f32 %v6828_v25, %v11242_v20 }
 0x3db   : > { %v6938_v4 = vpop.permute.xlu0 %6937 }
 0x3dc   : > { %6994 = vst.msk [vmem:[%s8912_s29 + $0x30] sm:$0xff] %vm6987_vm4, %v6977_v47  ;;  %v6978_v51 = vadd.f32 %v6938_v4, %v6898_v35  ;;  %v6787_v47 = vadd.f32 %v11234_v41, %v11220_v60  ;;  %v6903_v29 = vmul.f32 %v6887_v52, %v6871_v27  ;;  %v6905_v35 = vmul.f32 %v6889_v7, %v6873_v36 }
 0x3dd   : > { %v6932_v62 = vpop.permute.xlu1 %6931  ;;  %v6874_v11 = vmul.f32 %v11253_v13, %v6851_v56 }
 0x3de   : > { %v6975_v17 = vadd.f32 %v6932_v62, %v6895_v53  ;;  %6995 = vst.msk [vmem:[%s8912_s29 + $0x38] sm:$0xff] %vm6987_vm4, %v6978_v51  ;;  %v6904_v53 = vmul.f32 %v6888_v46, %v6872_v0  ;;  %v6890_v6 = vadd.f32 1.0, %v6787_v47 }
 0x3df   : > { %v6934_v57 = vpop.permute.xlu0 %6933 }
 0x3e0   : > { %6992 = vst.msk [vmem:[%s8912_s29 + $0x20] sm:$0xff] %vm6987_vm4, %v6975_v17  ;;  %v6976_v31 = vadd.f32 %v6934_v57, %v6896_v61  ;;  %v6906_v60 = vmul.f32 %v6890_v6, %v6874_v11 }
 0x3e1   : > { %v6944_v49 = vpop.permute.xlu1 %6943 }
 0x3e2   : > { %6993 = vst.msk [vmem:[%s8912_s29 + $0x28] sm:$0xff] %vm6987_vm4, %v6976_v31  ;;  %v6981_v42 = vadd.f32 %v6944_v49, %v6901_v33 }
 0x3e3   : > { %v6946_v22 = vpop.permute.xlu0 %6945 }
 0x3e4   : > { %6998 = vst.msk [vmem:[%s8912_s29 + $0x50] sm:$0xff] %vm6987_vm4, %v6981_v42  ;;  %v6982_v38 = vadd.f32 %v6946_v22, %v6902_v3 }
 0x3e5   : > { %v6940_v34 = vpop.permute.xlu1 %6939 }
 0x3e6   : > { %v6979_v30 = vadd.f32 %v6940_v34, %v6899_v32  ;;  %6999 = vst.msk [vmem:[%s8912_s29 + $0x58] sm:$0xff] %vm6987_vm4, %v6982_v38 }
 0x3e7   : > { %v6942_v8 = vpop.permute.xlu0 %6941 }
 0x3e8   : > { %6996 = vst.msk [vmem:[%s8912_s29 + $0x40] sm:$0xff] %vm6987_vm4, %v6979_v30  ;;  %v6980_v18 = vadd.f32 %v6942_v8, %v6900_v23 }
 0x3e9   : > { %v6948_v37 = vpop.permute.xlu1 %6947 }
 0x3ea   : > { %6997 = vst.msk [vmem:[%s8912_s29 + $0x48] sm:$0xff] %vm6987_vm4, %v6980_v18  ;;  %v6983_v14 = vadd.f32 %v6948_v37, %v6903_v29 }
 0x3ec   : > { %7000 = vst.msk [vmem:[%s8912_s29 + $0x60] sm:$0xff] %vm6987_vm4, %v6983_v14 }
 0x3ed   : > { %v6952_v9 = vpop.permute.xlu1 %6951  ;;  %v6950_v20 = vpop.permute.xlu0 %6949 }
 0x3ee   : > { %v6985_v4 = vadd.f32 %v6952_v9, %v6905_v35  ;;  %v6984_v62 = vadd.f32 %v6950_v20, %v6904_v53 }
 0x3f0   : > { %7002 = vst.msk [vmem:[%s8912_s29 + $0x70] sm:$0xff] %vm6987_vm4, %v6985_v4  ;;  %7001 = vst.msk [vmem:[%s8912_s29 + $0x68] sm:$0xff] %vm6987_vm4, %v6984_v62 }
 0x3f1   : > { %v6954_v41 = vpop.permute.xlu0 %6953 }
 0x3f2   : > { %v6986_v51 = vadd.f32 %v6954_v41, %v6906_v60 }
 0x3f4   : > { %7003 = vst.msk [vmem:[%s8912_s29 + $0x78] sm:$0xff] %vm6987_vm4, %v6986_v51 }
 0x3f5 PF: > { %s19_s13 = sadd.s32 1, %s8780_s13   ;;  %s11462_s10 = sld [smem:[#allocation3_spill]] }
 0x3f6   : > { %p16_p10 = scmp.ge.s32.totalorder %s19_s13, 6   ;;  %s11463_s14 = sld [smem:[#allocation4_spill]] }
 0x3f7   : > { %s11464_s12 = sld [smem:[#allocation5_spill]]  ;;  %s11465_s30 = smov %s8772_s11 }
 0x3f8   :  { %18 = sbr.rel (!%p16_p10) target bundleno = 3 (0x3), region = 124 }
 0x3fc   : > { %s11466_s11 = smov %s11463_s14 }

</bundles_post_ra>
